<compile_context>
chip_gen: v7x
topology: tpu7x:2x2x1
jax: 0.10.0
libtpu: 0.0.40
codegen_flags: <defaults>
</compile_context>

<pallas_src>
import functools

import jax
import jax.numpy as jnp
from jax import lax
from jax.experimental import pallas as pl
from jax.experimental.pallas import tpu as pltpu


# ----------------------------------------------------------------------------- helpers
def _gelu(v):
    # tanh-approximate GELU (torch.nn.GELU(approximate="tanh")); tanh -> EUP.
    u = v + 0.044715 * (v * v * v)
    return 0.5 * v * (1.0 + jnp.tanh(0.7978845608028654 * u))


def _sigmoid(v):
    return 1.0 / (1.0 + jnp.exp(-v))


_ROLL_SIGN = None


def _roll_sign():
    """Sign s such that pltpu.roll(x, (s*off) % n, axis=-1)[..., p] == x[..., (p+off) % n].

    pltpu.roll follows jnp.roll semantics (s = -1); verified once at runtime by a
    tiny probe kernel so the dwconv tap rotation can never be flipped.  Falls
    back to the documented convention if the probe cannot run concretely.
    """
    global _ROLL_SIGN
    if _ROLL_SIGN is None:
        try:
            def k(x_ref, o_ref):
                o_ref[...] = pltpu.roll(x_ref[...], 1, axis=1)

            x = jnp.tile(jnp.arange(128, dtype=jnp.float32)[None, :], (8, 1))
            y = pl.pallas_call(
                k, out_shape=jax.ShapeDtypeStruct((8, 128), jnp.float32))(x)
            _ROLL_SIGN = -1 if bool(jnp.allclose(y, jnp.roll(x, 1, axis=1))) else 1
        except Exception:
            _ROLL_SIGN = -1
    return _ROLL_SIGN


def _device_kind():
    try:
        return jax.devices()[0].device_kind.lower()
    except Exception:
        return ""


def _default_compute_dtype():
    # bf16 elementwise path on bf16-native VPU/EUP chips (v6e, v7x); f32 otherwise.
    kind = _device_kind()
    if any(tag in kind for tag in ("v6", "v7", "7x")):
        return jnp.bfloat16
    return jnp.float32


def _is_dual_tensorcore():
    # chips where a "parallel" grid axis is sharded over more than one TensorCore
    kind = _device_kind()
    return any(tag in kind for tag in ("v7", "7x", "v4", "v5p"))


def _pick_nt(n_imgs, c, hw, *, dual_core):
    """Images folded into one grid step.  Single-TC chips: as large as the
    (conservative, generation-safe) VMEM I/O budget allows, grid may be 1.
    Dual-TC chips: keep an even number (>=2) of grid steps."""
    per_img = 2 * c * hw * 4                     # in + out f32 block bytes
    cap = max(1, min(n_imgs, 16, (4 << 20) // max(per_img, 1)))
    best, best_dual = 1, None
    for nt in range(1, cap + 1):
        if n_imgs % nt:
            continue
        steps = n_imgs // nt
        best = nt
        if steps >= 2 and steps % 2 == 0:
            best_dual = nt
    if dual_core:
        if best_dual is not None:
            return best_dual
        for nt in range(cap, 0, -1):
            if n_imgs % nt == 0 and n_imgs // nt >= 2:
                return nt
    return best


def _build_masks(h, w, convs, dtype):
    """Border masks for the depthwise convs, one (1, h*w) row per mask.

    For each (k, dil): k w-direction masks indexed by kw, expressed in the
    *source* frame (valid after the pltpu.roll by the tap offset), followed by
    k h-direction masks indexed by kh, expressed in the *output* frame (these
    also clear rows where the roll wrapped vertically).
    Returned shape: (sum 2k, 1, h*w).
    """
    hw = h * w
    w_idx = jnp.arange(hw, dtype=jnp.int32) % w
    h_idx = jnp.arange(hw, dtype=jnp.int32) // w
    rows = []
    for k, dil in convs:
        pad = (k // 2) * dil
        for kw in range(k):
            dw = kw * dil - pad
            if dw >= 0:
                rows.append(w_idx >= dw)
            else:
                rows.append(w_idx < w + dw)
        for kh in range(k):
            dh = kh * dil - pad
            rows.append((h_idx + dh >= 0) & (h_idx + dh < h))
    return jnp.stack(rows, axis=0)[:, None, :].astype(dtype)


# ----------------------------------------------------------------------------- kernel
def _tau_ffn_kernel(x_ref, pw_ref, dwA_ref, dwM_ref, se_ref, m1w_ref, m2w_ref,
                    vecC_ref, vecH_ref, mask_ref, o_ref, *, W, cdt, roll_sign):
    """One grid step processes an (Nt, C, HW) slab of images (lane-dense HW)."""
    Nt, C, HW = x_ref.shape
    f32 = jnp.float32

    def dwconv(src, wmat, wbase, bias, mbase, *, k, dil):
        """Depthwise 'same' conv (PyTorch cross-correlation) in (Cc, HW) layout.

        src   : (Cc, HW) activation, compute dtype
        wmat  : (Cc, >= wbase + k*k) depthwise weights, tap index kh*k + kw
        bias  : (Cc, 1) f32
        mbase : first mask row for this conv in mask_ref
        Each tap is an XLU lane rotation of a per-kw pre-masked copy of src;
        the w-border mask is applied once per kw, the h-border mask once per kh
        on the partial sum.  Tap math runs in the compute dtype; the per-kh
        partial sums accumulate in f32.
        """
        pad = (k // 2) * dil
        srcs = []
        for kw in range(k):
            if kw * dil - pad == 0:
                srcs.append(src)                          # centre column: mask == 1
            else:
                srcs.append(src * mask_ref[mbase + kw])
        acc = None
        for kh in range(k):
            dh = kh * dil - pad
            inner = None
            for kw in range(k):
                dw = kw * dil - pad
                off = dh * W + dw
                tap = srcs[kw] if off == 0 else pltpu.roll(
                    srcs[kw], (roll_sign * off) % HW, axis=1)
                idx = wbase + kh * k + kw
                term = tap * wmat[:, idx:idx + 1]
                inner = term if inner is None else inner + term
            if dh != 0:
                inner = inner * mask_ref[mbase + k + kh]
            acc = inner.astype(f32) if acc is None else acc + inner.astype(f32)
        return acc + bias

    def per_image(n, carry):
        x2 = x_ref[n]                                     # (C, HW) f32
        xc = x2.astype(cdt)

        # ---- attention branch: z + ls1 * TemporalAttention(BN1(z)) ----------
        xn1 = xc * vecC_ref[:, 0:1].astype(cdt) + vecC_ref[:, 1:2].astype(cdt)
        a = _gelu((jnp.dot(pw_ref[0:C, :], xn1,
                           preferred_element_type=f32)
                   + vecC_ref[:, 2:3]).astype(cdt))       # (C, HW) cdt

        wA = dwA_ref[...]                                 # (C, 25 + 49), cdt
        c0 = dwconv(a, wA, 0, vecC_ref[:, 3:4], 0, k=5, dil=1)
        cs = dwconv(c0.astype(cdt), wA, 25, vecC_ref[:, 4:5], 10, k=7, dil=3)
        f_x = (jnp.dot(pw_ref[C:2 * C, :], cs.astype(cdt),
                       preferred_element_type=f32) + vecC_ref[:, 5:6])

        # squeeze-excite on u = a (bias-free fc pair, as in OpenSTL TAU)
        a32 = a.astype(f32)
        m = jnp.sum(a32, axis=1, keepdims=True) * (1.0 / HW)              # (C, 1)
        h1 = jnp.maximum(
            jnp.sum(se_ref[0:C, :] * m, axis=0, keepdims=True), 0.0)      # (1, Cr)
        se = _sigmoid(
            jnp.sum(se_ref[C:2 * C, :] * h1, axis=1, keepdims=True))      # (C, 1)

        g = (se * f_x) * a32
        attn = (jnp.dot(pw_ref[2 * C:3 * C, :], g.astype(cdt),
                        preferred_element_type=f32)
                + vecC_ref[:, 6:7] + xn1.astype(f32))
        y1 = x2 + vecC_ref[:, 7:8] * attn                 # f32 residual stream

        # ---- MLP branch: z + ls2 * MixMlp(BN2(z)) ----------------------------
        # (BN2 folded into m1w/m1b, layer_scale_2 folded into m2w/m2b host-side)
        hid = (jnp.dot(m1w_ref[...], y1.astype(cdt),
                       preferred_element_type=f32) + vecH_ref[:, 0:1])    # (Ch, HW)
        hd = dwconv(hid.astype(cdt), dwM_ref[...], 0, vecH_ref[:, 1:2], 24,
                    k=3, dil=1)
        hg = _gelu(hd.astype(cdt))
        y2 = (y1 + jnp.dot(m2w_ref[...], hg, preferred_element_type=f32)
              + vecC_ref[:, 8:9])

        # ---- outer residual of layerNormFeedForward: out = x + TAUSubBlock(x)
        o_ref[n] = (x2 + y2).astype(o_ref.dtype)
        return carry

    lax.fori_loop(0, Nt, per_image, 0)


# ----------------------------------------------------------------------------- wrapper
def layer_norm_feed_forward(x, p, *, eps=1e-5, compute_dtype=None):
    """y = x + TAUSubBlock(x.reshape(b*c, t, h, w)).view(b, c, t, h, w), eval mode."""
    b, c, t, h, w = x.shape
    C, HW, N = t, h * w, b * c
    Ch = 4 * C
    cdt = _default_compute_dtype() if compute_dtype is None else compute_dtype
    f32 = jnp.float32

    # (b, c, t, h, w) -> (N, C=t, HW=h*w): contiguous, no HBM transpose needed.
    xr = x.reshape(N, C, HW).astype(f32)

    def bn_affine(prefix):   # eval-mode BN folded into per-channel scale/shift
        scale = p[f"{prefix}_weight"] / jnp.sqrt(p[f"{prefix}_running_var"] + eps)
        shift = p[f"{prefix}_bias"] - p[f"{prefix}_running_mean"] * scale
        return scale, shift

    def pwm(name):           # 1x1 conv weight (Cout, Cin, 1, 1) -> (Cout, Cin)
        return p[name][:, :, 0, 0]

    def dwk(name, k):        # depthwise (Cc, 1, k, k) -> (Cc, k*k), idx = kh*k+kw
        return p[name][:, 0, :, :].reshape(p[name].shape[0], k * k)

    bn1s, bn1b = bn_affine("bn1")
    bn2s, bn2b = bn_affine("bn2")

    # host-side weight folding: BN2 -> mlp_fc1, layer_scale_2 -> mlp_fc2
    w_fc1 = pwm("mlp_fc1_weight")
    m1w = w_fc1 * bn2s[None, :]
    m1b = w_fc1 @ bn2b + p["mlp_fc1_bias"]
    w_fc2 = pwm("mlp_fc2_weight")
    ls2 = p["layer_scale_2"]
    m2w = ls2[:, None] * w_fc2
    m2b = ls2 * p["mlp_fc2_bias"]

    # packed parameters (fewer BlockSpecs / DMA descriptors / padded VMEM tiles)
    pw3 = jnp.concatenate([pwm("proj1_weight"), pwm("conv1_weight"),
                           pwm("proj2_weight")], axis=0).astype(cdt)       # (3C, C)
    dwA = jnp.concatenate([dwk("conv0_weight", 5),
                           dwk("convsp_weight", 7)], axis=1).astype(cdt)   # (C, 74)
    dwM = dwk("mlp_dw_weight", 3).astype(cdt)                              # (Ch, 9)
    seW = jnp.concatenate([p["se_fc1_weight"].T,
                           p["se_fc2_weight"]], axis=0).astype(f32)        # (2C, Cr)
    vecC = jnp.stack([bn1s, bn1b, p["proj1_bias"], p["conv0_bias"],
                      p["convsp_bias"], p["conv1_bias"], p["proj2_bias"],
                      p["layer_scale_1"], m2b], axis=1).astype(f32)        # (C, 9)
    vecH = jnp.stack([m1b, p["mlp_dw_bias"]], axis=1).astype(f32)          # (Ch, 2)
    masks = _build_masks(h, w, [(5, 1), (7, 3), (3, 1)], cdt)              # (30,1,HW)

    param_args = [pw3, dwA, dwM, seW, m1w.astype(cdt), m2w.astype(cdt),
                  vecC, vecH, masks]

    Nt = _pick_nt(N, C, HW, dual_core=_is_dual_tensorcore())
    grid = (N // Nt,)

    def full_spec(a):
        zeros = (0,) * a.ndim
        return pl.BlockSpec(a.shape, lambda i, _z=zeros: _z)

    grid_spec = pltpu.PrefetchScalarGridSpec(
        num_scalar_prefetch=0,
        grid=grid,
        in_specs=[pl.BlockSpec((Nt, C, HW), lambda i: (i, 0, 0))]
                 + [full_spec(a) for a in param_args],
        out_specs=pl.BlockSpec((Nt, C, HW), lambda i: (i, 0, 0)),
    )

    out = pl.pallas_call(
        functools.partial(_tau_ffn_kernel, W=w, cdt=cdt, roll_sign=_roll_sign()),
        out_shape=jax.ShapeDtypeStruct((N, C, HW), f32),
        grid_spec=grid_spec,
        compiler_params=pltpu.CompilerParams(
            dimension_semantics=("parallel",)),
    )(xr, *param_args)

    # (N, C, HW) -> (b, c, t, h, w): contiguous, no transpose needed.
    return out.reshape(b, c, t, h, w).astype(x.dtype)


# ----------------------------------------------------------------------------- params
def init_params(key, d_model):
    """Deterministic synthetic parameters in PyTorch-native shapes."""
    C = d_model
    Ch = 4 * C
    red = max(C // 16, 4)
    Cr = max(C // red, 1)
    keys = iter(jax.random.split(key, 40))

    def nrm(shape, scale=0.1):
        return scale * jax.random.normal(next(keys), shape, dtype=jnp.float32)

    p = {}
    for name in ("bn1", "bn2"):
        p[f"{name}_weight"] = 1.0 + nrm((C,))
        p[f"{name}_bias"] = nrm((C,))
        p[f"{name}_running_mean"] = nrm((C,))
        p[f"{name}_running_var"] = jax.random.uniform(
            next(keys), (C,), minval=0.5, maxval=1.5, dtype=jnp.float32)
    # TemporalAttention
    p["proj1_weight"] = nrm((C, C, 1, 1));   p["proj1_bias"] = nrm((C,))
    p["conv0_weight"] = nrm((C, 1, 5, 5));   p["conv0_bias"] = nrm((C,))
    p["convsp_weight"] = nrm((C, 1, 7, 7));  p["convsp_bias"] = nrm((C,))
    p["conv1_weight"] = nrm((C, C, 1, 1));   p["conv1_bias"] = nrm((C,))
    p["se_fc1_weight"] = nrm((Cr, C))        # Linear(C, Cr, bias=False)
    p["se_fc2_weight"] = nrm((C, Cr))        # Linear(Cr, C, bias=False)
    p["proj2_weight"] = nrm((C, C, 1, 1));   p["proj2_bias"] = nrm((C,))
    p["layer_scale_1"] = 1e-2 * jnp.ones((C,), jnp.float32)
    # MixMlp
    p["mlp_fc1_weight"] = nrm((Ch, C, 1, 1)); p["mlp_fc1_bias"] = nrm((Ch,))
    p["mlp_dw_weight"] = nrm((Ch, 1, 3, 3));  p["mlp_dw_bias"] = nrm((Ch,))
    p["mlp_fc2_weight"] = nrm((C, Ch, 1, 1)); p["mlp_fc2_bias"] = nrm((C,))
    p["layer_scale_2"] = 1e-2 * jnp.ones((C,), jnp.float32)
    return p


if __name__ == "__main__":
    key = jax.random.PRNGKey(0)
    kx, kp = jax.random.split(key)
    b, c, t, h, w = 2, 4, 8, 16, 16      # d_model = t = 8
    x = jax.random.normal(kx, (b, c, t, h, w), dtype=jnp.float32)
    params = init_params(kp, t)

    y = jax.block_until_ready(layer_norm_feed_forward(x, params))
    assert y.shape == x.shape and y.dtype == x.dtype
    assert bool(jnp.all(jnp.isfinite(y)))
    print("KERNEL_OK")
</pallas_src>

<mosaic_0001>
module attributes {stable_mosaic.version = 11 : i64} {
  func.func @k(%arg0: memref<8x128xf32, #tpu.memory_space<vmem>>, %arg1: memref<8x128xf32, #tpu.memory_space<vmem>>) attributes {dimension_semantics = [], scalar_prefetch = 0 : i64, scratch_operands = 0 : i64, tpu.core_type = #tpu.core_type<tc>} {
    %c0 = arith.constant 0 : index
    %c0_0 = arith.constant 0 : index
    %0 = vector.load %arg0[%c0, %c0_0] : memref<8x128xf32, #tpu.memory_space<vmem>>, vector<8x128xf32>
    %c1_i32 = arith.constant 1 : i32
    %1 = tpu.dynamic_rotate %0 by %c1_i32 dim 1 : vector<8x128xf32>, i32 -> vector<8x128xf32>
    %c0_1 = arith.constant 0 : index
    %c0_2 = arith.constant 0 : index
    %2 = vector.load %arg1[%c0_1, %c0_2] : memref<8x128xf32, #tpu.memory_space<vmem>>, vector<8x128xf32>
    tpu.vector_store %arg1[%c0_1, %c0_2], %1 {strides = array<i32>} : memref<8x128xf32, #tpu.memory_space<vmem>>, vector<8x128xf32>,
    return
  }
}

module attributes {stable_mosaic.version = 11 : i64} {
  func.func @_tau_ffn_kernel(%arg0: i32, %arg1: memref<8x8x256xf32, #tpu.memory_space<vmem>>, %arg2: memref<24x8xf32, #tpu.memory_space<vmem>>, %arg3: memref<8x74xf32, #tpu.memory_space<vmem>>, %arg4: memref<32x9xf32, #tpu.memory_space<vmem>>, %arg5: memref<16x2xf32, #tpu.memory_space<vmem>>, %arg6: memref<32x8xf32, #tpu.memory_space<vmem>>, %arg7: memref<8x32xf32, #tpu.memory_space<vmem>>, %arg8: memref<8x9xf32, #tpu.memory_space<vmem>>, %arg9: memref<32x2xf32, #tpu.memory_space<vmem>>, %arg10: memref<30x1x256xf32, #tpu.memory_space<vmem>>, %arg11: memref<8x8x256xf32, #tpu.memory_space<vmem>>) attributes {dimension_semantics = [#tpu.dimension_semantics<parallel>], iteration_bounds = array<i64: 1>, scalar_prefetch = 0 : i64, scratch_operands = 0 : i64, tpu.core_type = #tpu.core_type<tc>, window_params = [{transform_indices = @transform_0, window_bounds = array<i64: 8, 8, 256>}, {pipeline_mode = #tpu.pipeline_mode<synchronous>, transform_indices = @transform_1, window_bounds = array<i64: 24, 8>}, {pipeline_mode = #tpu.pipeline_mode<synchronous>, transform_indices = @transform_2, window_bounds = array<i64: 8, 74>}, {pipeline_mode = #tpu.pipeline_mode<synchronous>, transform_indices = @transform_3, window_bounds = array<i64: 32, 9>}, {pipeline_mode = #tpu.pipeline_mode<synchronous>, transform_indices = @transform_4, window_bounds = array<i64: 16, 2>}, {pipeline_mode = #tpu.pipeline_mode<synchronous>, transform_indices = @transform_5, window_bounds = array<i64: 32, 8>}, {pipeline_mode = #tpu.pipeline_mode<synchronous>, transform_indices = @transform_6, window_bounds = array<i64: 8, 32>}, {pipeline_mode = #tpu.pipeline_mode<synchronous>, transform_indices = @transform_7, window_bounds = array<i64: 8, 9>}, {pipeline_mode = #tpu.pipeline_mode<synchronous>, transform_indices = @transform_8, window_bounds = array<i64: 32, 2>}, {pipeline_mode = #tpu.pipeline_mode<synchronous>, transform_indices = @transform_9, window_bounds = array<i64: 30, 1, 256>}, {transform_indices = @transform_10, window_bounds = array<i64: 8, 8, 256>}]} {
    %c0_i32 = arith.constant 0 : i32
    %c8_i32 = arith.constant 8 : i32
    %0 = arith.addi %c0_i32, %c8_i32 : i32
    %c1_i32 = arith.constant 1 : i32
    scf.for %arg12 = %c0_i32 to %0 step %c1_i32  : i32 {
      %1 = arith.index_cast %arg12 : i32 to index
      %c0 = arith.constant 0 : index
      %c0_1 = arith.constant 0 : index
      %2 = vector.load %arg1[%1, %c0, %c0_1] : memref<8x8x256xf32, #tpu.memory_space<vmem>>, vector<1x8x256xf32>
      %3 = vector.shape_cast %2 : vector<1x8x256xf32> to vector<8x256xf32>
      %c0_2 = arith.constant 0 : index
      %c0_3 = arith.constant 0 : index
      %4 = vector.load %arg8[%c0_2, %c0_3] : memref<8x9xf32, #tpu.memory_space<vmem>>, vector<8x1xf32>
      %5 = vector.broadcast %4 : vector<8x1xf32> to vector<8x256xf32>
      %6 = arith.mulf %3, %5 : vector<8x256xf32>
      %c0_4 = arith.constant 0 : index
      %c1 = arith.constant 1 : index
      %7 = vector.load %arg8[%c0_4, %c1] : memref<8x9xf32, #tpu.memory_space<vmem>>, vector<8x1xf32>
      %8 = vector.broadcast %7 : vector<8x1xf32> to vector<8x256xf32>
      %9 = arith.addf %6, %8 : vector<8x256xf32>
      %c0_5 = arith.constant 0 : index
      %c0_6 = arith.constant 0 : index
      %10 = vector.load %arg2[%c0_5, %c0_6] : memref<24x8xf32, #tpu.memory_space<vmem>>, vector<8x8xf32>
      %cst = arith.constant dense<0.000000e+00> : vector<8x256xf32>
      %11 = tpu.matmul %10, %9, %cst {dimension_numbers = #tpu.dot_dimension_numbers<[1], [0], [0], [1], [0, 0, 1, 1], [], []>} : vector<8x8xf32>, vector<8x256xf32>, vector<8x256xf32> -> vector<8x256xf32>
      %c0_7 = arith.constant 0 : index
      %c2 = arith.constant 2 : index
      %12 = vector.load %arg8[%c0_7, %c2] : memref<8x9xf32, #tpu.memory_space<vmem>>, vector<8x1xf32>
      %13 = vector.broadcast %12 : vector<8x1xf32> to vector<8x256xf32>
      %14 = arith.addf %11, %13 : vector<8x256xf32>
      %15 = arith.mulf %14, %14 : vector<8x256xf32>
      %16 = arith.mulf %15, %14 : vector<8x256xf32>
      %cst_8 = arith.constant 4.471500e-02 : f32
      %17 = vector.broadcast %cst_8 : f32 to vector<8x256xf32>
      %18 = arith.mulf %17, %16 : vector<8x256xf32>
      %19 = arith.addf %14, %18 : vector<8x256xf32>
      %cst_9 = arith.constant 5.000000e-01 : f32
      %20 = vector.broadcast %cst_9 : f32 to vector<8x256xf32>
      %21 = arith.mulf %20, %14 : vector<8x256xf32>
      %cst_10 = arith.constant 0.797884583 : f32
      %22 = vector.broadcast %cst_10 : f32 to vector<8x256xf32>
      %23 = arith.mulf %22, %19 : vector<8x256xf32>
      %24 = math.tanh %23 : vector<8x256xf32>
      %cst_11 = arith.constant 1.000000e+00 : f32
      %25 = vector.broadcast %cst_11 : f32 to vector<8x256xf32>
      %26 = arith.addf %25, %24 : vector<8x256xf32>
      %27 = arith.mulf %21, %26 : vector<8x256xf32>
      %c0_12 = arith.constant 0 : index
      %c0_13 = arith.constant 0 : index
      %28 = vector.load %arg3[%c0_12, %c0_13] : memref<8x74xf32, #tpu.memory_space<vmem>>, vector<8x74xf32>
      %c0_14 = arith.constant 0 : index
      %c3 = arith.constant 3 : index
      %29 = vector.load %arg8[%c0_14, %c3] : memref<8x9xf32, #tpu.memory_space<vmem>>, vector<8x1xf32>
      %c0_15 = arith.constant 0 : index
      %c0_16 = arith.constant 0 : index
      %c0_17 = arith.constant 0 : index
      %30 = vector.load %arg10[%c0_15, %c0_16, %c0_17] : memref<30x1x256xf32, #tpu.memory_space<vmem>>, vector<1x1x256xf32>
      %31 = vector.shape_cast %30 : vector<1x1x256xf32> to vector<1x256xf32>
      %32 = vector.broadcast %31 : vector<1x256xf32> to vector<8x256xf32>
      %33 = arith.mulf %27, %32 : vector<8x256xf32>
      %c1_18 = arith.constant 1 : index
      %c0_19 = arith.constant 0 : index
      %c0_20 = arith.constant 0 : index
      %34 = vector.load %arg10[%c1_18, %c0_19, %c0_20] : memref<30x1x256xf32, #tpu.memory_space<vmem>>, vector<1x1x256xf32>
      %35 = vector.shape_cast %34 : vector<1x1x256xf32> to vector<1x256xf32>
      %36 = vector.broadcast %35 : vector<1x256xf32> to vector<8x256xf32>
      %37 = arith.mulf %27, %36 : vector<8x256xf32>
      %c3_21 = arith.constant 3 : index
      %c0_22 = arith.constant 0 : index
      %c0_23 = arith.constant 0 : index
      %38 = vector.load %arg10[%c3_21, %c0_22, %c0_23] : memref<30x1x256xf32, #tpu.memory_space<vmem>>, vector<1x1x256xf32>
      %39 = vector.shape_cast %38 : vector<1x1x256xf32> to vector<1x256xf32>
      %40 = vector.broadcast %39 : vector<1x256xf32> to vector<8x256xf32>
      %41 = arith.mulf %27, %40 : vector<8x256xf32>
      %c4 = arith.constant 4 : index
      %c0_24 = arith.constant 0 : index
      %c0_25 = arith.constant 0 : index
      %42 = vector.load %arg10[%c4, %c0_24, %c0_25] : memref<30x1x256xf32, #tpu.memory_space<vmem>>, vector<1x1x256xf32>
      %43 = vector.shape_cast %42 : vector<1x1x256xf32> to vector<1x256xf32>
      %44 = vector.broadcast %43 : vector<1x256xf32> to vector<8x256xf32>
      %45 = arith.mulf %27, %44 : vector<8x256xf32>
      %c34_i32 = arith.constant 34 : i32
      %46 = tpu.dynamic_rotate %33 by %c34_i32 dim 1 : vector<8x256xf32>, i32 -> vector<8x256xf32>
      %47 = vector.extract_strided_slice %28 {offsets = [0, 0], sizes = [8, 1], strides = [1, 1]} : vector<8x74xf32> to vector<8x1xf32>
      %48 = vector.broadcast %47 : vector<8x1xf32> to vector<8x256xf32>
      %49 = arith.mulf %46, %48 : vector<8x256xf32>
      %c33_i32 = arith.constant 33 : i32
      %50 = tpu.dynamic_rotate %37 by %c33_i32 dim 1 : vector<8x256xf32>, i32 -> vector<8x256xf32>
      %51 = vector.extract_strided_slice %28 {offsets = [0, 1], sizes = [8, 1], strides = [1, 1]} : vector<8x74xf32> to vector<8x1xf32>
      %52 = vector.broadcast %51 : vector<8x1xf32> to vector<8x256xf32>
      %53 = arith.mulf %50, %52 : vector<8x256xf32>
      %54 = arith.addf %49, %53 : vector<8x256xf32>
      %c32_i32 = arith.constant 32 : i32
      %55 = tpu.dynamic_rotate %27 by %c32_i32 dim 1 : vector<8x256xf32>, i32 -> vector<8x256xf32>
      %56 = vector.extract_strided_slice %28 {offsets = [0, 2], sizes = [8, 1], strides = [1, 1]} : vector<8x74xf32> to vector<8x1xf32>
      %57 = vector.broadcast %56 : vector<8x1xf32> to vector<8x256xf32>
      %58 = arith.mulf %55, %57 : vector<8x256xf32>
      %59 = arith.addf %54, %58 : vector<8x256xf32>
      %c31_i32 = arith.constant 31 : i32
      %60 = tpu.dynamic_rotate %41 by %c31_i32 dim 1 : vector<8x256xf32>, i32 -> vector<8x256xf32>
      %61 = vector.extract_strided_slice %28 {offsets = [0, 3], sizes = [8, 1], strides = [1, 1]} : vector<8x74xf32> to vector<8x1xf32>
      %62 = vector.broadcast %61 : vector<8x1xf32> to vector<8x256xf32>
      %63 = arith.mulf %60, %62 : vector<8x256xf32>
      %64 = arith.addf %59, %63 : vector<8x256xf32>
      %c30_i32 = arith.constant 30 : i32
      %65 = tpu.dynamic_rotate %45 by %c30_i32 dim 1 : vector<8x256xf32>, i32 -> vector<8x256xf32>
      %66 = vector.extract_strided_slice %28 {offsets = [0, 4], sizes = [8, 1], strides = [1, 1]} : vector<8x74xf32> to vector<8x1xf32>
      %67 = vector.broadcast %66 : vector<8x1xf32> to vector<8x256xf32>
      %68 = arith.mulf %65, %67 : vector<8x256xf32>
      %69 = arith.addf %64, %68 : vector<8x256xf32>
      %c5 = arith.constant 5 : index
      %c0_26 = arith.constant 0 : index
      %c0_27 = arith.constant 0 : index
      %70 = vector.load %arg10[%c5, %c0_26, %c0_27] : memref<30x1x256xf32, #tpu.memory_space<vmem>>, vector<1x1x256xf32>
      %71 = vector.shape_cast %70 : vector<1x1x256xf32> to vector<1x256xf32>
      %72 = vector.broadcast %71 : vector<1x256xf32> to vector<8x256xf32>
      %73 = arith.mulf %69, %72 : vector<8x256xf32>
      %c18_i32 = arith.constant 18 : i32
      %74 = tpu.dynamic_rotate %33 by %c18_i32 dim 1 : vector<8x256xf32>, i32 -> vector<8x256xf32>
      %75 = vector.extract_strided_slice %28 {offsets = [0, 5], sizes = [8, 1], strides = [1, 1]} : vector<8x74xf32> to vector<8x1xf32>
      %76 = vector.broadcast %75 : vector<8x1xf32> to vector<8x256xf32>
      %77 = arith.mulf %74, %76 : vector<8x256xf32>
      %c17_i32 = arith.constant 17 : i32
      %78 = tpu.dynamic_rotate %37 by %c17_i32 dim 1 : vector<8x256xf32>, i32 -> vector<8x256xf32>
      %79 = vector.extract_strided_slice %28 {offsets = [0, 6], sizes = [8, 1], strides = [1, 1]} : vector<8x74xf32> to vector<8x1xf32>
      %80 = vector.broadcast %79 : vector<8x1xf32> to vector<8x256xf32>
      %81 = arith.mulf %78, %80 : vector<8x256xf32>
      %82 = arith.addf %77, %81 : vector<8x256xf32>
      %c16_i32 = arith.constant 16 : i32
      %83 = tpu.dynamic_rotate %27 by %c16_i32 dim 1 : vector<8x256xf32>, i32 -> vector<8x256xf32>
      %84 = vector.extract_strided_slice %28 {offsets = [0, 7], sizes = [8, 1], strides = [1, 1]} : vector<8x74xf32> to vector<8x1xf32>
      %85 = vector.broadcast %84 : vector<8x1xf32> to vector<8x256xf32>
      %86 = arith.mulf %83, %85 : vector<8x256xf32>
      %87 = arith.addf %82, %86 : vector<8x256xf32>
      %c15_i32 = arith.constant 15 : i32
      %88 = tpu.dynamic_rotate %41 by %c15_i32 dim 1 : vector<8x256xf32>, i32 -> vector<8x256xf32>
      %89 = vector.extract_strided_slice %28 {offsets = [0, 8], sizes = [8, 1], strides = [1, 1]} : vector<8x74xf32> to vector<8x1xf32>
      %90 = vector.broadcast %89 : vector<8x1xf32> to vector<8x256xf32>
      %91 = arith.mulf %88, %90 : vector<8x256xf32>
      %92 = arith.addf %87, %91 : vector<8x256xf32>
      %c14_i32 = arith.constant 14 : i32
      %93 = tpu.dynamic_rotate %45 by %c14_i32 dim 1 : vector<8x256xf32>, i32 -> vector<8x256xf32>
      %94 = vector.extract_strided_slice %28 {offsets = [0, 9], sizes = [8, 1], strides = [1, 1]} : vector<8x74xf32> to vector<8x1xf32>
      %95 = vector.broadcast %94 : vector<8x1xf32> to vector<8x256xf32>
      %96 = arith.mulf %93, %95 : vector<8x256xf32>
      %97 = arith.addf %92, %96 : vector<8x256xf32>
      %c6 = arith.constant 6 : index
      %c0_28 = arith.constant 0 : index
      %c0_29 = arith.constant 0 : index
      %98 = vector.load %arg10[%c6, %c0_28, %c0_29] : memref<30x1x256xf32, #tpu.memory_space<vmem>>, vector<1x1x256xf32>
      %99 = vector.shape_cast %98 : vector<1x1x256xf32> to vector<1x256xf32>
      %100 = vector.broadcast %99 : vector<1x256xf32> to vector<8x256xf32>
      %101 = arith.mulf %97, %100 : vector<8x256xf32>
      %102 = arith.addf %73, %101 : vector<8x256xf32>
      %c2_i32 = arith.constant 2 : i32
      %103 = tpu.dynamic_rotate %33 by %c2_i32 dim 1 : vector<8x256xf32>, i32 -> vector<8x256xf32>
      %104 = vector.extract_strided_slice %28 {offsets = [0, 10], sizes = [8, 1], strides = [1, 1]} : vector<8x74xf32> to vector<8x1xf32>
      %105 = vector.broadcast %104 : vector<8x1xf32> to vector<8x256xf32>
      %106 = arith.mulf %103, %105 : vector<8x256xf32>
      %c1_i32_30 = arith.constant 1 : i32
      %107 = tpu.dynamic_rotate %37 by %c1_i32_30 dim 1 : vector<8x256xf32>, i32 -> vector<8x256xf32>
      %108 = vector.extract_strided_slice %28 {offsets = [0, 11], sizes = [8, 1], strides = [1, 1]} : vector<8x74xf32> to vector<8x1xf32>
      %109 = vector.broadcast %108 : vector<8x1xf32> to vector<8x256xf32>
      %110 = arith.mulf %107, %109 : vector<8x256xf32>
      %111 = arith.addf %106, %110 : vector<8x256xf32>
      %112 = vector.extract_strided_slice %28 {offsets = [0, 12], sizes = [8, 1], strides = [1, 1]} : vector<8x74xf32> to vector<8x1xf32>
      %113 = vector.broadcast %112 : vector<8x1xf32> to vector<8x256xf32>
      %114 = arith.mulf %27, %113 : vector<8x256xf32>
      %115 = arith.addf %111, %114 : vector<8x256xf32>
      %c255_i32 = arith.constant 255 : i32
      %116 = tpu.dynamic_rotate %41 by %c255_i32 dim 1 : vector<8x256xf32>, i32 -> vector<8x256xf32>
      %117 = vector.extract_strided_slice %28 {offsets = [0, 13], sizes = [8, 1], strides = [1, 1]} : vector<8x74xf32> to vector<8x1xf32>
      %118 = vector.broadcast %117 : vector<8x1xf32> to vector<8x256xf32>
      %119 = arith.mulf %116, %118 : vector<8x256xf32>
      %120 = arith.addf %115, %119 : vector<8x256xf32>
      %c254_i32 = arith.constant 254 : i32
      %121 = tpu.dynamic_rotate %45 by %c254_i32 dim 1 : vector<8x256xf32>, i32 -> vector<8x256xf32>
      %122 = vector.extract_strided_slice %28 {offsets = [0, 14], sizes = [8, 1], strides = [1, 1]} : vector<8x74xf32> to vector<8x1xf32>
      %123 = vector.broadcast %122 : vector<8x1xf32> to vector<8x256xf32>
      %124 = arith.mulf %121, %123 : vector<8x256xf32>
      %125 = arith.addf %120, %124 : vector<8x256xf32>
      %126 = arith.addf %102, %125 : vector<8x256xf32>
      %c242_i32 = arith.constant 242 : i32
      %127 = tpu.dynamic_rotate %33 by %c242_i32 dim 1 : vector<8x256xf32>, i32 -> vector<8x256xf32>
      %128 = vector.extract_strided_slice %28 {offsets = [0, 15], sizes = [8, 1], strides = [1, 1]} : vector<8x74xf32> to vector<8x1xf32>
      %129 = vector.broadcast %128 : vector<8x1xf32> to vector<8x256xf32>
      %130 = arith.mulf %127, %129 : vector<8x256xf32>
      %c241_i32 = arith.constant 241 : i32
      %131 = tpu.dynamic_rotate %37 by %c241_i32 dim 1 : vector<8x256xf32>, i32 -> vector<8x256xf32>
      %132 = vector.extract_strided_slice %28 {offsets = [0, 16], sizes = [8, 1], strides = [1, 1]} : vector<8x74xf32> to vector<8x1xf32>
      %133 = vector.broadcast %132 : vector<8x1xf32> to vector<8x256xf32>
      %134 = arith.mulf %131, %133 : vector<8x256xf32>
      %135 = arith.addf %130, %134 : vector<8x256xf32>
      %c240_i32 = arith.constant 240 : i32
      %136 = tpu.dynamic_rotate %27 by %c240_i32 dim 1 : vector<8x256xf32>, i32 -> vector<8x256xf32>
      %137 = vector.extract_strided_slice %28 {offsets = [0, 17], sizes = [8, 1], strides = [1, 1]} : vector<8x74xf32> to vector<8x1xf32>
      %138 = vector.broadcast %137 : vector<8x1xf32> to vector<8x256xf32>
      %139 = arith.mulf %136, %138 : vector<8x256xf32>
      %140 = arith.addf %135, %139 : vector<8x256xf32>
      %c239_i32 = arith.constant 239 : i32
      %141 = tpu.dynamic_rotate %41 by %c239_i32 dim 1 : vector<8x256xf32>, i32 -> vector<8x256xf32>
      %142 = vector.extract_strided_slice %28 {offsets = [0, 18], sizes = [8, 1], strides = [1, 1]} : vector<8x74xf32> to vector<8x1xf32>
      %143 = vector.broadcast %142 : vector<8x1xf32> to vector<8x256xf32>
      %144 = arith.mulf %141, %143 : vector<8x256xf32>
      %145 = arith.addf %140, %144 : vector<8x256xf32>
      %c238_i32 = arith.constant 238 : i32
      %146 = tpu.dynamic_rotate %45 by %c238_i32 dim 1 : vector<8x256xf32>, i32 -> vector<8x256xf32>
      %147 = vector.extract_strided_slice %28 {offsets = [0, 19], sizes = [8, 1], strides = [1, 1]} : vector<8x74xf32> to vector<8x1xf32>
      %148 = vector.broadcast %147 : vector<8x1xf32> to vector<8x256xf32>
      %149 = arith.mulf %146, %148 : vector<8x256xf32>
      %150 = arith.addf %145, %149 : vector<8x256xf32>
      %c8 = arith.constant 8 : index
      %c0_31 = arith.constant 0 : index
      %c0_32 = arith.constant 0 : index
      %151 = vector.load %arg10[%c8, %c0_31, %c0_32] : memref<30x1x256xf32, #tpu.memory_space<vmem>>, vector<1x1x256xf32>
      %152 = vector.shape_cast %151 : vector<1x1x256xf32> to vector<1x256xf32>
      %153 = vector.broadcast %152 : vector<1x256xf32> to vector<8x256xf32>
      %154 = arith.mulf %150, %153 : vector<8x256xf32>
      %155 = arith.addf %126, %154 : vector<8x256xf32>
      %c226_i32 = arith.constant 226 : i32
      %156 = tpu.dynamic_rotate %33 by %c226_i32 dim 1 : vector<8x256xf32>, i32 -> vector<8x256xf32>
      %157 = vector.extract_strided_slice %28 {offsets = [0, 20], sizes = [8, 1], strides = [1, 1]} : vector<8x74xf32> to vector<8x1xf32>
      %158 = vector.broadcast %157 : vector<8x1xf32> to vector<8x256xf32>
      %159 = arith.mulf %156, %158 : vector<8x256xf32>
      %c225_i32 = arith.constant 225 : i32
      %160 = tpu.dynamic_rotate %37 by %c225_i32 dim 1 : vector<8x256xf32>, i32 -> vector<8x256xf32>
      %161 = vector.extract_strided_slice %28 {offsets = [0, 21], sizes = [8, 1], strides = [1, 1]} : vector<8x74xf32> to vector<8x1xf32>
      %162 = vector.broadcast %161 : vector<8x1xf32> to vector<8x256xf32>
      %163 = arith.mulf %160, %162 : vector<8x256xf32>
      %164 = arith.addf %159, %163 : vector<8x256xf32>
      %c224_i32 = arith.constant 224 : i32
      %165 = tpu.dynamic_rotate %27 by %c224_i32 dim 1 : vector<8x256xf32>, i32 -> vector<8x256xf32>
      %166 = vector.extract_strided_slice %28 {offsets = [0, 22], sizes = [8, 1], strides = [1, 1]} : vector<8x74xf32> to vector<8x1xf32>
      %167 = vector.broadcast %166 : vector<8x1xf32> to vector<8x256xf32>
      %168 = arith.mulf %165, %167 : vector<8x256xf32>
      %169 = arith.addf %164, %168 : vector<8x256xf32>
      %c223_i32 = arith.constant 223 : i32
      %170 = tpu.dynamic_rotate %41 by %c223_i32 dim 1 : vector<8x256xf32>, i32 -> vector<8x256xf32>
      %171 = vector.extract_strided_slice %28 {offsets = [0, 23], sizes = [8, 1], strides = [1, 1]} : vector<8x74xf32> to vector<8x1xf32>
      %172 = vector.broadcast %171 : vector<8x1xf32> to vector<8x256xf32>
      %173 = arith.mulf %170, %172 : vector<8x256xf32>
      %174 = arith.addf %169, %173 : vector<8x256xf32>
      %c222_i32 = arith.constant 222 : i32
      %175 = tpu.dynamic_rotate %45 by %c222_i32 dim 1 : vector<8x256xf32>, i32 -> vector<8x256xf32>
      %176 = vector.extract_strided_slice %28 {offsets = [0, 24], sizes = [8, 1], strides = [1, 1]} : vector<8x74xf32> to vector<8x1xf32>
      %177 = vector.broadcast %176 : vector<8x1xf32> to vector<8x256xf32>
      %178 = arith.mulf %175, %177 : vector<8x256xf32>
      %179 = arith.addf %174, %178 : vector<8x256xf32>
      %c9 = arith.constant 9 : index
      %c0_33 = arith.constant 0 : index
      %c0_34 = arith.constant 0 : index
      %180 = vector.load %arg10[%c9, %c0_33, %c0_34] : memref<30x1x256xf32, #tpu.memory_space<vmem>>, vector<1x1x256xf32>
      %181 = vector.shape_cast %180 : vector<1x1x256xf32> to vector<1x256xf32>
      %182 = vector.broadcast %181 : vector<1x256xf32> to vector<8x256xf32>
      %183 = arith.mulf %179, %182 : vector<8x256xf32>
      %184 = arith.addf %155, %183 : vector<8x256xf32>
      %185 = vector.broadcast %29 : vector<8x1xf32> to vector<8x256xf32>
      %186 = arith.addf %184, %185 : vector<8x256xf32>
      %c0_35 = arith.constant 0 : index
      %c4_36 = arith.constant 4 : index
      %187 = vector.load %arg8[%c0_35, %c4_36] : memref<8x9xf32, #tpu.memory_space<vmem>>, vector<8x1xf32>
      %c10 = arith.constant 10 : index
      %c0_37 = arith.constant 0 : index
      %c0_38 = arith.constant 0 : index
      %188 = vector.load %arg10[%c10, %c0_37, %c0_38] : memref<30x1x256xf32, #tpu.memory_space<vmem>>, vector<1x1x256xf32>
      %189 = vector.shape_cast %188 : vector<1x1x256xf32> to vector<1x256xf32>
      %190 = vector.broadcast %189 : vector<1x256xf32> to vector<8x256xf32>
      %191 = arith.mulf %186, %190 : vector<8x256xf32>
      %c11 = arith.constant 11 : index
      %c0_39 = arith.constant 0 : index
      %c0_40 = arith.constant 0 : index
      %192 = vector.load %arg10[%c11, %c0_39, %c0_40] : memref<30x1x256xf32, #tpu.memory_space<vmem>>, vector<1x1x256xf32>
      %193 = vector.shape_cast %192 : vector<1x1x256xf32> to vector<1x256xf32>
      %194 = vector.broadcast %193 : vector<1x256xf32> to vector<8x256xf32>
      %195 = arith.mulf %186, %194 : vector<8x256xf32>
      %c12 = arith.constant 12 : index
      %c0_41 = arith.constant 0 : index
      %c0_42 = arith.constant 0 : index
      %196 = vector.load %arg10[%c12, %c0_41, %c0_42] : memref<30x1x256xf32, #tpu.memory_space<vmem>>, vector<1x1x256xf32>
      %197 = vector.shape_cast %196 : vector<1x1x256xf32> to vector<1x256xf32>
      %198 = vector.broadcast %197 : vector<1x256xf32> to vector<8x256xf32>
      %199 = arith.mulf %186, %198 : vector<8x256xf32>
      %c14 = arith.constant 14 : index
      %c0_43 = arith.constant 0 : index
      %c0_44 = arith.constant 0 : index
      %200 = vector.load %arg10[%c14, %c0_43, %c0_44] : memref<30x1x256xf32, #tpu.memory_space<vmem>>, vector<1x1x256xf32>
      %201 = vector.shape_cast %200 : vector<1x1x256xf32> to vector<1x256xf32>
      %202 = vector.broadcast %201 : vector<1x256xf32> to vector<8x256xf32>
      %203 = arith.mulf %186, %202 : vector<8x256xf32>
      %c15 = arith.constant 15 : index
      %c0_45 = arith.constant 0 : index
      %c0_46 = arith.constant 0 : index
      %204 = vector.load %arg10[%c15, %c0_45, %c0_46] : memref<30x1x256xf32, #tpu.memory_space<vmem>>, vector<1x1x256xf32>
      %205 = vector.shape_cast %204 : vector<1x1x256xf32> to vector<1x256xf32>
      %206 = vector.broadcast %205 : vector<1x256xf32> to vector<8x256xf32>
      %207 = arith.mulf %186, %206 : vector<8x256xf32>
      %c16 = arith.constant 16 : index
      %c0_47 = arith.constant 0 : index
      %c0_48 = arith.constant 0 : index
      %208 = vector.load %arg10[%c16, %c0_47, %c0_48] : memref<30x1x256xf32, #tpu.memory_space<vmem>>, vector<1x1x256xf32>
      %209 = vector.shape_cast %208 : vector<1x1x256xf32> to vector<1x256xf32>
      %210 = vector.broadcast %209 : vector<1x256xf32> to vector<8x256xf32>
      %211 = arith.mulf %186, %210 : vector<8x256xf32>
      %c153_i32 = arith.constant 153 : i32
      %212 = tpu.dynamic_rotate %191 by %c153_i32 dim 1 : vector<8x256xf32>, i32 -> vector<8x256xf32>
      %213 = vector.extract_strided_slice %28 {offsets = [0, 25], sizes = [8, 1], strides = [1, 1]} : vector<8x74xf32> to vector<8x1xf32>
      %214 = vector.broadcast %213 : vector<8x1xf32> to vector<8x256xf32>
      %215 = arith.mulf %212, %214 : vector<8x256xf32>
      %c150_i32 = arith.constant 150 : i32
      %216 = tpu.dynamic_rotate %195 by %c150_i32 dim 1 : vector<8x256xf32>, i32 -> vector<8x256xf32>
      %217 = vector.extract_strided_slice %28 {offsets = [0, 26], sizes = [8, 1], strides = [1, 1]} : vector<8x74xf32> to vector<8x1xf32>
      %218 = vector.broadcast %217 : vector<8x1xf32> to vector<8x256xf32>
      %219 = arith.mulf %216, %218 : vector<8x256xf32>
      %220 = arith.addf %215, %219 : vector<8x256xf32>
      %c147_i32 = arith.constant 147 : i32
      %221 = tpu.dynamic_rotate %199 by %c147_i32 dim 1 : vector<8x256xf32>, i32 -> vector<8x256xf32>
      %222 = vector.extract_strided_slice %28 {offsets = [0, 27], sizes = [8, 1], strides = [1, 1]} : vector<8x74xf32> to vector<8x1xf32>
      %223 = vector.broadcast %222 : vector<8x1xf32> to vector<8x256xf32>
      %224 = arith.mulf %221, %223 : vector<8x256xf32>
      %225 = arith.addf %220, %224 : vector<8x256xf32>
      %c144_i32 = arith.constant 144 : i32
      %226 = tpu.dynamic_rotate %186 by %c144_i32 dim 1 : vector<8x256xf32>, i32 -> vector<8x256xf32>
      %227 = vector.extract_strided_slice %28 {offsets = [0, 28], sizes = [8, 1], strides = [1, 1]} : vector<8x74xf32> to vector<8x1xf32>
      %228 = vector.broadcast %227 : vector<8x1xf32> to vector<8x256xf32>
      %229 = arith.mulf %226, %228 : vector<8x256xf32>
      %230 = arith.addf %225, %229 : vector<8x256xf32>
      %c141_i32 = arith.constant 141 : i32
      %231 = tpu.dynamic_rotate %203 by %c141_i32 dim 1 : vector<8x256xf32>, i32 -> vector<8x256xf32>
      %232 = vector.extract_strided_slice %28 {offsets = [0, 29], sizes = [8, 1], strides = [1, 1]} : vector<8x74xf32> to vector<8x1xf32>
      %233 = vector.broadcast %232 : vector<8x1xf32> to vector<8x256xf32>
      %234 = arith.mulf %231, %233 : vector<8x256xf32>
      %235 = arith.addf %230, %234 : vector<8x256xf32>
      %c138_i32 = arith.constant 138 : i32
      %236 = tpu.dynamic_rotate %207 by %c138_i32 dim 1 : vector<8x256xf32>, i32 -> vector<8x256xf32>
      %237 = vector.extract_strided_slice %28 {offsets = [0, 30], sizes = [8, 1], strides = [1, 1]} : vector<8x74xf32> to vector<8x1xf32>
      %238 = vector.broadcast %237 : vector<8x1xf32> to vector<8x256xf32>
      %239 = arith.mulf %236, %238 : vector<8x256xf32>
      %240 = arith.addf %235, %239 : vector<8x256xf32>
      %c135_i32 = arith.constant 135 : i32
      %241 = tpu.dynamic_rotate %211 by %c135_i32 dim 1 : vector<8x256xf32>, i32 -> vector<8x256xf32>
      %242 = vector.extract_strided_slice %28 {offsets = [0, 31], sizes = [8, 1], strides = [1, 1]} : vector<8x74xf32> to vector<8x1xf32>
      %243 = vector.broadcast %242 : vector<8x1xf32> to vector<8x256xf32>
      %244 = arith.mulf %241, %243 : vector<8x256xf32>
      %245 = arith.addf %240, %244 : vector<8x256xf32>
      %c17 = arith.constant 17 : index
      %c0_49 = arith.constant 0 : index
      %c0_50 = arith.constant 0 : index
      %246 = vector.load %arg10[%c17, %c0_49, %c0_50] : memref<30x1x256xf32, #tpu.memory_space<vmem>>, vector<1x1x256xf32>
      %247 = vector.shape_cast %246 : vector<1x1x256xf32> to vector<1x256xf32>
      %248 = vector.broadcast %247 : vector<1x256xf32> to vector<8x256xf32>
      %249 = arith.mulf %245, %248 : vector<8x256xf32>
      %c105_i32 = arith.constant 105 : i32
      %250 = tpu.dynamic_rotate %191 by %c105_i32 dim 1 : vector<8x256xf32>, i32 -> vector<8x256xf32>
      %251 = vector.extract_strided_slice %28 {offsets = [0, 32], sizes = [8, 1], strides = [1, 1]} : vector<8x74xf32> to vector<8x1xf32>
      %252 = vector.broadcast %251 : vector<8x1xf32> to vector<8x256xf32>
      %253 = arith.mulf %250, %252 : vector<8x256xf32>
      %c102_i32 = arith.constant 102 : i32
      %254 = tpu.dynamic_rotate %195 by %c102_i32 dim 1 : vector<8x256xf32>, i32 -> vector<8x256xf32>
      %255 = vector.extract_strided_slice %28 {offsets = [0, 33], sizes = [8, 1], strides = [1, 1]} : vector<8x74xf32> to vector<8x1xf32>
      %256 = vector.broadcast %255 : vector<8x1xf32> to vector<8x256xf32>
      %257 = arith.mulf %254, %256 : vector<8x256xf32>
      %258 = arith.addf %253, %257 : vector<8x256xf32>
      %c99_i32 = arith.constant 99 : i32
      %259 = tpu.dynamic_rotate %199 by %c99_i32 dim 1 : vector<8x256xf32>, i32 -> vector<8x256xf32>
      %260 = vector.extract_strided_slice %28 {offsets = [0, 34], sizes = [8, 1], strides = [1, 1]} : vector<8x74xf32> to vector<8x1xf32>
      %261 = vector.broadcast %260 : vector<8x1xf32> to vector<8x256xf32>
      %262 = arith.mulf %259, %261 : vector<8x256xf32>
      %263 = arith.addf %258, %262 : vector<8x256xf32>
      %c96_i32 = arith.constant 96 : i32
      %264 = tpu.dynamic_rotate %186 by %c96_i32 dim 1 : vector<8x256xf32>, i32 -> vector<8x256xf32>
      %265 = vector.extract_strided_slice %28 {offsets = [0, 35], sizes = [8, 1], strides = [1, 1]} : vector<8x74xf32> to vector<8x1xf32>
      %266 = vector.broadcast %265 : vector<8x1xf32> to vector<8x256xf32>
      %267 = arith.mulf %264, %266 : vector<8x256xf32>
      %268 = arith.addf %263, %267 : vector<8x256xf32>
      %c93_i32 = arith.constant 93 : i32
      %269 = tpu.dynamic_rotate %203 by %c93_i32 dim 1 : vector<8x256xf32>, i32 -> vector<8x256xf32>
      %270 = vector.extract_strided_slice %28 {offsets = [0, 36], sizes = [8, 1], strides = [1, 1]} : vector<8x74xf32> to vector<8x1xf32>
      %271 = vector.broadcast %270 : vector<8x1xf32> to vector<8x256xf32>
      %272 = arith.mulf %269, %271 : vector<8x256xf32>
      %273 = arith.addf %268, %272 : vector<8x256xf32>
      %c90_i32 = arith.constant 90 : i32
      %274 = tpu.dynamic_rotate %207 by %c90_i32 dim 1 : vector<8x256xf32>, i32 -> vector<8x256xf32>
      %275 = vector.extract_strided_slice %28 {offsets = [0, 37], sizes = [8, 1], strides = [1, 1]} : vector<8x74xf32> to vector<8x1xf32>
      %276 = vector.broadcast %275 : vector<8x1xf32> to vector<8x256xf32>
      %277 = arith.mulf %274, %276 : vector<8x256xf32>
      %278 = arith.addf %273, %277 : vector<8x256xf32>
      %c87_i32 = arith.constant 87 : i32
      %279 = tpu.dynamic_rotate %211 by %c87_i32 dim 1 : vector<8x256xf32>, i32 -> vector<8x256xf32>
      %280 = vector.extract_strided_slice %28 {offsets = [0, 38], sizes = [8, 1], strides = [1, 1]} : vector<8x74xf32> to vector<8x1xf32>
      %281 = vector.broadcast %280 : vector<8x1xf32> to vector<8x256xf32>
      %282 = arith.mulf %279, %281 : vector<8x256xf32>
      %283 = arith.addf %278, %282 : vector<8x256xf32>
      %c18 = arith.constant 18 : index
      %c0_51 = arith.constant 0 : index
      %c0_52 = arith.constant 0 : index
      %284 = vector.load %arg10[%c18, %c0_51, %c0_52] : memref<30x1x256xf32, #tpu.memory_space<vmem>>, vector<1x1x256xf32>
      %285 = vector.shape_cast %284 : vector<1x1x256xf32> to vector<1x256xf32>
      %286 = vector.broadcast %285 : vector<1x256xf32> to vector<8x256xf32>
      %287 = arith.mulf %283, %286 : vector<8x256xf32>
      %288 = arith.addf %249, %287 : vector<8x256xf32>
      %c57_i32 = arith.constant 57 : i32
      %289 = tpu.dynamic_rotate %191 by %c57_i32 dim 1 : vector<8x256xf32>, i32 -> vector<8x256xf32>
      %290 = vector.extract_strided_slice %28 {offsets = [0, 39], sizes = [8, 1], strides = [1, 1]} : vector<8x74xf32> to vector<8x1xf32>
      %291 = vector.broadcast %290 : vector<8x1xf32> to vector<8x256xf32>
      %292 = arith.mulf %289, %291 : vector<8x256xf32>
      %c54_i32 = arith.constant 54 : i32
      %293 = tpu.dynamic_rotate %195 by %c54_i32 dim 1 : vector<8x256xf32>, i32 -> vector<8x256xf32>
      %294 = vector.extract_strided_slice %28 {offsets = [0, 40], sizes = [8, 1], strides = [1, 1]} : vector<8x74xf32> to vector<8x1xf32>
      %295 = vector.broadcast %294 : vector<8x1xf32> to vector<8x256xf32>
      %296 = arith.mulf %293, %295 : vector<8x256xf32>
      %297 = arith.addf %292, %296 : vector<8x256xf32>
      %c51_i32 = arith.constant 51 : i32
      %298 = tpu.dynamic_rotate %199 by %c51_i32 dim 1 : vector<8x256xf32>, i32 -> vector<8x256xf32>
      %299 = vector.extract_strided_slice %28 {offsets = [0, 41], sizes = [8, 1], strides = [1, 1]} : vector<8x74xf32> to vector<8x1xf32>
      %300 = vector.broadcast %299 : vector<8x1xf32> to vector<8x256xf32>
      %301 = arith.mulf %298, %300 : vector<8x256xf32>
      %302 = arith.addf %297, %301 : vector<8x256xf32>
      %c48_i32 = arith.constant 48 : i32
      %303 = tpu.dynamic_rotate %186 by %c48_i32 dim 1 : vector<8x256xf32>, i32 -> vector<8x256xf32>
      %304 = vector.extract_strided_slice %28 {offsets = [0, 42], sizes = [8, 1], strides = [1, 1]} : vector<8x74xf32> to vector<8x1xf32>
      %305 = vector.broadcast %304 : vector<8x1xf32> to vector<8x256xf32>
      %306 = arith.mulf %303, %305 : vector<8x256xf32>
      %307 = arith.addf %302, %306 : vector<8x256xf32>
      %c45_i32 = arith.constant 45 : i32
      %308 = tpu.dynamic_rotate %203 by %c45_i32 dim 1 : vector<8x256xf32>, i32 -> vector<8x256xf32>
      %309 = vector.extract_strided_slice %28 {offsets = [0, 43], sizes = [8, 1], strides = [1, 1]} : vector<8x74xf32> to vector<8x1xf32>
      %310 = vector.broadcast %309 : vector<8x1xf32> to vector<8x256xf32>
      %311 = arith.mulf %308, %310 : vector<8x256xf32>
      %312 = arith.addf %307, %311 : vector<8x256xf32>
      %c42_i32 = arith.constant 42 : i32
      %313 = tpu.dynamic_rotate %207 by %c42_i32 dim 1 : vector<8x256xf32>, i32 -> vector<8x256xf32>
      %314 = vector.extract_strided_slice %28 {offsets = [0, 44], sizes = [8, 1], strides = [1, 1]} : vector<8x74xf32> to vector<8x1xf32>
      %315 = vector.broadcast %314 : vector<8x1xf32> to vector<8x256xf32>
      %316 = arith.mulf %313, %315 : vector<8x256xf32>
      %317 = arith.addf %312, %316 : vector<8x256xf32>
      %c39_i32 = arith.constant 39 : i32
      %318 = tpu.dynamic_rotate %211 by %c39_i32 dim 1 : vector<8x256xf32>, i32 -> vector<8x256xf32>
      %319 = vector.extract_strided_slice %28 {offsets = [0, 45], sizes = [8, 1], strides = [1, 1]} : vector<8x74xf32> to vector<8x1xf32>
      %320 = vector.broadcast %319 : vector<8x1xf32> to vector<8x256xf32>
      %321 = arith.mulf %318, %320 : vector<8x256xf32>
      %322 = arith.addf %317, %321 : vector<8x256xf32>
      %c19 = arith.constant 19 : index
      %c0_53 = arith.constant 0 : index
      %c0_54 = arith.constant 0 : index
      %323 = vector.load %arg10[%c19, %c0_53, %c0_54] : memref<30x1x256xf32, #tpu.memory_space<vmem>>, vector<1x1x256xf32>
      %324 = vector.shape_cast %323 : vector<1x1x256xf32> to vector<1x256xf32>
      %325 = vector.broadcast %324 : vector<1x256xf32> to vector<8x256xf32>
      %326 = arith.mulf %322, %325 : vector<8x256xf32>
      %327 = arith.addf %288, %326 : vector<8x256xf32>
      %c9_i32 = arith.constant 9 : i32
      %328 = tpu.dynamic_rotate %191 by %c9_i32 dim 1 : vector<8x256xf32>, i32 -> vector<8x256xf32>
      %329 = vector.extract_strided_slice %28 {offsets = [0, 46], sizes = [8, 1], strides = [1, 1]} : vector<8x74xf32> to vector<8x1xf32>
      %330 = vector.broadcast %329 : vector<8x1xf32> to vector<8x256xf32>
      %331 = arith.mulf %328, %330 : vector<8x256xf32>
      %c6_i32 = arith.constant 6 : i32
      %332 = tpu.dynamic_rotate %195 by %c6_i32 dim 1 : vector<8x256xf32>, i32 -> vector<8x256xf32>
      %333 = vector.extract_strided_slice %28 {offsets = [0, 47], sizes = [8, 1], strides = [1, 1]} : vector<8x74xf32> to vector<8x1xf32>
      %334 = vector.broadcast %333 : vector<8x1xf32> to vector<8x256xf32>
      %335 = arith.mulf %332, %334 : vector<8x256xf32>
      %336 = arith.addf %331, %335 : vector<8x256xf32>
      %c3_i32 = arith.constant 3 : i32
      %337 = tpu.dynamic_rotate %199 by %c3_i32 dim 1 : vector<8x256xf32>, i32 -> vector<8x256xf32>
      %338 = vector.extract_strided_slice %28 {offsets = [0, 48], sizes = [8, 1], strides = [1, 1]} : vector<8x74xf32> to vector<8x1xf32>
      %339 = vector.broadcast %338 : vector<8x1xf32> to vector<8x256xf32>
      %340 = arith.mulf %337, %339 : vector<8x256xf32>
      %341 = arith.addf %336, %340 : vector<8x256xf32>
      %342 = vector.extract_strided_slice %28 {offsets = [0, 49], sizes = [8, 1], strides = [1, 1]} : vector<8x74xf32> to vector<8x1xf32>
      %343 = vector.broadcast %342 : vector<8x1xf32> to vector<8x256xf32>
      %344 = arith.mulf %186, %343 : vector<8x256xf32>
      %345 = arith.addf %341, %344 : vector<8x256xf32>
      %c253_i32 = arith.constant 253 : i32
      %346 = tpu.dynamic_rotate %203 by %c253_i32 dim 1 : vector<8x256xf32>, i32 -> vector<8x256xf32>
      %347 = vector.extract_strided_slice %28 {offsets = [0, 50], sizes = [8, 1], strides = [1, 1]} : vector<8x74xf32> to vector<8x1xf32>
      %348 = vector.broadcast %347 : vector<8x1xf32> to vector<8x256xf32>
      %349 = arith.mulf %346, %348 : vector<8x256xf32>
      %350 = arith.addf %345, %349 : vector<8x256xf32>
      %c250_i32 = arith.constant 250 : i32
      %351 = tpu.dynamic_rotate %207 by %c250_i32 dim 1 : vector<8x256xf32>, i32 -> vector<8x256xf32>
      %352 = vector.extract_strided_slice %28 {offsets = [0, 51], sizes = [8, 1], strides = [1, 1]} : vector<8x74xf32> to vector<8x1xf32>
      %353 = vector.broadcast %352 : vector<8x1xf32> to vector<8x256xf32>
      %354 = arith.mulf %351, %353 : vector<8x256xf32>
      %355 = arith.addf %350, %354 : vector<8x256xf32>
      %c247_i32 = arith.constant 247 : i32
      %356 = tpu.dynamic_rotate %211 by %c247_i32 dim 1 : vector<8x256xf32>, i32 -> vector<8x256xf32>
      %357 = vector.extract_strided_slice %28 {offsets = [0, 52], sizes = [8, 1], strides = [1, 1]} : vector<8x74xf32> to vector<8x1xf32>
      %358 = vector.broadcast %357 : vector<8x1xf32> to vector<8x256xf32>
      %359 = arith.mulf %356, %358 : vector<8x256xf32>
      %360 = arith.addf %355, %359 : vector<8x256xf32>
      %361 = arith.addf %327, %360 : vector<8x256xf32>
      %c217_i32 = arith.constant 217 : i32
      %362 = tpu.dynamic_rotate %191 by %c217_i32 dim 1 : vector<8x256xf32>, i32 -> vector<8x256xf32>
      %363 = vector.extract_strided_slice %28 {offsets = [0, 53], sizes = [8, 1], strides = [1, 1]} : vector<8x74xf32> to vector<8x1xf32>
      %364 = vector.broadcast %363 : vector<8x1xf32> to vector<8x256xf32>
      %365 = arith.mulf %362, %364 : vector<8x256xf32>
      %c214_i32 = arith.constant 214 : i32
      %366 = tpu.dynamic_rotate %195 by %c214_i32 dim 1 : vector<8x256xf32>, i32 -> vector<8x256xf32>
      %367 = vector.extract_strided_slice %28 {offsets = [0, 54], sizes = [8, 1], strides = [1, 1]} : vector<8x74xf32> to vector<8x1xf32>
      %368 = vector.broadcast %367 : vector<8x1xf32> to vector<8x256xf32>
      %369 = arith.mulf %366, %368 : vector<8x256xf32>
      %370 = arith.addf %365, %369 : vector<8x256xf32>
      %c211_i32 = arith.constant 211 : i32
      %371 = tpu.dynamic_rotate %199 by %c211_i32 dim 1 : vector<8x256xf32>, i32 -> vector<8x256xf32>
      %372 = vector.extract_strided_slice %28 {offsets = [0, 55], sizes = [8, 1], strides = [1, 1]} : vector<8x74xf32> to vector<8x1xf32>
      %373 = vector.broadcast %372 : vector<8x1xf32> to vector<8x256xf32>
      %374 = arith.mulf %371, %373 : vector<8x256xf32>
      %375 = arith.addf %370, %374 : vector<8x256xf32>
      %c208_i32 = arith.constant 208 : i32
      %376 = tpu.dynamic_rotate %186 by %c208_i32 dim 1 : vector<8x256xf32>, i32 -> vector<8x256xf32>
      %377 = vector.extract_strided_slice %28 {offsets = [0, 56], sizes = [8, 1], strides = [1, 1]} : vector<8x74xf32> to vector<8x1xf32>
      %378 = vector.broadcast %377 : vector<8x1xf32> to vector<8x256xf32>
      %379 = arith.mulf %376, %378 : vector<8x256xf32>
      %380 = arith.addf %375, %379 : vector<8x256xf32>
      %c205_i32 = arith.constant 205 : i32
      %381 = tpu.dynamic_rotate %203 by %c205_i32 dim 1 : vector<8x256xf32>, i32 -> vector<8x256xf32>
      %382 = vector.extract_strided_slice %28 {offsets = [0, 57], sizes = [8, 1], strides = [1, 1]} : vector<8x74xf32> to vector<8x1xf32>
      %383 = vector.broadcast %382 : vector<8x1xf32> to vector<8x256xf32>
      %384 = arith.mulf %381, %383 : vector<8x256xf32>
      %385 = arith.addf %380, %384 : vector<8x256xf32>
      %c202_i32 = arith.constant 202 : i32
      %386 = tpu.dynamic_rotate %207 by %c202_i32 dim 1 : vector<8x256xf32>, i32 -> vector<8x256xf32>
      %387 = vector.extract_strided_slice %28 {offsets = [0, 58], sizes = [8, 1], strides = [1, 1]} : vector<8x74xf32> to vector<8x1xf32>
      %388 = vector.broadcast %387 : vector<8x1xf32> to vector<8x256xf32>
      %389 = arith.mulf %386, %388 : vector<8x256xf32>
      %390 = arith.addf %385, %389 : vector<8x256xf32>
      %c199_i32 = arith.constant 199 : i32
      %391 = tpu.dynamic_rotate %211 by %c199_i32 dim 1 : vector<8x256xf32>, i32 -> vector<8x256xf32>
      %392 = vector.extract_strided_slice %28 {offsets = [0, 59], sizes = [8, 1], strides = [1, 1]} : vector<8x74xf32> to vector<8x1xf32>
      %393 = vector.broadcast %392 : vector<8x1xf32> to vector<8x256xf32>
      %394 = arith.mulf %391, %393 : vector<8x256xf32>
      %395 = arith.addf %390, %394 : vector<8x256xf32>
      %c21 = arith.constant 21 : index
      %c0_55 = arith.constant 0 : index
      %c0_56 = arith.constant 0 : index
      %396 = vector.load %arg10[%c21, %c0_55, %c0_56] : memref<30x1x256xf32, #tpu.memory_space<vmem>>, vector<1x1x256xf32>
      %397 = vector.shape_cast %396 : vector<1x1x256xf32> to vector<1x256xf32>
      %398 = vector.broadcast %397 : vector<1x256xf32> to vector<8x256xf32>
      %399 = arith.mulf %395, %398 : vector<8x256xf32>
      %400 = arith.addf %361, %399 : vector<8x256xf32>
      %c169_i32 = arith.constant 169 : i32
      %401 = tpu.dynamic_rotate %191 by %c169_i32 dim 1 : vector<8x256xf32>, i32 -> vector<8x256xf32>
      %402 = vector.extract_strided_slice %28 {offsets = [0, 60], sizes = [8, 1], strides = [1, 1]} : vector<8x74xf32> to vector<8x1xf32>
      %403 = vector.broadcast %402 : vector<8x1xf32> to vector<8x256xf32>
      %404 = arith.mulf %401, %403 : vector<8x256xf32>
      %c166_i32 = arith.constant 166 : i32
      %405 = tpu.dynamic_rotate %195 by %c166_i32 dim 1 : vector<8x256xf32>, i32 -> vector<8x256xf32>
      %406 = vector.extract_strided_slice %28 {offsets = [0, 61], sizes = [8, 1], strides = [1, 1]} : vector<8x74xf32> to vector<8x1xf32>
      %407 = vector.broadcast %406 : vector<8x1xf32> to vector<8x256xf32>
      %408 = arith.mulf %405, %407 : vector<8x256xf32>
      %409 = arith.addf %404, %408 : vector<8x256xf32>
      %c163_i32 = arith.constant 163 : i32
      %410 = tpu.dynamic_rotate %199 by %c163_i32 dim 1 : vector<8x256xf32>, i32 -> vector<8x256xf32>
      %411 = vector.extract_strided_slice %28 {offsets = [0, 62], sizes = [8, 1], strides = [1, 1]} : vector<8x74xf32> to vector<8x1xf32>
      %412 = vector.broadcast %411 : vector<8x1xf32> to vector<8x256xf32>
      %413 = arith.mulf %410, %412 : vector<8x256xf32>
      %414 = arith.addf %409, %413 : vector<8x256xf32>
      %c160_i32 = arith.constant 160 : i32
      %415 = tpu.dynamic_rotate %186 by %c160_i32 dim 1 : vector<8x256xf32>, i32 -> vector<8x256xf32>
      %416 = vector.extract_strided_slice %28 {offsets = [0, 63], sizes = [8, 1], strides = [1, 1]} : vector<8x74xf32> to vector<8x1xf32>
      %417 = vector.broadcast %416 : vector<8x1xf32> to vector<8x256xf32>
      %418 = arith.mulf %415, %417 : vector<8x256xf32>
      %419 = arith.addf %414, %418 : vector<8x256xf32>
      %c157_i32 = arith.constant 157 : i32
      %420 = tpu.dynamic_rotate %203 by %c157_i32 dim 1 : vector<8x256xf32>, i32 -> vector<8x256xf32>
      %421 = vector.extract_strided_slice %28 {offsets = [0, 64], sizes = [8, 1], strides = [1, 1]} : vector<8x74xf32> to vector<8x1xf32>
      %422 = vector.broadcast %421 : vector<8x1xf32> to vector<8x256xf32>
      %423 = arith.mulf %420, %422 : vector<8x256xf32>
      %424 = arith.addf %419, %423 : vector<8x256xf32>
      %c154_i32 = arith.constant 154 : i32
      %425 = tpu.dynamic_rotate %207 by %c154_i32 dim 1 : vector<8x256xf32>, i32 -> vector<8x256xf32>
      %426 = vector.extract_strided_slice %28 {offsets = [0, 65], sizes = [8, 1], strides = [1, 1]} : vector<8x74xf32> to vector<8x1xf32>
      %427 = vector.broadcast %426 : vector<8x1xf32> to vector<8x256xf32>
      %428 = arith.mulf %425, %427 : vector<8x256xf32>
      %429 = arith.addf %424, %428 : vector<8x256xf32>
      %c151_i32 = arith.constant 151 : i32
      %430 = tpu.dynamic_rotate %211 by %c151_i32 dim 1 : vector<8x256xf32>, i32 -> vector<8x256xf32>
      %431 = vector.extract_strided_slice %28 {offsets = [0, 66], sizes = [8, 1], strides = [1, 1]} : vector<8x74xf32> to vector<8x1xf32>
      %432 = vector.broadcast %431 : vector<8x1xf32> to vector<8x256xf32>
      %433 = arith.mulf %430, %432 : vector<8x256xf32>
      %434 = arith.addf %429, %433 : vector<8x256xf32>
      %c22 = arith.constant 22 : index
      %c0_57 = arith.constant 0 : index
      %c0_58 = arith.constant 0 : index
      %435 = vector.load %arg10[%c22, %c0_57, %c0_58] : memref<30x1x256xf32, #tpu.memory_space<vmem>>, vector<1x1x256xf32>
      %436 = vector.shape_cast %435 : vector<1x1x256xf32> to vector<1x256xf32>
      %437 = vector.broadcast %436 : vector<1x256xf32> to vector<8x256xf32>
      %438 = arith.mulf %434, %437 : vector<8x256xf32>
      %439 = arith.addf %400, %438 : vector<8x256xf32>
      %c121_i32 = arith.constant 121 : i32
      %440 = tpu.dynamic_rotate %191 by %c121_i32 dim 1 : vector<8x256xf32>, i32 -> vector<8x256xf32>
      %441 = vector.extract_strided_slice %28 {offsets = [0, 67], sizes = [8, 1], strides = [1, 1]} : vector<8x74xf32> to vector<8x1xf32>
      %442 = vector.broadcast %441 : vector<8x1xf32> to vector<8x256xf32>
      %443 = arith.mulf %440, %442 : vector<8x256xf32>
      %c118_i32 = arith.constant 118 : i32
      %444 = tpu.dynamic_rotate %195 by %c118_i32 dim 1 : vector<8x256xf32>, i32 -> vector<8x256xf32>
      %445 = vector.extract_strided_slice %28 {offsets = [0, 68], sizes = [8, 1], strides = [1, 1]} : vector<8x74xf32> to vector<8x1xf32>
      %446 = vector.broadcast %445 : vector<8x1xf32> to vector<8x256xf32>
      %447 = arith.mulf %444, %446 : vector<8x256xf32>
      %448 = arith.addf %443, %447 : vector<8x256xf32>
      %c115_i32 = arith.constant 115 : i32
      %449 = tpu.dynamic_rotate %199 by %c115_i32 dim 1 : vector<8x256xf32>, i32 -> vector<8x256xf32>
      %450 = vector.extract_strided_slice %28 {offsets = [0, 69], sizes = [8, 1], strides = [1, 1]} : vector<8x74xf32> to vector<8x1xf32>
      %451 = vector.broadcast %450 : vector<8x1xf32> to vector<8x256xf32>
      %452 = arith.mulf %449, %451 : vector<8x256xf32>
      %453 = arith.addf %448, %452 : vector<8x256xf32>
      %c112_i32 = arith.constant 112 : i32
      %454 = tpu.dynamic_rotate %186 by %c112_i32 dim 1 : vector<8x256xf32>, i32 -> vector<8x256xf32>
      %455 = vector.extract_strided_slice %28 {offsets = [0, 70], sizes = [8, 1], strides = [1, 1]} : vector<8x74xf32> to vector<8x1xf32>
      %456 = vector.broadcast %455 : vector<8x1xf32> to vector<8x256xf32>
      %457 = arith.mulf %454, %456 : vector<8x256xf32>
      %458 = arith.addf %453, %457 : vector<8x256xf32>
      %c109_i32 = arith.constant 109 : i32
      %459 = tpu.dynamic_rotate %203 by %c109_i32 dim 1 : vector<8x256xf32>, i32 -> vector<8x256xf32>
      %460 = vector.extract_strided_slice %28 {offsets = [0, 71], sizes = [8, 1], strides = [1, 1]} : vector<8x74xf32> to vector<8x1xf32>
      %461 = vector.broadcast %460 : vector<8x1xf32> to vector<8x256xf32>
      %462 = arith.mulf %459, %461 : vector<8x256xf32>
      %463 = arith.addf %458, %462 : vector<8x256xf32>
      %c106_i32 = arith.constant 106 : i32
      %464 = tpu.dynamic_rotate %207 by %c106_i32 dim 1 : vector<8x256xf32>, i32 -> vector<8x256xf32>
      %465 = vector.extract_strided_slice %28 {offsets = [0, 72], sizes = [8, 1], strides = [1, 1]} : vector<8x74xf32> to vector<8x1xf32>
      %466 = vector.broadcast %465 : vector<8x1xf32> to vector<8x256xf32>
      %467 = arith.mulf %464, %466 : vector<8x256xf32>
      %468 = arith.addf %463, %467 : vector<8x256xf32>
      %c103_i32 = arith.constant 103 : i32
      %469 = tpu.dynamic_rotate %211 by %c103_i32 dim 1 : vector<8x256xf32>, i32 -> vector<8x256xf32>
      %470 = vector.extract_strided_slice %28 {offsets = [0, 73], sizes = [8, 1], strides = [1, 1]} : vector<8x74xf32> to vector<8x1xf32>
      %471 = vector.broadcast %470 : vector<8x1xf32> to vector<8x256xf32>
      %472 = arith.mulf %469, %471 : vector<8x256xf32>
      %473 = arith.addf %468, %472 : vector<8x256xf32>
      %c23 = arith.constant 23 : index
      %c0_59 = arith.constant 0 : index
      %c0_60 = arith.constant 0 : index
      %474 = vector.load %arg10[%c23, %c0_59, %c0_60] : memref<30x1x256xf32, #tpu.memory_space<vmem>>, vector<1x1x256xf32>
      %475 = vector.shape_cast %474 : vector<1x1x256xf32> to vector<1x256xf32>
      %476 = vector.broadcast %475 : vector<1x256xf32> to vector<8x256xf32>
      %477 = arith.mulf %473, %476 : vector<8x256xf32>
      %478 = arith.addf %439, %477 : vector<8x256xf32>
      %479 = vector.broadcast %187 : vector<8x1xf32> to vector<8x256xf32>
      %480 = arith.addf %478, %479 : vector<8x256xf32>
      %c8_61 = arith.constant 8 : index
      %c0_62 = arith.constant 0 : index
      %481 = vector.load %arg2[%c8_61, %c0_62] : memref<24x8xf32, #tpu.memory_space<vmem>>, vector<8x8xf32>
      %cst_63 = arith.constant dense<0.000000e+00> : vector<8x256xf32>
      %482 = tpu.matmul %481, %480, %cst_63 {dimension_numbers = #tpu.dot_dimension_numbers<[1], [0], [0], [1], [0, 0, 1, 1], [], []>} : vector<8x8xf32>, vector<8x256xf32>, vector<8x256xf32> -> vector<8x256xf32>
      %c0_64 = arith.constant 0 : index
      %c5_65 = arith.constant 5 : index
      %483 = vector.load %arg8[%c0_64, %c5_65] : memref<8x9xf32, #tpu.memory_space<vmem>>, vector<8x1xf32>
      %484 = vector.broadcast %483 : vector<8x1xf32> to vector<8x256xf32>
      %485 = arith.addf %482, %484 : vector<8x256xf32>
      %cst_66 = arith.constant dense<0.000000e+00> : vector<8xf32>
      %486 = vector.multi_reduction <add>, %27, %cst_66 [1] : vector<8x256xf32> to vector<8xf32>
      %487 = vector.shape_cast %486 : vector<8xf32> to vector<8x1xf32>
      %cst_67 = arith.constant 3.906250e-03 : f32
      %488 = vector.broadcast %cst_67 : f32 to vector<8x1xf32>
      %489 = arith.mulf %487, %488 : vector<8x1xf32>
      %c0_68 = arith.constant 0 : index
      %c0_69 = arith.constant 0 : index
      %490 = vector.load %arg5[%c0_68, %c0_69] : memref<16x2xf32, #tpu.memory_space<vmem>>, vector<8x2xf32>
      %491 = vector.broadcast %489 : vector<8x1xf32> to vector<8x2xf32>
      %492 = arith.mulf %490, %491 : vector<8x2xf32>
      %cst_70 = arith.constant dense<0.000000e+00> : vector<2xf32>
      %493 = vector.multi_reduction <add>, %492, %cst_70 [0] : vector<8x2xf32> to vector<2xf32>
      %494 = vector.shape_cast %493 : vector<2xf32> to vector<1x2xf32>
      %cst_71 = arith.constant 0.000000e+00 : f32
      %495 = vector.broadcast %cst_71 : f32 to vector<1x2xf32>
      %496 = arith.maximumf %494, %495 : vector<1x2xf32>
      %c8_72 = arith.constant 8 : index
      %c0_73 = arith.constant 0 : index
      %497 = vector.load %arg5[%c8_72, %c0_73] : memref<16x2xf32, #tpu.memory_space<vmem>>, vector<8x2xf32>
      %498 = vector.broadcast %496 : vector<1x2xf32> to vector<8x2xf32>
      %499 = arith.mulf %497, %498 : vector<8x2xf32>
      %cst_74 = arith.constant dense<0.000000e+00> : vector<8xf32>
      %500 = vector.multi_reduction <add>, %499, %cst_74 [1] : vector<8x2xf32> to vector<8xf32>
      %501 = vector.shape_cast %500 : vector<8xf32> to vector<8x1xf32>
      %cst_75 = arith.constant 0.000000e+00 : f32
      %502 = vector.broadcast %cst_75 : f32 to vector<8x1xf32>
      %503 = arith.subf %502, %501 : vector<8x1xf32>
      %504 = math.exp %503 : vector<8x1xf32>
      %cst_76 = arith.constant 1.000000e+00 : f32
      %505 = vector.broadcast %cst_76 : f32 to vector<8x1xf32>
      %506 = arith.addf %505, %504 : vector<8x1xf32>
      %cst_77 = arith.constant 1.000000e+00 : f32
      %507 = vector.broadcast %cst_77 : f32 to vector<8x1xf32>
      %508 = arith.divf %507, %506 : vector<8x1xf32>
      %509 = vector.broadcast %508 : vector<8x1xf32> to vector<8x256xf32>
      %510 = arith.mulf %509, %485 : vector<8x256xf32>
      %511 = arith.mulf %510, %27 : vector<8x256xf32>
      %c16_78 = arith.constant 16 : index
      %c0_79 = arith.constant 0 : index
      %512 = vector.load %arg2[%c16_78, %c0_79] : memref<24x8xf32, #tpu.memory_space<vmem>>, vector<8x8xf32>
      %cst_80 = arith.constant dense<0.000000e+00> : vector<8x256xf32>
      %513 = tpu.matmul %512, %511, %cst_80 {dimension_numbers = #tpu.dot_dimension_numbers<[1], [0], [0], [1], [0, 0, 1, 1], [], []>} : vector<8x8xf32>, vector<8x256xf32>, vector<8x256xf32> -> vector<8x256xf32>
      %c0_81 = arith.constant 0 : index
      %c6_82 = arith.constant 6 : index
      %514 = vector.load %arg8[%c0_81, %c6_82] : memref<8x9xf32, #tpu.memory_space<vmem>>, vector<8x1xf32>
      %515 = vector.broadcast %514 : vector<8x1xf32> to vector<8x256xf32>
      %516 = arith.addf %513, %515 : vector<8x256xf32>
      %517 = arith.addf %516, %9 : vector<8x256xf32>
      %c0_83 = arith.constant 0 : index
      %c7 = arith.constant 7 : index
      %518 = vector.load %arg8[%c0_83, %c7] : memref<8x9xf32, #tpu.memory_space<vmem>>, vector<8x1xf32>
      %519 = vector.broadcast %518 : vector<8x1xf32> to vector<8x256xf32>
      %520 = arith.mulf %519, %517 : vector<8x256xf32>
      %521 = arith.addf %3, %520 : vector<8x256xf32>
      %c0_84 = arith.constant 0 : index
      %c0_85 = arith.constant 0 : index
      %522 = vector.load %arg6[%c0_84, %c0_85] : memref<32x8xf32, #tpu.memory_space<vmem>>, vector<32x8xf32>
      %cst_86 = arith.constant dense<0.000000e+00> : vector<32x256xf32>
      %523 = tpu.matmul %522, %521, %cst_86 {dimension_numbers = #tpu.dot_dimension_numbers<[1], [0], [0], [1], [0, 0, 1, 1], [], []>} : vector<32x8xf32>, vector<8x256xf32>, vector<32x256xf32> -> vector<32x256xf32>
      %c0_87 = arith.constant 0 : index
      %c0_88 = arith.constant 0 : index
      %524 = vector.load %arg9[%c0_87, %c0_88] : memref<32x2xf32, #tpu.memory_space<vmem>>, vector<32x1xf32>
      %525 = vector.broadcast %524 : vector<32x1xf32> to vector<32x256xf32>
      %526 = arith.addf %523, %525 : vector<32x256xf32>
      %c0_89 = arith.constant 0 : index
      %c0_90 = arith.constant 0 : index
      %527 = vector.load %arg4[%c0_89, %c0_90] : memref<32x9xf32, #tpu.memory_space<vmem>>, vector<32x9xf32>
      %c0_91 = arith.constant 0 : index
      %c1_92 = arith.constant 1 : index
      %528 = vector.load %arg9[%c0_91, %c1_92] : memref<32x2xf32, #tpu.memory_space<vmem>>, vector<32x1xf32>
      %c24 = arith.constant 24 : index
      %c0_93 = arith.constant 0 : index
      %c0_94 = arith.constant 0 : index
      %529 = vector.load %arg10[%c24, %c0_93, %c0_94] : memref<30x1x256xf32, #tpu.memory_space<vmem>>, vector<1x1x256xf32>
      %530 = vector.shape_cast %529 : vector<1x1x256xf32> to vector<1x256xf32>
      %531 = vector.broadcast %530 : vector<1x256xf32> to vector<32x256xf32>
      %532 = arith.mulf %526, %531 : vector<32x256xf32>
      %c26 = arith.constant 26 : index
      %c0_95 = arith.constant 0 : index
      %c0_96 = arith.constant 0 : index
      %533 = vector.load %arg10[%c26, %c0_95, %c0_96] : memref<30x1x256xf32, #tpu.memory_space<vmem>>, vector<1x1x256xf32>
      %534 = vector.shape_cast %533 : vector<1x1x256xf32> to vector<1x256xf32>
      %535 = vector.broadcast %534 : vector<1x256xf32> to vector<32x256xf32>
      %536 = arith.mulf %526, %535 : vector<32x256xf32>
      %c17_i32_97 = arith.constant 17 : i32
      %537 = tpu.dynamic_rotate %532 by %c17_i32_97 dim 1 : vector<32x256xf32>, i32 -> vector<32x256xf32>
      %538 = vector.extract_strided_slice %527 {offsets = [0, 0], sizes = [32, 1], strides = [1, 1]} : vector<32x9xf32> to vector<32x1xf32>
      %539 = vector.broadcast %538 : vector<32x1xf32> to vector<32x256xf32>
      %540 = arith.mulf %537, %539 : vector<32x256xf32>
      %c16_i32_98 = arith.constant 16 : i32
      %541 = tpu.dynamic_rotate %526 by %c16_i32_98 dim 1 : vector<32x256xf32>, i32 -> vector<32x256xf32>
      %542 = vector.extract_strided_slice %527 {offsets = [0, 1], sizes = [32, 1], strides = [1, 1]} : vector<32x9xf32> to vector<32x1xf32>
      %543 = vector.broadcast %542 : vector<32x1xf32> to vector<32x256xf32>
      %544 = arith.mulf %541, %543 : vector<32x256xf32>
      %545 = arith.addf %540, %544 : vector<32x256xf32>
      %c15_i32_99 = arith.constant 15 : i32
      %546 = tpu.dynamic_rotate %536 by %c15_i32_99 dim 1 : vector<32x256xf32>, i32 -> vector<32x256xf32>
      %547 = vector.extract_strided_slice %527 {offsets = [0, 2], sizes = [32, 1], strides = [1, 1]} : vector<32x9xf32> to vector<32x1xf32>
      %548 = vector.broadcast %547 : vector<32x1xf32> to vector<32x256xf32>
      %549 = arith.mulf %546, %548 : vector<32x256xf32>
      %550 = arith.addf %545, %549 : vector<32x256xf32>
      %c27 = arith.constant 27 : index
      %c0_100 = arith.constant 0 : index
      %c0_101 = arith.constant 0 : index
      %551 = vector.load %arg10[%c27, %c0_100, %c0_101] : memref<30x1x256xf32, #tpu.memory_space<vmem>>, vector<1x1x256xf32>
      %552 = vector.shape_cast %551 : vector<1x1x256xf32> to vector<1x256xf32>
      %553 = vector.broadcast %552 : vector<1x256xf32> to vector<32x256xf32>
      %554 = arith.mulf %550, %553 : vector<32x256xf32>
      %c1_i32_102 = arith.constant 1 : i32
      %555 = tpu.dynamic_rotate %532 by %c1_i32_102 dim 1 : vector<32x256xf32>, i32 -> vector<32x256xf32>
      %556 = vector.extract_strided_slice %527 {offsets = [0, 3], sizes = [32, 1], strides = [1, 1]} : vector<32x9xf32> to vector<32x1xf32>
      %557 = vector.broadcast %556 : vector<32x1xf32> to vector<32x256xf32>
      %558 = arith.mulf %555, %557 : vector<32x256xf32>
      %559 = vector.extract_strided_slice %527 {offsets = [0, 4], sizes = [32, 1], strides = [1, 1]} : vector<32x9xf32> to vector<32x1xf32>
      %560 = vector.broadcast %559 : vector<32x1xf32> to vector<32x256xf32>
      %561 = arith.mulf %526, %560 : vector<32x256xf32>
      %562 = arith.addf %558, %561 : vector<32x256xf32>
      %c255_i32_103 = arith.constant 255 : i32
      %563 = tpu.dynamic_rotate %536 by %c255_i32_103 dim 1 : vector<32x256xf32>, i32 -> vector<32x256xf32>
      %564 = vector.extract_strided_slice %527 {offsets = [0, 5], sizes = [32, 1], strides = [1, 1]} : vector<32x9xf32> to vector<32x1xf32>
      %565 = vector.broadcast %564 : vector<32x1xf32> to vector<32x256xf32>
      %566 = arith.mulf %563, %565 : vector<32x256xf32>
      %567 = arith.addf %562, %566 : vector<32x256xf32>
      %568 = arith.addf %554, %567 : vector<32x256xf32>
      %c241_i32_104 = arith.constant 241 : i32
      %569 = tpu.dynamic_rotate %532 by %c241_i32_104 dim 1 : vector<32x256xf32>, i32 -> vector<32x256xf32>
      %570 = vector.extract_strided_slice %527 {offsets = [0, 6], sizes = [32, 1], strides = [1, 1]} : vector<32x9xf32> to vector<32x1xf32>
      %571 = vector.broadcast %570 : vector<32x1xf32> to vector<32x256xf32>
      %572 = arith.mulf %569, %571 : vector<32x256xf32>
      %c240_i32_105 = arith.constant 240 : i32
      %573 = tpu.dynamic_rotate %526 by %c240_i32_105 dim 1 : vector<32x256xf32>, i32 -> vector<32x256xf32>
      %574 = vector.extract_strided_slice %527 {offsets = [0, 7], sizes = [32, 1], strides = [1, 1]} : vector<32x9xf32> to vector<32x1xf32>
      %575 = vector.broadcast %574 : vector<32x1xf32> to vector<32x256xf32>
      %576 = arith.mulf %573, %575 : vector<32x256xf32>
      %577 = arith.addf %572, %576 : vector<32x256xf32>
      %c239_i32_106 = arith.constant 239 : i32
      %578 = tpu.dynamic_rotate %536 by %c239_i32_106 dim 1 : vector<32x256xf32>, i32 -> vector<32x256xf32>
      %579 = vector.extract_strided_slice %527 {offsets = [0, 8], sizes = [32, 1], strides = [1, 1]} : vector<32x9xf32> to vector<32x1xf32>
      %580 = vector.broadcast %579 : vector<32x1xf32> to vector<32x256xf32>
      %581 = arith.mulf %578, %580 : vector<32x256xf32>
      %582 = arith.addf %577, %581 : vector<32x256xf32>
      %c29 = arith.constant 29 : index
      %c0_107 = arith.constant 0 : index
      %c0_108 = arith.constant 0 : index
      %583 = vector.load %arg10[%c29, %c0_107, %c0_108] : memref<30x1x256xf32, #tpu.memory_space<vmem>>, vector<1x1x256xf32>
      %584 = vector.shape_cast %583 : vector<1x1x256xf32> to vector<1x256xf32>
      %585 = vector.broadcast %584 : vector<1x256xf32> to vector<32x256xf32>
      %586 = arith.mulf %582, %585 : vector<32x256xf32>
      %587 = arith.addf %568, %586 : vector<32x256xf32>
      %588 = vector.broadcast %528 : vector<32x1xf32> to vector<32x256xf32>
      %589 = arith.addf %587, %588 : vector<32x256xf32>
      %590 = arith.mulf %589, %589 : vector<32x256xf32>
      %591 = arith.mulf %590, %589 : vector<32x256xf32>
      %cst_109 = arith.constant 4.471500e-02 : f32
      %592 = vector.broadcast %cst_109 : f32 to vector<32x256xf32>
      %593 = arith.mulf %592, %591 : vector<32x256xf32>
      %594 = arith.addf %589, %593 : vector<32x256xf32>
      %cst_110 = arith.constant 5.000000e-01 : f32
      %595 = vector.broadcast %cst_110 : f32 to vector<32x256xf32>
      %596 = arith.mulf %595, %589 : vector<32x256xf32>
      %cst_111 = arith.constant 0.797884583 : f32
      %597 = vector.broadcast %cst_111 : f32 to vector<32x256xf32>
      %598 = arith.mulf %597, %594 : vector<32x256xf32>
      %599 = math.tanh %598 : vector<32x256xf32>
      %cst_112 = arith.constant 1.000000e+00 : f32
      %600 = vector.broadcast %cst_112 : f32 to vector<32x256xf32>
      %601 = arith.addf %600, %599 : vector<32x256xf32>
      %602 = arith.mulf %596, %601 : vector<32x256xf32>
      %c0_113 = arith.constant 0 : index
      %c0_114 = arith.constant 0 : index
      %603 = vector.load %arg7[%c0_113, %c0_114] : memref<8x32xf32, #tpu.memory_space<vmem>>, vector<8x32xf32>
      %cst_115 = arith.constant dense<0.000000e+00> : vector<8x256xf32>
      %604 = tpu.matmul %603, %602, %cst_115 {dimension_numbers = #tpu.dot_dimension_numbers<[1], [0], [0], [1], [0, 0, 1, 1], [], []>} : vector<8x32xf32>, vector<32x256xf32>, vector<8x256xf32> -> vector<8x256xf32>
      %605 = arith.addf %521, %604 : vector<8x256xf32>
      %c0_116 = arith.constant 0 : index
      %c8_117 = arith.constant 8 : index
      %606 = vector.load %arg8[%c0_116, %c8_117] : memref<8x9xf32, #tpu.memory_space<vmem>>, vector<8x1xf32>
      %607 = vector.broadcast %606 : vector<8x1xf32> to vector<8x256xf32>
      %608 = arith.addf %605, %607 : vector<8x256xf32>
      %609 = arith.addf %3, %608 : vector<8x256xf32>
      %610 = arith.index_cast %arg12 : i32 to index
      %c0_118 = arith.constant 0 : index
      %c0_119 = arith.constant 0 : index
      %611 = vector.load %arg11[%610, %c0_118, %c0_119] : memref<8x8x256xf32, #tpu.memory_space<vmem>>, vector<1x8x256xf32>
      %612 = vector.shape_cast %611 : vector<1x8x256xf32> to vector<8x256xf32>
      %613 = vector.shape_cast %609 : vector<8x256xf32> to vector<1x8x256xf32>
      tpu.vector_store %arg11[%610, %c0_118, %c0_119], %613 {strides = array<i32>} : memref<8x8x256xf32, #tpu.memory_space<vmem>>, vector<1x8x256xf32>,
    }
    %c8_i32_0 = arith.constant 8 : i32
    return
  }
  func.func @transform_0(%arg0: i32) -> (i32, i32, i32) {
    %c0_i32 = arith.constant 0 : i32
    %c0_i32_0 = arith.constant 0 : i32
    %c0_i32_1 = arith.constant 0 : i32
    return %arg0, %c0_i32, %c0_i32_0 : i32, i32, i32
  }
  func.func @transform_1(%arg0: i32) -> (i32, i32) {
    %c0_i32 = arith.constant 0 : i32
    %c0_i32_0 = arith.constant 0 : i32
    %c0_i32_1 = arith.constant 0 : i32
    return %c0_i32, %c0_i32_0 : i32, i32
  }
  func.func @transform_2(%arg0: i32) -> (i32, i32) {
    %c0_i32 = arith.constant 0 : i32
    %c0_i32_0 = arith.constant 0 : i32
    %c0_i32_1 = arith.constant 0 : i32
    return %c0_i32, %c0_i32_0 : i32, i32
  }
  func.func @transform_3(%arg0: i32) -> (i32, i32) {
    %c0_i32 = arith.constant 0 : i32
    %c0_i32_0 = arith.constant 0 : i32
    %c0_i32_1 = arith.constant 0 : i32
    return %c0_i32, %c0_i32_0 : i32, i32
  }
  func.func @transform_4(%arg0: i32) -> (i32, i32) {
    %c0_i32 = arith.constant 0 : i32
    %c0_i32_0 = arith.constant 0 : i32
    %c0_i32_1 = arith.constant 0 : i32
    return %c0_i32, %c0_i32_0 : i32, i32
  }
  func.func @transform_5(%arg0: i32) -> (i32, i32) {
    %c0_i32 = arith.constant 0 : i32
    %c0_i32_0 = arith.constant 0 : i32
    %c0_i32_1 = arith.constant 0 : i32
    return %c0_i32, %c0_i32_0 : i32, i32
  }
  func.func @transform_6(%arg0: i32) -> (i32, i32) {
    %c0_i32 = arith.constant 0 : i32
    %c0_i32_0 = arith.constant 0 : i32
    %c0_i32_1 = arith.constant 0 : i32
    return %c0_i32, %c0_i32_0 : i32, i32
  }
  func.func @transform_7(%arg0: i32) -> (i32, i32) {
    %c0_i32 = arith.constant 0 : i32
    %c0_i32_0 = arith.constant 0 : i32
    %c0_i32_1 = arith.constant 0 : i32
    return %c0_i32, %c0_i32_0 : i32, i32
  }
  func.func @transform_8(%arg0: i32) -> (i32, i32) {
    %c0_i32 = arith.constant 0 : i32
    %c0_i32_0 = arith.constant 0 : i32
    %c0_i32_1 = arith.constant 0 : i32
    return %c0_i32, %c0_i32_0 : i32, i32
  }
  func.func @transform_9(%arg0: i32) -> (i32, i32, i32) {
    %c0_i32 = arith.constant 0 : i32
    %c0_i32_0 = arith.constant 0 : i32
    %c0_i32_1 = arith.constant 0 : i32
    %c0_i32_2 = arith.constant 0 : i32
    return %c0_i32, %c0_i32_0, %c0_i32_1 : i32, i32, i32
  }
  func.func @transform_10(%arg0: i32) -> (i32, i32, i32) {
    %c0_i32 = arith.constant 0 : i32
    %c0_i32_0 = arith.constant 0 : i32
    %c0_i32_1 = arith.constant 0 : i32
    return %arg0, %c0_i32, %c0_i32_0 : i32, i32, i32
  }
}

</mosaic_0001>

<bundles_post_ra>
// kernel: tpu_custom_call.1
= control target key start
LH: loop header
LB: loop body
LE: loop exit
PB: predicated region body
PF: predicated region fallthrough
CT: control target
= control target key end

     0   :  { %6 = vsyncpa [#allocation3], 0  ;;  %s128_s0 = inlined_call_operand.hbm [shape: f32[8,128], index: 0, kind: input, shape index: {}]   ;;  %s129_s1 = inlined_call_operand.hbm [shape: f32[8,128], index: 1, kind: output, shape index: {}]  }
   0x1   :  { %7 = vsyncpa [#allocation4], 0  ;;  %s91_s6 = smov [#allocation2]   ;;  %s43_s10 = scalar_lea.hbm %s128_s0, 128 }
   0x2   :  { %s14_s7 = sshll.u32 %s91_s6, 4  ;;  %p44_p0 = scmp.ne.s32.totalorder %s128_s0, %s43_s10  ;;  %s15_s7 = int_to_ptr.vmem [resolvable:$true] %s14_s7 }
   0x3   :  { %p47_p1 = scmp.lt.u32.totalorder %s43_s10, %s128_s0 }
   0x5   :  { %p49_p2 = pnand %p47_p1, %p44_p0 }
   0x7   :  { %52 = shalt.err (!%p49_p2)
}
   0x8   :  { %s53_s15 = scalar_lea.vmem %s15_s7, 128  ;;  %p58_p4 = scmp.lt.s32.totalorder %s15_s7, %s15_s7 }
   0x9   :  { %p54_p3 = scmp.ne.s32.totalorder %s15_s7, %s53_s15  ;;  %p59_p5 = scmp.lt.s32.totalorder %s53_s15, %s53_s15 }
   0xb   :  { %p60_p6 = por %p59_p5, %p58_p4 }
   0xd   :  { %p61_p7 = pnand %p60_p6, %p54_p3 }
   0xf   :  { %64 = shalt.err (!%p61_p7)
}
  0x10   :  { %17 = dma.hbm_to_vmem [thread:$0]  %s128_s0, 128, %s15_s7, [#allocation3]  }
  0x11   :  { %87 = dma.done.wait [#allocation3], 128  }
  0x12   :  { %88 = vsyncadd [#allocation3], 4294967168  ;;  %v21_v0 = vld [vmem:[#allocation2] sm:$0xff]  ;;  %s92_s18 = smov 1   ;;  %s93_s19 = smov [#allocation5]  }
  0x13   :  { %22 = vrot.lane.b32.xlu0 %v21_v0, %s92_s18  ;;  %s31_s20 = sshll.u32 %s93_s19, 4  ;;  %s32_s20 = int_to_ptr.vmem [resolvable:$true] %s31_s20 }
  0x14   :  { %s65_s21 = scalar_lea.vmem %s32_s20, 128  ;;  %p70_p9 = scmp.lt.s32.totalorder %s32_s20, %s32_s20 }
  0x15   :  { %p66_p8 = scmp.ne.s32.totalorder %s32_s20, %s65_s21  ;;  %p71_p10 = scmp.lt.s32.totalorder %s65_s21, %s65_s21 }
  0x17   :  { %p72_p11 = por %p71_p10, %p70_p9 }
  0x19   :  { %p73_p12 = pnand %p72_p11, %p66_p8 }
  0x85   :  { %v23_v1 = vpop.permute.xlu0 %22 }
  0x86   :  { %24 = vst [vmem:[#allocation5] sm:$0xff] %v23_v1 }
  0x87   :  { %76 = shalt.err (!%p73_p12)
}
  0x88   :  { %s77_s0 = scalar_lea.hbm %s129_s1, 128 }
  0x89   :  { %p78_p13 = scmp.ne.s32.totalorder %s129_s1, %s77_s0  ;;  %p81_p0 = scmp.lt.u32.totalorder %s77_s0, %s129_s1 }
  0x8b   :  { %p83_p1 = pnand %p81_p0, %p78_p13 }
  0x8d   :  { %86 = shalt.err (!%p83_p1)
}
  0x8e   :  { %34 = dma.vmem_to_hbm [thread:$0]  %s32_s20, 128, %s129_s1, [#allocation4]  }
  0x8f   :  { %89 = dma.done.wait [#allocation4], 128  }
  0x90   :  { %90 = vsyncadd [#allocation4], 4294967168 }
  0x91   :  { %38 = vsyncpa [#allocation3], 1 }
  0x92   :  { %39 = vsyncpa [#allocation4], 1 }

// kernel: tpu_custom_call.1
= control target key start
LH: loop header
LB: loop body
LE: loop exit
PB: predicated region body
PF: predicated region fallthrough
CT: control target
= control target key end

     0   :  { %15 = vsyncpa [#allocation3], 0  ;;  %s5834_s0 = inlined_call_operand.vmem [shape: f32[8,8,256], index: 0, kind: input, shape index: {}]   ;;  %s5835_s1 = inlined_call_operand.vmem [shape: f32[24,8], index: 1, kind: input, shape index: {}]   ;;  %s5836_s2 = inlined_call_operand.hbm [shape: f32[8,74], index: 2, kind: input, shape index: {}]   ;;  %s5837_s3 = inlined_call_operand.vmem [shape: f32[32,9], index: 3, kind: input, shape index: {}]   ;;  %s5838_s4 = inlined_call_operand.vmem [shape: f32[16,2], index: 4, kind: input, shape index: {}]   ;;  %s5839_s5 = inlined_call_operand.vmem [shape: f32[32,8], index: 5, kind: input, shape index: {}]   ;;  %s5840_s6 = inlined_call_operand.hbm [shape: f32[8,32], index: 6, kind: input, shape index: {}]   ;;  %s5841_s7 = inlined_call_operand.vmem [shape: f32[8,9], index: 7, kind: input, shape index: {}]   ;;  %s5842_s8 = inlined_call_operand.vmem [shape: f32[32,2], index: 8, kind: input, shape index: {}]   ;;  %s5843_s9 = inlined_call_operand.vmem [shape: f32[30,1,256], index: 9, kind: input, shape index: {}]   ;;  %s5844_s10 = inlined_call_operand.hbm [shape: f32[8,8,256], index: 10, kind: output, shape index: {}]  }
   0x1   :  { %16 = vsyncpa [#allocation6], 0 }
   0x2   :  { %17 = vsyncpa [#allocation4], 0  ;;  %s3111_s13 = smov [#allocation2]   ;;  %s3112_s15 = smov [#allocation5]  }
   0x3   :  { %s28_s14 = sshll.u32 %s3111_s13, 4  ;;  %s44_s16 = sshll.u32 %s3112_s15, 4  ;;  %s29_s14 = int_to_ptr.vmem [resolvable:$true] %s28_s14  ;;  %s45_s16 = int_to_ptr.vmem [resolvable:$true] %s44_s16 }
   0x4   :  { %s3031_s19 = scalar_lea.hbm %s5836_s2, 128 }
   0x5   :  { %p3032_p0 = scmp.ne.s32.totalorder %s5836_s2, %s3031_s19  ;;  %p3035_p1 = scmp.lt.u32.totalorder %s3031_s19, %s5836_s2 }
   0x7   :  { %p3037_p2 = pnand %p3035_p1, %p3032_p0 }
   0x9   :  { %3040 = shalt.err (!%p3037_p2)
}
   0xa   :  { %s3041_s24 = scalar_lea.vmem %s29_s14, 128  ;;  %p3046_p4 = scmp.lt.s32.totalorder %s29_s14, %s29_s14 }
   0xb   :  { %p3042_p3 = scmp.ne.s32.totalorder %s29_s14, %s3041_s24  ;;  %p3047_p5 = scmp.lt.s32.totalorder %s3041_s24, %s3041_s24 }
   0xd   :  { %p3048_p6 = por %p3047_p5, %p3046_p4 }
   0xf   :  { %p3049_p7 = pnand %p3048_p6, %p3042_p3 }
  0x11   :  { %3052 = shalt.err (!%p3049_p7)
}
  0x12   :  { %31 = dma.hbm_to_vmem [thread:$0]  %s5836_s2, 128, %s29_s14, [#allocation3]  }
  0x13   :  { %s3053_s29 = scalar_lea.hbm %s5840_s6, 128 }
  0x14   :  { %p3054_p8 = scmp.ne.s32.totalorder %s5840_s6, %s3053_s29  ;;  %p3057_p9 = scmp.lt.u32.totalorder %s3053_s29, %s5840_s6 }
  0x16   :  { %p3059_p10 = pnand %p3057_p9, %p3054_p8 }
  0x18   :  { %3062 = shalt.err (!%p3059_p10)
}
  0x19   :  { %s3063_s15 = scalar_lea.vmem %s45_s16, 128  ;;  %p3068_p12 = scmp.lt.s32.totalorder %s45_s16, %s45_s16 }
  0x1a   :  { %p3064_p11 = scmp.ne.s32.totalorder %s45_s16, %s3063_s15  ;;  %p3069_p13 = scmp.lt.s32.totalorder %s3063_s15, %s3063_s15 }
  0x1c   :  { %p3070_p0 = por %p3069_p13, %p3068_p12 }
  0x1e   :  { %p3071_p1 = pnand %p3070_p0, %p3064_p11 }
  0x20   :  { %3074 = shalt.err (!%p3071_p1)
}
  0x21   :  { %47 = dma.hbm_to_vmem [thread:$0]  %s5840_s6, 128, %s45_s16, [#allocation6]  }
  0x22   :  { %3101 = dma.done.wait [#allocation3], 128  }
  0x23   :  { %3102 = vsyncadd [#allocation3], 4294967168 }
  0x24   :  { %3103 = dma.done.wait [#allocation6], 128  }
  0x25   :  { %3104 = vsyncadd [#allocation6], 4294967168  ;;  %s3338_s17 = smov 0  }
  0x26 LB: > { %v71_v0 = vld [vmem:[%s5841_s7] sm:$0xff]  ;;  %v5859_v1 = vmov 0   ;;  %v5853_v2 = vmov 1   ;;  %v5857_v3 = vmov 0.0   ;;  %v5851_v4 = vmov 2   ;;  %s5870_s6 = sshll.u32 %s3109_s17, 4  ;;  %s3109_s17 = sphi %s3338_s17, %s65_s17  }
  0x27   : > { %2890 = vset.pattern.permute.xlu0 %v5859_v1  ;;  %158 = vmatprep.mubr.f32.mxu0 %v5857_v3  ;;  %v3351_v5 = vld [vmem:[#allocation2] sm:$0xff]  ;;  %v5847_v6 = vmov 5   ;;  %v5861_v7 = vmov 7   ;;  %v3119_v8 = vmov 10   ;;  %v5863_v9 = vmov 6   ;;  %s3412_s21 = scalar_lea.vmem %s5834_s0, %s5870_s6  ;;  %s5879_s24 = smov 96  }
  0x28   : > { %74 = vperm.xlu0 %2890, %v71_v0   ;;  %1658 = vmatprep.mubr.f32.mxu1 %v5857_v3  ;;  %v3121_v10 = vmov 16   ;;  %v3122_v11 = vmov 9   ;;  %v5849_v12 = vmov 3   ;;  %v3124_v13 = vmov 20   ;;  %v70_v50 = vld [vmem:[%s3412_s21 + $0x8] sm:$0xff]  ;;  %v69_v51 = vld [vmem:[%s3412_s21] sm:$0xff] }
  0x29   : > { %2892 = vset.pattern.permute.xlu1 %v5851_v4  ;;  %v5845_v14 = vmov 8   ;;  %v3126_v15 = vmov 18   ;;  %v3127_v16 = vmov 11   ;;  %v3128_v17 = vmov 19   ;;  %v85_v59 = vld [vmem:[%s5835_s1] sm:$0xff]  ;;  %s5874_s25 = smov 32  }
  0x2a   : > { %87 = vperm.xlu1 %2892, %v71_v0   ;;  %v3129_v18 = vmov 15   ;;  %v3130_v19 = vmov 12   ;;  %v3131_v20 = vmov 32   ;;  %v3132_v21 = vmov 17   ;;  %s5881_s26 = smov 16   ;;  %s5872_s11 = smov 112  }
  0x2b   : > { %v3133_v22 = vmov 34   ;;  %v3134_v23 = vmov 21   ;;  %v3135_v24 = vmov 28   ;;  %v3136_v25 = vmov 13   ;;  %s3192_s15 = smov 33   ;;  %s3193_s2 = smov 34  }
  0x2c   : > { %2891 = vset.pattern.permute.xlu0 %v5853_v2  ;;  %v3137_v26 = vmov 29   ;;  %v3138_v27 = vmov 22   ;;  %v3139_v28 = vmov 36   ;;  %v3140_v29 = vmov 14   ;;  %s5953_s14 = smov 17   ;;  %s3195_s18 = smov 18  }
  0x2d   : > { %80 = vperm.xlu0 %2891, %v71_v0   ;;  %v3141_v30 = vmov 47   ;;  %v3142_v31 = vmov 23   ;;  %v3143_v32 = vmov 30   ;;  %v3144_v33 = vmov 24   ;;  %s3196_s19 = smov 114   ;;  %s3197_s16 = smov 31  }
  0x2e   : > { %2893 = vset.pattern.permute.xlu1 %v5859_v1  ;;  %v3145_v34 = vmov 37   ;;  %v3146_v35 = vmov 25   ;;  %v3147_v36 = vmov 43   ;;  %v3148_v37 = vmov 26   ;;  %s5945_s20 = smov 113   ;;  %s5949_s22 = smov 15  }
  0x2f   : > { %254 = vperm.xlu1 %2893, %v3351_v5   ;;  %v3149_v38 = vmov 60   ;;  %v3150_v39 = vmov 33   ;;  %v3151_v40 = vmov 38   ;;  %v3152_v41 = vmov 27   ;;  %s5951_s28 = smov 127   ;;  %s3201_s29 = smov 2  }
  0x30   : > { %v3153_v42 = vmov 44   ;;  %v3154_v43 = vmov 39   ;;  %v3155_v44 = vmov 62   ;;  %v3156_v45 = vmov 40   ;;  %s5947_s30 = smov 111   ;;  %s5955_s12 = smov 1  }
  0x31   : > { %2895 = vset.pattern.permute.xlu0 %v5847_v6  ;;  %v3157_v46 = vmov 45   ;;  %v3158_v47 = vmov 35   ;;  %v3159_v48 = vmov 50   ;;  %v3160_v52 = vmov 41   ;;  %s3204_s13 = smov 126   ;;  %s3205_s23 = smov 30  }
  0x32   : > { %342 = vperm.xlu0 %2895, %v3351_v5   ;;  %v3161_v55 = vmov 57   ;;  %vm90_vm0 = vcmask 64512   ;;  %v3162_v60 = vmov 42   ;;  %v3163_v61 = vmov 51   ;;  %s3206_s27 = smov 110   ;;  %s3207_s6 = smov 14  }
  0x33   : > { %2894 = vset.pattern.permute.xlu1 %v5853_v2  ;;  %v3164_v62 = vmov 46   ;;  %v3165_v63 = vmov 58  }
  0x34   : > { %267 = vperm.xlu1 %2894, %v3351_v5  }
  0x36   : > { %2898 = vset.pattern.permute.xlu0 %v5861_v7 }
  0x37   : > { %370 = vperm.xlu0 %2898, %v3351_v5  }
  0x38   : > { %2896 = vset.pattern.permute.xlu1 %v5863_v9 }
  0x39   : > { %355 = vperm.xlu1 %2896, %v3351_v5  }
  0x3b   : > { %2901 = vset.pattern.permute.xlu0 %v3119_v8  ;;  %v3167_v8 = vmov 64  }
  0x3c   : > { %432 = vperm.xlu0 %2901, %v3351_v5  }
  0x3d   : > { %2897 = vset.pattern.permute.xlu1 %v5851_v4 }
  0x3e   : > { %282 = vperm.xlu1 %2897, %v3351_v5  }
  0x40   : > { %2904 = vset.pattern.permute.xlu0 %v3121_v10  ;;  %v3168_v10 = vmov 54  }
  0x41   : > { %513 = vperm.xlu0 %2904, %v3351_v5  }
  0x42   : > { %2899 = vset.pattern.permute.xlu1 %v5849_v12 }
  0x43   : > { %297 = vperm.xlu1 %2899, %v3351_v5  }
  0x45   : > { %2905 = vset.pattern.permute.xlu0 %v3122_v11  ;;  %v3169_v11 = vmov 59  }
  0x46   : > { %400 = vperm.xlu0 %2905, %v3351_v5  }
  0x47   : > { %2900 = vset.pattern.permute.xlu1 %v5845_v14 }
  0x48   : > { %385 = vperm.xlu1 %2900, %v3351_v5  }
  0x4a   : > { %2908 = vset.pattern.permute.xlu0 %v3124_v13  ;;  %v3170_v13 = vmov 48  }
  0x4b   : > { %590 = vperm.xlu0 %2908, %v3351_v5  }
  0x4c   : > { %2902 = vset.pattern.permute.xlu1 %v3127_v16  ;;  %v3172_v16 = vmov 55  }
  0x4d   : > { %445 = vperm.xlu1 %2902, %v3351_v5  }
  0x4f   : > { %2911 = vset.pattern.permute.xlu0 %v3126_v15  ;;  %v3171_v15 = vmov 65  }
  0x50   : > { %543 = vperm.xlu0 %2911, %v3351_v5  }
  0x51   : > { %2903 = vset.pattern.permute.xlu1 %v3129_v18  ;;  %v3174_v18 = vmov 61  }
  0x52   : > { %500 = vperm.xlu1 %2903, %v3351_v5  }
  0x54   : > { %2914 = vset.pattern.permute.xlu0 %v3128_v17  ;;  %v3173_v17 = vmov 71  }
  0x55   : > { %558 = vperm.xlu0 %2914, %v3351_v5  }
  0x56   : > { %2906 = vset.pattern.permute.xlu1 %v3130_v19  ;;  %v3175_v19 = vmov 66  }
  0x57   : > { %453 = vperm.xlu1 %2906, %v3351_v5  }
  0x59   : > { %2917 = vset.pattern.permute.xlu0 %v5849_v12  ;;  %v2694_v12 = vld [vmem:[%s5843_s9 + $0x6] sm:$0x3] }
  0x5a   : > { %673 = vperm.xlu0 %2917, %v71_v0   ;;  %v3166_v0 = vmov 53  }
  0x5b   : > { %2907 = vset.pattern.permute.xlu1 %v3132_v21  ;;  %v3177_v21 = vmov 72  }
  0x5c   : > { %528 = vperm.xlu1 %2907, %v3351_v5  }
  0x5e   : > { %2920 = vset.pattern.permute.xlu0 %v3131_v20  ;;  %v3176_v20 = vmov 31  }
  0x5f   : > { %893 = vperm.xlu0 %2920, %v3351_v5  }
  0x60   : > { %2909 = vset.pattern.permute.xlu1 %v3134_v23  ;;  %v3179_v23 = vmov 56  }
  0x61   : > { %603 = vperm.xlu1 %2909, %v3351_v5  }
  0x63   : > { %2923 = vset.pattern.permute.xlu0 %v3133_v22  ;;  %v3178_v22 = vmov 49  }
  0x64   : > { %921 = vperm.xlu0 %2923, %v3351_v5  }
  0x65   : > { %2910 = vset.pattern.permute.xlu1 %v3136_v25  ;;  %v3181_v25 = vmov 68  }
  0x66   : > { %468 = vperm.xlu1 %2910, %v3351_v5  }
  0x68   : > { %2926 = vset.pattern.permute.xlu0 %v3135_v24  ;;  %v3180_v24 = vmov 67  }
  0x69   : > { %818 = vperm.xlu0 %2926, %v3351_v5  }
  0x6a   : > { %2912 = vset.pattern.permute.xlu1 %v3138_v27  ;;  %v3183_v27 = vmov 69  }
  0x6b   : > { %618 = vperm.xlu1 %2912, %v3351_v5  }
  0x6d   : > { %2929 = vset.pattern.permute.xlu0 %v3137_v26  ;;  %v3182_v26 = vmov 63  }
  0x6e   : > { %833 = vperm.xlu0 %2929, %v3351_v5  }
  0x6f   : > { %2913 = vset.pattern.permute.xlu1 %v3140_v29  ;;  %v3185_v29 = vmov 73  }
  0x70   : > { %483 = vperm.xlu1 %2913, %v3351_v5  }
  0x72   : > { %2930 = vset.pattern.permute.xlu0 %v3139_v28  ;;  %v3184_v28 = vmov 70  }
  0x73   : > { %950 = vperm.xlu0 %2930, %v3351_v5  }
  0x74   : > { %2915 = vset.pattern.permute.xlu1 %v3142_v31  ;;  %v5855_v31 = vmov 4  }
  0x75   : > { %633 = vperm.xlu1 %2915, %v3351_v5  }
  0x77   : > { %2933 = vset.pattern.permute.xlu0 %v3141_v30  ;;  %v3186_v30 = vmov 52  }
  0x78   : > { %1145 = vperm.xlu0 %2933, %v3351_v5  }
  0x79   : > { %2916 = vset.pattern.permute.xlu1 %v3144_v33 }
  0x7a   : > { %648 = vperm.xlu1 %2916, %v3351_v5  }
  0x7c   : > { %2936 = vset.pattern.permute.xlu0 %v3143_v32 }
  0x7d   : > { %848 = vperm.xlu0 %2936, %v3351_v5  }
  0x7e   : > { %2918 = vset.pattern.permute.xlu1 %v3146_v35 }
  0x7f   : > { %776 = vperm.xlu1 %2918, %v3351_v5  }
  0x81   : > { %2937 = vset.pattern.permute.xlu0 %v3145_v34 }
  0x82   : > { %965 = vperm.xlu0 %2937, %v3351_v5  }
  0x83   : > { %2919 = vset.pattern.permute.xlu1 %v3148_v37 }
  0x84   : > { %789 = vperm.xlu1 %2919, %v3351_v5  }
  0x86   : > { %2938 = vset.pattern.permute.xlu0 %v3147_v36 }
  0x87   : > { %1070 = vperm.xlu0 %2938, %v3351_v5  }
  0x88   : > { %2921 = vset.pattern.permute.xlu1 %v3150_v39 }
  0x89   : > { %906 = vperm.xlu1 %2921, %v3351_v5  }
  0x8b   : > { %2941 = vset.pattern.permute.xlu0 %v3149_v38 }
  0x8c   : > { %1350 = vperm.xlu0 %2941, %v3351_v5  }
  0x8d   : > { %2922 = vset.pattern.permute.xlu1 %v3152_v41 }
  0x8e   : > { %804 = vperm.xlu1 %2922, %v3351_v5  }
  0x90   : > { %2944 = vset.pattern.permute.xlu0 %v3151_v40 }
  0x91   : > { %980 = vperm.xlu0 %2944, %v3351_v5  }
  0x92   : > { %2924 = vset.pattern.permute.xlu1 %v3154_v43 }
  0x93   : > { %1012 = vperm.xlu1 %2924, %v3351_v5  }
  0x95   : > { %2945 = vset.pattern.permute.xlu0 %v3153_v42 }
  0x96   : > { %1085 = vperm.xlu0 %2945, %v3351_v5  }
  0x97   : > { %2925 = vset.pattern.permute.xlu1 %v3156_v45 }
  0x98   : > { %1025 = vperm.xlu1 %2925, %v3351_v5  }
  0x9a   : > { %2948 = vset.pattern.permute.xlu0 %v3155_v44 }
  0x9b   : > { %1378 = vperm.xlu0 %2948, %v3351_v5  }
  0x9c   : > { %2927 = vset.pattern.permute.xlu1 %v3158_v47 }
  0x9d   : > { %935 = vperm.xlu1 %2927, %v3351_v5  }
  0x9f   : > { %2951 = vset.pattern.permute.xlu0 %v3157_v46 }
  0xa0   : > { %1100 = vperm.xlu0 %2951, %v3351_v5  }
  0xa1   : > { %2928 = vset.pattern.permute.xlu1 %v3160_v52 }
  0xa2   : > { %1040 = vperm.xlu1 %2928, %v3351_v5  }
  0xa4   : > { %2952 = vset.pattern.permute.xlu0 %v3159_v48 }
  0xa5   : > { %1183 = vperm.xlu0 %2952, %v3351_v5  }
  0xa6   : > { %2931 = vset.pattern.permute.xlu1 %v3162_v60 }
  0xa7   : > { %v75_v49 = vpop.permute.xlu0 %74  ;;  %1055 = vperm.xlu1 %2931, %v3351_v5  }
  0xa8   : > { %v78_v53 = vmul.f32 %v75_v49, %v70_v50  ;;  %v77_v54 = vmul.f32 %v75_v49, %v69_v51 }
  0xa9   : > { %2953 = vset.pattern.permute.xlu0 %v3161_v55  ;;  %v88_v32 = vpop.permute.xlu1 %87 }
  0xaa   : > { %1288 = vperm.xlu0 %2953, %v3351_v5  }
  0xab   : > { %2932 = vset.pattern.permute.xlu1 %v3164_v62 }
  0xac   : > { %v81_v56 = vpop.permute.xlu0 %80  ;;  %1132 = vperm.xlu1 %2932, %v3351_v5  }
  0xad   : > { %v3420_v57 = vadd.f32 %v81_v56, %v78_v53  ;;  %v3422_v58 = vadd.f32 %v81_v56, %v77_v54 }
  0xae   : > { %2956 = vset.pattern.permute.xlu0 %v3163_v61  ;;  %v3459_v33 = vpop.permute.xlu1 %254 }
  0xaf   : > { %5998 = vst [vmem:[#allocation11_spill] sm:$0xff] %v3420_v57  ;;  %5999 = vst [vmem:[#allocation12_spill] sm:$0xff] %v3422_v58  ;;  %94 = vmatprep.subr.mxu0 %v3420_v57  ;;  %1198 = vperm.xlu0 %2956, %v3351_v5  }
  0xb0   : > { %95 = vmatpush1.msra.mxu0 %v3422_v58  ;;  %2934 = vset.pattern.permute.xlu1 %v3166_v0 }
  0xb1   : > { %2692 = vmatmul.mubr.msk.f32.vlgmr.msra.gmra.mrb[0].mxu0 %vm90_vm0, %v85_v59  ;;  %1230 = vperm.xlu1 %2934, %v3351_v5   ;;  %v3471_v39 = vpop.permute.xlu0 %342 }
  0xb2   : > { %1767 = vmatprep.mubr.f32.mxu0 %v5857_v3 }
  0xb3   : > { %2957 = vset.pattern.permute.xlu0 %v3165_v63  ;;  %v3461_v34 = vpop.permute.xlu1 %267 }
  0xb4   : > { %1303 = vperm.xlu0 %2957, %v3351_v5  }
  0xb5   : > { %2935 = vset.pattern.permute.xlu1 %v3168_v10 }
  0xb6   : > { %1243 = vperm.xlu1 %2935, %v3351_v5  }
  0xb8   : > { %2958 = vset.pattern.permute.xlu0 %v3167_v8  ;;  %v3463_v35 = vpop.permute.xlu1 %355 }
  0xb9   : > { %1407 = vperm.xlu0 %2958, %v3351_v5  }
  0xba   : > { %2939 = vset.pattern.permute.xlu1 %v3170_v13 }
  0xbb   : > { %1160 = vperm.xlu1 %2939, %v3351_v5  }
  0xbd   : > { %2961 = vset.pattern.permute.xlu0 %v3169_v11  ;;  %v3465_v36 = vpop.permute.xlu1 %282 }
  0xbe   : > { %1318 = vperm.xlu0 %2961, %v3351_v5  }
  0xbf   : > { %2940 = vset.pattern.permute.xlu1 %v3172_v16 }
  0xc0   : > { %1258 = vperm.xlu1 %2940, %v3351_v5  }
  0xc2   : > { %2962 = vset.pattern.permute.xlu0 %v3171_v15  ;;  %v3467_v37 = vpop.permute.xlu1 %297 }
  0xc3   : > { %1422 = vperm.xlu0 %2962, %v3351_v5  }
  0xc4   : > { %2942 = vset.pattern.permute.xlu1 %v3174_v18 }
  0xc5   : > { %1363 = vperm.xlu1 %2942, %v3351_v5  }
  0xc7   : > { %2963 = vset.pattern.permute.xlu0 %v3173_v17  ;;  %v3469_v38 = vpop.permute.xlu1 %385 }
  0xc8   : > { %1526 = vperm.xlu0 %2963, %v3351_v5  }
  0xc9   : > { %2943 = vset.pattern.permute.xlu1 %v3176_v20 }
  0xca   : > { %863 = vperm.xlu1 %2943, %v3351_v5  }
  0xcc   : > { %2964 = vset.pattern.permute.xlu0 %v3175_v19  ;;  %v3473_v40 = vpop.permute.xlu1 %445 }
  0xcd   : > { %1437 = vperm.xlu0 %2964, %v3351_v5  }
  0xce   : > { %2946 = vset.pattern.permute.xlu1 %v3178_v22 }
  0xcf   : > { %1168 = vperm.xlu1 %2946, %v3351_v5  }
  0xd1   : > { %2965 = vset.pattern.permute.xlu0 %v3177_v21  ;;  %v3477_v41 = vpop.permute.xlu1 %500 }
  0xd2   : > { %1541 = vperm.xlu0 %2965, %v3351_v5  }
  0xd3   : > { %2947 = vset.pattern.permute.xlu1 %v3179_v23 }
  0xd4   : > { %1273 = vperm.xlu1 %2947, %v3351_v5  }
  0xd6   : > { %2966 = vset.pattern.permute.xlu0 %v3185_v29  ;;  %v3481_v43 = vpop.permute.xlu1 %453 }
  0xd7   : > { %1556 = vperm.xlu0 %2966, %v3351_v5  }
  0xd8   : > { %2949 = vset.pattern.permute.xlu1 %v3180_v24 }
  0xd9   : > { %1469 = vperm.xlu1 %2949, %v3351_v5  }
  0xdb   : > { %2967 = vset.pattern.permute.xlu0 %v5855_v31  ;;  %v3485_v45 = vpop.permute.xlu1 %528 }
  0xdc   : > { %312 = vperm.xlu0 %2967, %v3351_v5  }
  0xdd   : > { %2950 = vset.pattern.permute.xlu1 %v3181_v25 }
  0xde   : > { %1482 = vperm.xlu1 %2950, %v3351_v5  }
  0xe0   : > { %v3489_v47 = vpop.permute.xlu1 %603 }
  0xe1   : > { %6000 = vst [vmem:[#allocation13_spill] sm:$0xff] %v3489_v47 }
  0xe2   : > { %2954 = vset.pattern.permute.xlu1 %v3182_v26 }
  0xe3   : > { %1392 = vperm.xlu1 %2954, %v3351_v5  }
  0xe5   : > { %v3493_v49 = vpop.permute.xlu1 %468 }
  0xe6   : > { %6001 = vst [vmem:[#allocation14_spill] sm:$0xff] %v3493_v49 }
  0xe7   : > { %2955 = vset.pattern.permute.xlu1 %v3183_v27 }
  0xe8   : > { %1497 = vperm.xlu1 %2955, %v3351_v5  }
  0xea   : > { %v3497_v51 = vpop.permute.xlu1 %618 }
  0xec   : > { %2959 = vset.pattern.permute.xlu1 %v3184_v28 }
  0xed   : > { %1511 = vperm.xlu1 %2959, %v3351_v5  }
  0xef   : > { %v3501_v53 = vpop.permute.xlu1 %483 }
  0xf0   : > { %6004 = vst [vmem:[#allocation17_spill] sm:$0xff] %v3501_v53 }
  0xf1   : > { %2960 = vset.pattern.permute.xlu1 %v3186_v30 }
  0xf2   : > { %1213 = vperm.xlu1 %2960, %v3351_v5   ;;  %v3475_v5 = vpop.permute.xlu0 %370 }
  0xf4   : > { %v3505_v55 = vpop.permute.xlu1 %633 }
  0xf5   : > { %6006 = vst [vmem:[#allocation19_spill] sm:$0xff] %v3505_v55  ;;  %v3787_v55 = vld [vmem:[%s5843_s9 + $0xc] sm:$0x3] }
  0xf6   : > { %2968 = vset.pattern.permute.xlu1 %v5847_v6  ;;  %v3479_v42 = vpop.permute.xlu0 %432  ;;  %6064 = vst [vmem:[#allocation76_spill] sm:$0xff] %v3787_v55 }
  0xf9   : > { %v3509_v59 = vpop.permute.xlu1 %648 }
  0xfa   : > { %v3483_v44 = vpop.permute.xlu0 %513  ;;  %6008 = vst [vmem:[#allocation21_spill] sm:$0xff] %v3509_v59 }
  0xfe   : > { %v3487_v46 = vpop.permute.xlu0 %400  ;;  %v3513_v61 = vpop.permute.xlu1 %776 }
  0xff   : > { %6010 = vst [vmem:[#allocation23_spill] sm:$0xff] %v3513_v61 }
 0x102   : > { %v3491_v48 = vpop.permute.xlu0 %590 }
 0x103   : > { %v3517_v15 = vpop.permute.xlu1 %789 }
 0x104   : > { %6012 = vst [vmem:[#allocation25_spill] sm:$0xff] %v3517_v15 }
 0x106   : > { %v3495_v50 = vpop.permute.xlu0 %543 }
 0x107   : > { %6002 = vst [vmem:[#allocation15_spill] sm:$0xff] %v3495_v50 }
 0x108   : > { %v3521_v23 = vpop.permute.xlu1 %906 }
 0x109   : > { %6014 = vst [vmem:[#allocation27_spill] sm:$0xff] %v3521_v23 }
 0x10a   : > { %v3499_v52 = vpop.permute.xlu0 %558 }
 0x10b   : > { %6003 = vst [vmem:[#allocation16_spill] sm:$0xff] %v3499_v52 }
 0x10d   : > { %v3525_v27 = vpop.permute.xlu1 %804 }
 0x10e   : > { %v3503_v54 = vpop.permute.xlu0 %673  ;;  %6016 = vst [vmem:[#allocation29_spill] sm:$0xff] %v3525_v27 }
 0x10f   : > { %6005 = vst [vmem:[#allocation18_spill] sm:$0xff] %v3503_v54  ;;  %v3773_v54 = vld [vmem:[%s5843_s9 + $0xa] sm:$0x3] }
 0x112   : > { %v3507_v56 = vpop.permute.xlu0 %893  ;;  %v3529_v29 = vpop.permute.xlu1 %1012 }
 0x113   : > { %6007 = vst [vmem:[#allocation20_spill] sm:$0xff] %v3507_v56  ;;  %6018 = vst [vmem:[#allocation31_spill] sm:$0xff] %v3529_v29 }
 0x116   : > { %v3511_v60 = vpop.permute.xlu0 %921 }
 0x117   : > { %6009 = vst [vmem:[#allocation22_spill] sm:$0xff] %v3511_v60 }
 0x11a   : > { %v3515_v62 = vpop.permute.xlu0 %818 }
 0x11b   : > { %6011 = vst [vmem:[#allocation24_spill] sm:$0xff] %v3515_v62 }
 0x11e   : > { %v3519_v16 = vpop.permute.xlu0 %833 }
 0x11f   : > { %6013 = vst [vmem:[#allocation26_spill] sm:$0xff] %v3519_v16 }
 0x122   : > { %v3523_v24 = vpop.permute.xlu0 %950 }
 0x123   : > { %6015 = vst [vmem:[#allocation28_spill] sm:$0xff] %v3523_v24 }
 0x126   : > { %v3527_v28 = vpop.permute.xlu0 %1145 }
 0x127   : > { %6017 = vst [vmem:[#allocation30_spill] sm:$0xff] %v3527_v28 }
 0x12a   : > { %v3531_v30 = vpop.permute.xlu0 %848 }
 0x12b   : > { %6019 = vst [vmem:[#allocation32_spill] sm:$0xff] %v3531_v30 }
 0x184   : > { %v160_v63 = vpop.f32.mrb[0].mxu0 }
 0x185   : > { %v161_v0 = vadd.f32 %v160_v63, %v88_v32  ;;  %v162_v8 = vpop.f32.mrb[1].mxu0 }
 0x186   : > { %v163_v10 = vadd.f32 %v162_v8, %v88_v32 }
 0x187   : > { %v165_v11 = vmul.f32 %v161_v0, %v161_v0  ;;  %v173_v8 = vmul.f32 0.5, %v161_v0 }
 0x188   : > { %v166_v13 = vmul.f32 %v163_v10, %v163_v10 }
 0x189   : > { %v167_v17 = vmul.f32 %v165_v11, %v161_v0 }
 0x18a   : > { %v168_v18 = vmul.f32 %v166_v13, %v163_v10 }
 0x18b   : > { %v169_v19 = vmul.f32 0.044715, %v167_v17 }
 0x18c   : > { %v170_v20 = vmul.f32 0.044715, %v168_v18  ;;  %v5865_v18 = vlaneseq }
 0x18d   : > { %v171_v21 = vadd.f32 %v169_v19, %v161_v0  ;;  %v174_v19 = vmul.f32 0.5, %v163_v10 }
 0x18e   : > { %v172_v22 = vadd.f32 %v170_v20, %v163_v10  ;;  %v3539_v20 = vpop.permute.xlu1 %1025  ;;  %v3546_v0 = vshrl.u32 %v5865_v18, 7 }
 0x18f   : > { %v175_v25 = vmul.f32 0.7978846, %v171_v21  ;;  %6021 = vst [vmem:[#allocation34_spill] sm:$0xff] %v3539_v20  ;;  %v3541_v21 = vpop.permute.xlu0 %965 }
 0x190   : > { %v176_v26 = vmul.f32 0.7978846, %v172_v22  ;;  %6022 = vst [vmem:[#allocation35_spill] sm:$0xff] %v3541_v21  ;;  %v3553_v10 = vsub.s32 0, %v3546_v0 }
 0x191   : > { %3001 = vtanh.f32 %v175_v25 }
 0x192   : > { %3003 = vtanh.f32 %v176_v26  ;;  %v3555_v25 = vpop.permute.xlu1 %935  ;;  %v219_v4 = vrot.slane %v2694_v12, %v3553_v10 }
 0x193   : > { %6024 = vst [vmem:[#allocation37_spill] sm:$0xff] %v3555_v25  ;;  %v3557_v26 = vpop.permute.xlu0 %1070 }
 0x194   : > { %6025 = vst [vmem:[#allocation38_spill] sm:$0xff] %v3557_v26 }
 0x19b   : > { %v3002_v32 = vpop.eup %3001 }
 0x19c   : > { %v3004_v63 = vpop.eup %3003  ;;  %v179_v11 = vadd.f32 1.0, %v3002_v32  ;;  %v3562_v32 = vld [vmem:[%s5843_s9 + $0x2] sm:$0x3] }
 0x19d   : > { %v180_v17 = vadd.f32 1.0, %v3004_v63  ;;  %v3567_v63 = vld [vmem:[%s5843_s9] sm:$0x3] }
 0x19e   : > { %v3533_v13 = vmul.f32 %v179_v11, %v173_v8  ;;  %v204_v8 = vrot.slane %v3562_v32, %v3553_v10  ;;  %v189_v11 = vrot.slane %v3567_v63, %v3553_v10 }
 0x19f   : > { %v3543_v22 = vmul.f32 %v180_v17, %v174_v19  ;;  %v3581_v17 = vpop.permute.xlu1 %1040  ;;  %v3583_v19 = vpop.permute.xlu0 %1350 }
 0x1a0   : > { %6020 = vst [vmem:[#allocation33_spill] sm:$0xff] %v3533_v13  ;;  %610 = vrot.lane.b32.xlu0 %v3533_v13, %s5879_s24  ;;  %274 = vrot.lane.b32.xlu1 %v3533_v13, %s5874_s25  ;;  %6026 = vst [vmem:[#allocation39_spill] sm:$0xff] %v3581_v17  ;;  %v211_v14 = vmul.f32 %v204_v8, %v3533_v13  ;;  %v196_v6 = vmul.f32 %v189_v11, %v3533_v13 }
 0x1a1   : > { %6023 = vst [vmem:[#allocation36_spill] sm:$0xff] %v3543_v22  ;;  %6027 = vst [vmem:[#allocation40_spill] sm:$0xff] %v3583_v19  ;;  %v226_v8 = vmul.f32 %v219_v4, %v3533_v13  ;;  %v2695_v4 = vld [vmem:[%s5843_s9 + $0x8] sm:$0x3] }
 0x1a2   : > { %v234_v9 = vrot.slane %v2695_v4, %v3553_v10 }
 0x1a3   : > { %v3593_v2 = vpop.permute.xlu1 %1055  ;;  %v3595_v31 = vpop.permute.xlu0 %980 }
 0x1a4   : > { %276 = vrot.lane.b32.xlu0 %v3543_v22, %s5874_s25  ;;  %362 = vrot.lane.b32.xlu1 %v3533_v13, %s5881_s26  ;;  %6028 = vst [vmem:[#allocation41_spill] sm:$0xff] %v3593_v2  ;;  %6029 = vst [vmem:[#allocation42_spill] sm:$0xff] %v3595_v31  ;;  %v241_v58 = vmul.f32 %v234_v9, %v3533_v13  ;;  %s3209_s25 = smov 98   ;;  %v6063_v2 = vlaneseq }
 0x1a6   : > { %v3761_v25 = vand.u32 127, %v6063_v2  ;;  %v3777_v2 = vmul.f32 %v3481_v43, %v3533_v13 }
 0x1a7   : > { %v3602_v11 = vpop.permute.xlu1 %1132  ;;  %v3604_v3 = vpop.permute.xlu0 %1085 }
 0x1a8   : > { %364 = vrot.lane.b32.xlu0 %v3543_v22, %s5881_s26  ;;  %520 = vrot.lane.b32.xlu1 %v3533_v13, %s5872_s11  ;;  %6030 = vst [vmem:[#allocation43_spill] sm:$0xff] %v3602_v11  ;;  %6031 = vst [vmem:[#allocation44_spill] sm:$0xff] %v3604_v3  ;;  %s3211_s26 = smov 97   ;;  %vm278_vm1 = vcmp.lt.s32.totalorder %v3761_v25, 32  ;;  %vm263_vm2 = vcmp.lt.s32.totalorder %v3761_v25, 33  ;;  %vm366_vm3 = vcmp.lt.s32.totalorder %v3761_v25, 16 }
 0x1a9   : > { %vm524_vm4 = vcmp.lt.s32.totalorder %v3761_v25, 112  ;;  %vm614_vm5 = vcmp.lt.s32.totalorder %v3761_v25, 96  ;;  %vm293_vm6 = vcmp.lt.s32.totalorder %v3761_v25, 31  ;;  %vm249_vm7 = vcmp.lt.s32.totalorder %v3761_v25, 34 }
 0x1aa   : > { %vm338_vm8 = vcmp.lt.s32.totalorder %v3761_v25, 18  ;;  %vm5944_vm9 = vcmp.lt.s32.totalorder %v3761_v25, 1  ;;  %vm351_vm10 = vcmp.lt.s32.totalorder %v3761_v25, 17  ;;  %vm428_vm11 = vcmp.lt.s32.totalorder %v3761_v25, 2 }
 0x1ab   : > { %v3608_v1 = vpop.permute.xlu1 %1230  ;;  %v3610_v7 = vpop.permute.xlu0 %1378  ;;  %vm308_vm12 = vcmp.lt.s32.totalorder %v3761_v25, 30  ;;  %vm381_vm13 = vcmp.lt.s32.totalorder %v3761_v25, 15  ;;  %vm5974_vm14 = vcmp.lt.s32.totalorder %v3761_v25, 113  ;;  %vm496_vm15 = vcmp.lt.s32.totalorder %v3761_v25, 114 }
 0x1ac   : > { %522 = vrot.lane.b32.xlu0 %v3543_v22, %s5872_s11  ;;  %612 = vrot.lane.b32.xlu1 %v3543_v22, %s5879_s24  ;;  %6032 = vst [vmem:[#allocation45_spill] sm:$0xff] %v3608_v1  ;;  %6033 = vst [vmem:[#allocation46_spill] sm:$0xff] %v3610_v7  ;;  %s3208_s11 = smov 95   ;;  %s3210_s24 = smov 94  }
 0x1af   : > { %v3620_v18 = vpop.permute.xlu1 %1243  ;;  %v3622_v57 = vpop.permute.xlu0 %1100 }
 0x1b0   : > { %259 = vrot.lane.b32.xlu0 %v211_v14, %s3192_s15  ;;  %243 = vrot.lane.b32.xlu1 %v196_v6, %s3193_s2  ;;  %6034 = vst [vmem:[#allocation47_spill] sm:$0xff] %v3620_v18  ;;  %6035 = vst [vmem:[#allocation48_spill] sm:$0xff] %v3622_v57  ;;  %v3634_v57 = vsub.s32 1, %v3546_v0 }
 0x1b2   : > { %v193_v31 = vrot.slane %v3567_v63, %v3634_v57 }
 0x1b3   : > { %v3627_v7 = vpop.permute.xlu1 %1160  ;;  %v3629_v19 = vpop.permute.xlu0 %1183 }
 0x1b4   : > { %347 = vrot.lane.b32.xlu0 %v211_v14, %s5953_s14  ;;  %334 = vrot.lane.b32.xlu1 %v196_v6, %s3195_s18  ;;  %6036 = vst [vmem:[#allocation49_spill] sm:$0xff] %v3627_v7  ;;  %6037 = vst [vmem:[#allocation50_spill] sm:$0xff] %v3629_v19  ;;  %v223_v19 = vrot.slane %v2694_v12, %v3634_v57 }
 0x1b6   : > { %v227_v0 = vmul.f32 %v223_v19, %v3543_v22 }
 0x1b7   : > { %v3638_v9 = vpop.permute.xlu1 %1258  ;;  %v3640_v3 = vpop.permute.xlu0 %1288 }
 0x1b8   : > { %492 = vrot.lane.b32.xlu0 %v196_v6, %s3196_s19  ;;  %289 = vrot.lane.b32.xlu1 %v226_v8, %s3197_s16  ;;  %6038 = vst [vmem:[#allocation51_spill] sm:$0xff] %v3638_v9  ;;  %6039 = vst [vmem:[#allocation52_spill] sm:$0xff] %v3640_v3 }
 0x1bb   : > { %v3651_v9 = vpop.permute.xlu1 %1363  ;;  %v3653_v3 = vpop.permute.xlu0 %1198 }
 0x1bc   : > { %505 = vrot.lane.b32.xlu0 %v211_v14, %s5945_s20  ;;  %377 = vrot.lane.b32.xlu1 %v226_v8, %s5949_s22  ;;  %6040 = vst [vmem:[#allocation53_spill] sm:$0xff] %v3651_v9  ;;  %6041 = vst [vmem:[#allocation54_spill] sm:$0xff] %v3653_v3 }
 0x1c0   : > { %460 = vrot.lane.b32.xlu0 %v226_v8, %s5951_s28  ;;  %424 = vrot.lane.b32.xlu1 %v196_v6, %s3201_s29 }
 0x1c4   : > { %535 = vrot.lane.b32.xlu0 %v226_v8, %s5947_s30  ;;  %437 = vrot.lane.b32.xlu1 %v211_v14, %s5955_s12 }
 0x1c8   : > { %475 = vrot.lane.b32.xlu0 %v241_v58, %s3204_s13  ;;  %304 = vrot.lane.b32.xlu1 %v241_v58, %s3205_s23 }
 0x1cc   : > { %550 = vrot.lane.b32.xlu0 %v241_v58, %s3206_s27  ;;  %392 = vrot.lane.b32.xlu1 %v241_v58, %s3207_s6 }
 0x1d0   : > { %625 = vrot.lane.b32.xlu0 %v226_v8, %s3208_s11  ;;  %582 = vrot.lane.b32.xlu1 %v196_v6, %s3209_s25  ;;  %v197_v8 = vmul.f32 %v193_v31, %v3543_v22  ;;  %v208_v6 = vrot.slane %v3562_v32, %v3634_v57  ;;  %v238_v31 = vrot.slane %v2695_v4, %v3634_v57 }
 0x1d2   : > { %v212_v12 = vmul.f32 %v208_v6, %v3543_v22  ;;  %v242_v19 = vmul.f32 %v238_v31, %v3543_v22 }
 0x1d4   : > { %640 = vrot.lane.b32.xlu0 %v241_v58, %s3210_s24  ;;  %595 = vrot.lane.b32.xlu1 %v211_v14, %s3211_s26  ;;  %v3660_v14 = vpop.permute.xlu1 %863  ;;  %v3662_v58 = vpop.permute.xlu0 %1303 }
 0x1d5   : > { %6042 = vst [vmem:[#allocation55_spill] sm:$0xff] %v3660_v14  ;;  %6043 = vst [vmem:[#allocation56_spill] sm:$0xff] %v3662_v58 }
 0x1d8   : > { %291 = vrot.lane.b32.xlu0 %v227_v0, %s3197_s16  ;;  %245 = vrot.lane.b32.xlu1 %v197_v8, %s3193_s2  ;;  %v3667_v32 = vpop.permute.xlu1 %1168  ;;  %v3669_v63 = vpop.permute.xlu0 %1407  ;;  %s6083_s16 = smov 96   ;;  %s3235_s2 = smov 42  }
 0x1d9   : > { %6044 = vst [vmem:[#allocation57_spill] sm:$0xff] %v3667_v32  ;;  %6045 = vst [vmem:[#allocation58_spill] sm:$0xff] %v3669_v63 }
 0x1dc   : > { %379 = vrot.lane.b32.xlu0 %v227_v0, %s5949_s22  ;;  %261 = vrot.lane.b32.xlu1 %v212_v12, %s3192_s15  ;;  %v3676_v6 = vpop.permute.xlu1 %1273  ;;  %v3678_v58 = vpop.permute.xlu0 %1318  ;;  %s3233_s15 = smov 9   ;;  %s3241_s22 = smov 29  }
 0x1dd   : > { %6046 = vst [vmem:[#allocation59_spill] sm:$0xff] %v3676_v6  ;;  %6047 = vst [vmem:[#allocation60_spill] sm:$0xff] %v3678_v58 }
 0x1e0   : > { %426 = vrot.lane.b32.xlu0 %v197_v8, %s3201_s29  ;;  %336 = vrot.lane.b32.xlu1 %v197_v8, %s3195_s18  ;;  %v3682_v4 = vpop.permute.xlu1 %1469  ;;  %v3684_v63 = vpop.permute.xlu0 %1422  ;;  %s3212_s29 = smov 48   ;;  %s3215_s18 = smov 22  }
 0x1e1   : > { %6048 = vst [vmem:[#allocation61_spill] sm:$0xff] %v3682_v4  ;;  %6049 = vst [vmem:[#allocation62_spill] sm:$0xff] %v3684_v63 }
 0x1e4   : > { %439 = vrot.lane.b32.xlu0 %v212_v12, %s5955_s12  ;;  %349 = vrot.lane.b32.xlu1 %v212_v12, %s5953_s14  ;;  %v3690_v31 = vpop.permute.xlu1 %1482  ;;  %v3692_v3 = vpop.permute.xlu0 %1526  ;;  %s3249_s14 = smov 103   ;;  %s3251_s12 = smov 121  }
 0x1e5   : > { %6050 = vst [vmem:[#allocation63_spill] sm:$0xff] %v3690_v31  ;;  %6051 = vst [vmem:[#allocation64_spill] sm:$0xff] %v3692_v3 }
 0x1e8   : > { %306 = vrot.lane.b32.xlu0 %v242_v19, %s3205_s23  ;;  %494 = vrot.lane.b32.xlu1 %v197_v8, %s3196_s19  ;;  %v3695_v58 = vpop.permute.xlu1 %1392  ;;  %v3697_v9 = vpop.permute.xlu0 %1437  ;;  %s6082_s19 = smov 16   ;;  %s3227_s23 = smov 90  }
 0x1e9   : > { %6052 = vst [vmem:[#allocation65_spill] sm:$0xff] %v3695_v58  ;;  %6053 = vst [vmem:[#allocation66_spill] sm:$0xff] %v3697_v9 }
 0x1ec   : > { %394 = vrot.lane.b32.xlu0 %v242_v19, %s3207_s6  ;;  %507 = vrot.lane.b32.xlu1 %v212_v12, %s5945_s20  ;;  %v3703_v63 = vpop.permute.xlu0 %1541  ;;  %s6084_s6 = smov 32   ;;  %s3237_s20 = smov 89  }
 0x1ed   : > { %6055 = vst [vmem:[#allocation68_spill] sm:$0xff] %v3703_v63 }
 0x1f0   : > { %584 = vrot.lane.b32.xlu0 %v197_v8, %s3209_s25  ;;  %462 = vrot.lane.b32.xlu1 %v227_v0, %s5951_s28  ;;  %v3701_v8 = vpop.permute.xlu1 %1497  ;;  %v3708_v4 = vpop.permute.xlu0 %1556  ;;  %s3221_s25 = smov 99   ;;  %s5957_s28 = smov 23  }
 0x1f1   : > { %6054 = vst [vmem:[#allocation67_spill] sm:$0xff] %v3701_v8  ;;  %6057 = vst [vmem:[#allocation70_spill] sm:$0xff] %v3708_v4 }
 0x1f4   : > { %597 = vrot.lane.b32.xlu0 %v212_v12, %s3211_s26  ;;  %537 = vrot.lane.b32.xlu1 %v227_v0, %s5947_s30  ;;  %v3706_v12 = vpop.permute.xlu1 %1511  ;;  %v3712_v31 = vpop.permute.xlu0 %312  ;;  %s6085_s26 = smov 112   ;;  %s3238_s30 = smov 125  }
 0x1f5   : > { %6056 = vst [vmem:[#allocation69_spill] sm:$0xff] %v3706_v12 }
 0x1f8   : > { %477 = vrot.lane.b32.xlu1 %v242_v19, %s3204_s13  ;;  %v3710_v3 = vpop.permute.xlu1 %1213  ;;  %s3213_s13 = smov 80  }
 0x1f9   : > { %6058 = vst [vmem:[#allocation71_spill] sm:$0xff] %v3710_v3 }
 0x1fc   : > { %552 = vrot.lane.b32.xlu1 %v242_v19, %s3206_s27  ;;  %s3218_s27 = smov 19  }
 0x200   : > { %627 = vrot.lane.b32.xlu1 %v227_v0, %s3208_s11  ;;  %s3214_s11 = smov 25  }
 0x204   : > { %642 = vrot.lane.b32.xlu1 %v242_v19, %s3210_s24  ;;  %s3220_s24 = smov 13  }
 0x212   : > { %v3714_v14 = vpop.permute.xlu0 %610  ;;  %v275_v9 = vpop.permute.xlu1 %274 }
 0x216   : > { %v277_v26 = vpop.permute.xlu0 %276  ;;  %v363_v21 = vpop.permute.xlu1 %362 }
 0x217   : > { %v279_v52 = vsel %vm278_vm1, %v275_v9, %v277_v26  ;;  %v280_v49 = vsel %vm278_vm1, %v277_v26, %v275_v9 }
 0x218   : > { %v285_v50 = vmul.f32 %v3465_v36, %v280_v49  ;;  %v286_v26 = vmul.f32 %v3465_v36, %v279_v52 }
 0x21a   : > { %v365_v0 = vpop.permute.xlu0 %364  ;;  %v3716_v30 = vpop.permute.xlu1 %520 }
 0x21e   : > { %v3718_v8 = vpop.permute.xlu0 %522  ;;  %v3720_v63 = vpop.permute.xlu1 %612 }
 0x222   : > { %v260_v19 = vpop.permute.xlu0 %259  ;;  %v244_v7 = vpop.permute.xlu1 %243 }
 0x226   : > { %v3722_v1 = vpop.permute.xlu0 %347  ;;  %v3724_v4 = vpop.permute.xlu1 %334 }
 0x22a   : > { %v3726_v3 = vpop.permute.xlu0 %492  ;;  %v3728_v18 = vpop.permute.xlu1 %289 }
 0x22e   : > { %v3730_v11 = vpop.permute.xlu0 %505  ;;  %v3732_v28 = vpop.permute.xlu1 %377 }
 0x232   : > { %v3734_v24 = vpop.permute.xlu0 %460  ;;  %v3736_v16 = vpop.permute.xlu1 %424 }
 0x236   : > { %v3738_v12 = vpop.permute.xlu0 %535  ;;  %v3740_v17 = vpop.permute.xlu1 %437 }
 0x23a   : > { %v3742_v29 = vpop.permute.xlu0 %475  ;;  %v3744_v60 = vpop.permute.xlu1 %304 }
 0x23b   : > { %6059 = vst [vmem:[#allocation72_spill] sm:$0xff] %v3742_v29 }
 0x23e   : > { %v3746_v56 = vpop.permute.xlu0 %550  ;;  %v3748_v20 = vpop.permute.xlu1 %392 }
 0x23f   : > { %6060 = vst [vmem:[#allocation73_spill] sm:$0xff] %v3746_v56  ;;  %v368_v56 = vsel %vm366_vm3, %v365_v0, %v363_v21 }
 0x240   : > { %v373_v52 = vmul.f32 %v3475_v5, %v368_v56 }
 0x242   : > { %v3750_v27 = vpop.permute.xlu0 %625  ;;  %v3752_v23 = vpop.permute.xlu1 %582 }
 0x243   : > { %6061 = vst [vmem:[#allocation74_spill] sm:$0xff] %v3750_v27  ;;  %v3791_v27 = vmul.f32 %v3481_v43, %v3543_v22  ;;  %v367_v43 = vsel %vm366_vm3, %v363_v21, %v365_v0  ;;  %v525_v21 = vsel %vm524_vm4, %v3716_v30, %v3718_v8 }
 0x246   : > { %v3754_v15 = vpop.permute.xlu0 %640  ;;  %v3756_v61 = vpop.permute.xlu1 %595 }
 0x247   : > { %6062 = vst [vmem:[#allocation75_spill] sm:$0xff] %v3754_v15 }
 0x24a   : > { %v3758_v58 = vpop.permute.xlu0 %291  ;;  %v246_v6 = vpop.permute.xlu1 %245 }
 0x24b   : > { %v251_v22 = vsel %vm249_vm7, %v246_v6, %v244_v7 }
 0x24c   : > { %v257_v49 = vmul.f32 %v3459_v33, %v251_v22 }
 0x24e   : > { %v3763_v62 = vpop.permute.xlu0 %379  ;;  %v262_v32 = vpop.permute.xlu1 %261 }
 0x24f   : > { %v264_v13 = vsel %vm263_vm2, %v260_v19, %v262_v32  ;;  %v265_v53 = vsel %vm263_vm2, %v262_v32, %v260_v19  ;;  %v3807_v32 = vld [vmem:[%s5843_s9 + $0x10] sm:$0x3]  ;;  %v250_v19 = vsel %vm249_vm7, %v244_v7, %v246_v6  ;;  %vm396_vm2 = vcmp.lt.s32.totalorder %v3761_v25, 14 }
 0x250   : > { %v270_v29 = vmul.f32 %v3461_v34, %v265_v53  ;;  %v271_v7 = vmul.f32 %v3461_v34, %v264_v13  ;;  %v571_v9 = vrot.slane %v3807_v32, %v3553_v10  ;;  %v575_v55 = vrot.slane %v3807_v32, %v3634_v57 }
 0x251   : > { %v526_v34 = vsel %vm524_vm4, %v3718_v8, %v3716_v30  ;;  %v258_v36 = vmul.f32 %v3459_v33, %v250_v19  ;;  %v374_v53 = vmul.f32 %v3475_v5, %v367_v43  ;;  %v615_v13 = vsel %vm614_vm5, %v3714_v14, %v3720_v63 }
 0x252   : > { %v3781_v59 = vpop.permute.xlu0 %426  ;;  %v337_v15 = vpop.permute.xlu1 %336  ;;  %v616_v30 = vsel %vm614_vm5, %v3720_v63, %v3714_v14  ;;  %v272_v22 = vadd.f32 %v270_v29, %v257_v49  ;;  %v3861_v43 = vmul.f32 %v3485_v45, %v525_v21  ;;  %v3864_v14 = vmul.f32 %v3485_v45, %v526_v34 }
 0x253   : > { %v273_v33 = vadd.f32 %v271_v7, %v258_v36  ;;  %v294_v29 = vsel %vm293_vm6, %v3728_v18, %v3758_v58  ;;  %v3878_v63 = vmul.f32 %v3497_v51, %v616_v30  ;;  %v339_v45 = vsel %vm338_vm8, %v3724_v4, %v337_v15 }
 0x254   : > { %v340_v19 = vsel %vm338_vm8, %v337_v15, %v3724_v4  ;;  %v301_v34 = vmul.f32 %v3467_v37, %v294_v29  ;;  %v287_v49 = vadd.f32 %v285_v50, %v272_v22  ;;  %v429_v4 = vsel %vm428_vm11, %v3736_v16, %v3781_v59 }
 0x255   : > { %v288_v36 = vadd.f32 %v286_v26, %v273_v33  ;;  %vm5969_vm7 = vcmp.lt.s32.totalorder %v3761_v25, 111  ;;  %vm599_vm8 = vcmp.lt.s32.totalorder %v3761_v25, 97  ;;  %v436_v33 = vmul.f32 %v3479_v42, %v429_v4 }
 0x256   : > { %v440_v6 = vpop.permute.xlu0 %439  ;;  %v350_v47 = vpop.permute.xlu1 %349 }
 0x257   : > { %v352_v56 = vsel %vm351_vm10, %v3722_v1, %v350_v47  ;;  %v353_v5 = vsel %vm351_vm10, %v350_v47, %v3722_v1  ;;  %v295_v1 = vsel %vm293_vm6, %v3758_v58, %v3728_v18  ;;  %v3875_v47 = vmul.f32 %v3497_v51, %v615_v13 }
 0x258   : > { %v442_v7 = vsel %vm5944_vm9, %v3740_v17, %v440_v6  ;;  %v443_v18 = vsel %vm5944_vm9, %v440_v6, %v3740_v17  ;;  %v358_v58 = vmul.f32 %v3463_v35, %v353_v5  ;;  %v359_v51 = vmul.f32 %v3463_v35, %v352_v56 }
 0x259   : > { %v300_v21 = vmul.f32 %v3467_v37, %v295_v1  ;;  %vm586_vm6 = vcmp.lt.s32.totalorder %v3761_v25, 98  ;;  %v430_v35 = vsel %vm428_vm11, %v3781_v59, %v3736_v16  ;;  %v345_v17 = vmul.f32 %v3471_v39, %v340_v19 }
 0x25a   : > { %v307_v8 = vpop.permute.xlu0 %306  ;;  %v495_v0 = vpop.permute.xlu1 %494  ;;  %v346_v37 = vmul.f32 %v3471_v39, %v339_v45  ;;  %v448_v50 = vmul.f32 %v3473_v40, %v443_v18  ;;  %v449_v26 = vmul.f32 %v3473_v40, %v442_v7  ;;  %v382_v39 = vsel %vm381_vm13, %v3732_v28, %v3763_v62 }
 0x25b   : > { %v309_v6 = vsel %vm308_vm12, %v3744_v60, %v307_v8  ;;  %v310_v30 = vsel %vm308_vm12, %v307_v8, %v3744_v60  ;;  %v383_v40 = vsel %vm381_vm13, %v3763_v62, %v3732_v28  ;;  %v360_v59 = vadd.f32 %v358_v58, %v345_v17 }
 0x25c   : > { %v361_v16 = vadd.f32 %v359_v51, %v346_v37  ;;  %v435_v22 = vmul.f32 %v3479_v42, %v430_v35  ;;  %v302_v56 = vadd.f32 %v300_v21, %v287_v49  ;;  %v303_v60 = vadd.f32 %v301_v34, %v288_v36 }
 0x25d   : > { %vm5970_vm11 = vcmp.lt.s32.totalorder %v3761_v25, 127  ;;  %v315_v29 = vmul.f32 %v3712_v31, %v310_v30  ;;  %v316_v1 = vmul.f32 %v3712_v31, %v309_v6  ;;  %v451_v42 = vadd.f32 %v449_v26, %v436_v33 }
 0x25e   : > { %v395_v13 = vpop.permute.xlu0 %394  ;;  %v508_v15 = vpop.permute.xlu1 %507  ;;  %v450_v45 = vadd.f32 %v448_v50, %v435_v22  ;;  %v497_v19 = vsel %vm496_vm15, %v3726_v3, %v495_v0  ;;  %v498_v7 = vsel %vm496_vm15, %v495_v0, %v3726_v3  ;;  %vm479_vm12 = vcmp.lt.s32.totalorder %v3761_v25, 126 }
 0x25f   : > { %v510_v62 = vsel %vm5974_vm14, %v3730_v11, %v508_v15  ;;  %v511_v28 = vsel %vm5974_vm14, %v508_v15, %v3730_v11  ;;  %vm554_vm9 = vcmp.lt.s32.totalorder %v3761_v25, 110  ;;  %v375_v31 = vadd.f32 %v373_v52, %v360_v59 }
 0x260   : > { %v376_v18 = vadd.f32 %v374_v53, %v361_v16  ;;  %v397_v11 = vsel %vm396_vm2, %v3748_v20, %v395_v13  ;;  %v398_v58 = vsel %vm396_vm2, %v395_v13, %v3748_v20  ;;  %v388_v51 = vmul.f32 %v3469_v38, %v383_v40 }
 0x261   : > { %v389_v21 = vmul.f32 %v3469_v38, %v382_v39  ;;  %v516_v3 = vmul.f32 %v3483_v44, %v510_v62  ;;  %v517_v0 = vmul.f32 %v3483_v44, %v511_v28  ;;  %v317_v49 = vadd.f32 %v315_v29, %v302_v56  ;;  %v6067_v56 = vld [vmem:[#allocation15_spill] sm:$0xff] }
 0x262   : > { %v585_v5 = vpop.permute.xlu0 %584  ;;  %v463_v8 = vpop.permute.xlu1 %462  ;;  %v318_v52 = vadd.f32 %v316_v1, %v303_v60  ;;  %v503_v53 = vmul.f32 %v3477_v41, %v497_v19  ;;  %v504_v36 = vmul.f32 %v3477_v41, %v498_v7  ;;  %v403_v15 = vmul.f32 %v3487_v46, %v398_v58 }
 0x263   : > { %v404_v4 = vmul.f32 %v3487_v46, %v397_v11  ;;  %v458_v20 = vadd.f32 %v3777_v2, %v450_v45  ;;  %v459_v13 = vadd.f32 %v3791_v27, %v451_v42  ;;  %vm629_vm15 = vcmp.lt.s32.totalorder %v3761_v25, 95  ;;  %v6069_v45 = vld [vmem:[#allocation72_spill] sm:$0xff] }
 0x264   : > { %v390_v35 = vadd.f32 %v388_v51, %v375_v31  ;;  %v391_v44 = vadd.f32 %v389_v21, %v376_v18  ;;  %v587_v17 = vsel %vm586_vm6, %v3752_v23, %v585_v5  ;;  %v588_v41 = vsel %vm586_vm6, %v585_v5, %v3752_v23  ;;  %v6068_v5 = vld [vmem:[#allocation13_spill] sm:$0xff]  ;;  %v6072_v18 = vld [vmem:[#allocation16_spill] sm:$0xff] }
 0x265   : > { %v518_v37 = vadd.f32 %v516_v3, %v503_v53  ;;  %v519_v50 = vadd.f32 %v517_v0, %v504_v36  ;;  %v6065_v26 = vrot.slane %v3773_v54, %v3553_v10  ;;  %v6066_v30 = vrot.slane %v3773_v54, %v3634_v57  ;;  %v6073_v51 = vld [vmem:[#allocation76_spill] sm:$0xff] }
 0x266   : > { %v538_v34 = vpop.permute.xlu1 %537  ;;  %v598_v38 = vpop.permute.xlu0 %597  ;;  %v405_v59 = vadd.f32 %v403_v15, %v390_v35  ;;  %v406_v16 = vadd.f32 %v404_v4, %v391_v44  ;;  %v594_v22 = vmul.f32 %v3491_v48, %v588_v41  ;;  %vm644_vm2 = vcmp.lt.s32.totalorder %v3761_v25, 94  ;;  %v6076_v15 = vld [vmem:[#allocation17_spill] sm:$0xff]  ;;  %v2699_v44 = vld [vmem:[%s5843_s9 + $0x12] sm:$0x3] }
 0x267   : > { %v540_v46 = vsel %vm5969_vm7, %v3738_v12, %v538_v34  ;;  %v541_v27 = vsel %vm5969_vm7, %v538_v34, %v3738_v12  ;;  %v332_v6 = vmul.f32 %v6065_v26, %v317_v49  ;;  %v333_v39 = vmul.f32 %v6066_v30, %v318_v52  ;;  %v6078_v26 = vld [vmem:[#allocation19_spill] sm:$0xff] }
 0x268   : > { %v600_v23 = vsel %vm599_vm8, %v3756_v61, %v598_v38  ;;  %v601_v40 = vsel %vm599_vm8, %v598_v38, %v3756_v61  ;;  %v593_v12 = vmul.f32 %v3491_v48, %v587_v17  ;;  %v465_v54 = vsel %vm5970_vm11, %v3734_v24, %v463_v8 }
 0x269   : > { %v466_v33 = vsel %vm5970_vm11, %v463_v8, %v3734_v24  ;;  %v546_v60 = vmul.f32 %v6067_v56, %v540_v46  ;;  %v547_v61 = vmul.f32 %v6067_v56, %v541_v27  ;;  %v606_v29 = vmul.f32 %v6068_v5, %v600_v23  ;;  %v6070_v8 = vld [vmem:[#allocation73_spill] sm:$0xff] }
 0x26a   : > { %v478_v2 = vpop.permute.xlu1 %477  ;;  %v607_v1 = vmul.f32 %v6068_v5, %v601_v40  ;;  %v533_v48 = vadd.f32 %v3861_v43, %v518_v37  ;;  %v534_v62 = vadd.f32 %v3864_v14, %v519_v50  ;;  %v6071_v43 = vld [vmem:[#allocation14_spill] sm:$0xff]  ;;  %v6074_v21 = vrot.slane %v6073_v51, %v3553_v10 }
 0x26b   : > { %v480_v42 = vsel %vm479_vm12, %v6069_v45, %v478_v2  ;;  %v481_v24 = vsel %vm479_vm12, %v478_v2, %v6069_v45  ;;  %v471_v31 = vmul.f32 %v6071_v43, %v465_v54  ;;  %v472_v14 = vmul.f32 %v6071_v43, %v466_v33  ;;  %v6077_v37 = vld [vmem:[#allocation74_spill] sm:$0xff] }
 0x26c   : > { %v420_v3 = vmul.f32 %v6074_v21, %v405_v59  ;;  %v6075_v0 = vrot.slane %v6073_v51, %v3634_v57  ;;  %v548_v49 = vadd.f32 %v546_v60, %v533_v48  ;;  %v549_v52 = vadd.f32 %v547_v61, %v534_v62 }
 0x26d   : > { %v608_v53 = vadd.f32 %v606_v29, %v593_v12  ;;  %v609_v36 = vadd.f32 %v607_v1, %v594_v22  ;;  %v486_v4 = vmul.f32 %v6076_v15, %v480_v42  ;;  %v487_v38 = vmul.f32 %v6076_v15, %v481_v24 }
 0x26e   : > { %v553_v28 = vpop.permute.xlu1 %552  ;;  %v421_v34 = vmul.f32 %v6075_v0, %v406_v16  ;;  %v473_v27 = vadd.f32 %v471_v31, %v458_v20  ;;  %v474_v2 = vadd.f32 %v472_v14, %v459_v13  ;;  %v422_v40 = vadd.f32 %v420_v3, %v332_v6  ;;  %v6079_v6 = vld [vmem:[#allocation75_spill] sm:$0xff] }
 0x26f   : > { %v555_v19 = vsel %vm554_vm9, %v6070_v8, %v553_v28  ;;  %v556_v7 = vsel %vm554_vm9, %v553_v28, %v6070_v8  ;;  %v661_v16 = vrot.slane %v2699_v44, %v3553_v10  ;;  %v665_v12 = vrot.slane %v2699_v44, %v3634_v57  ;;  %v2700_v31 = vld [vmem:[%s5843_s9 + $0x14] sm:$0x3]  ;;  %v2704_v44 = vld [vmem:[%s5843_s9 + $0x1e] sm:$0x3] }
 0x270   : > { %v561_v11 = vmul.f32 %v6072_v18, %v555_v19  ;;  %v562_v58 = vmul.f32 %v6072_v18, %v556_v7  ;;  %v423_v59 = vadd.f32 %v421_v34, %v333_v39  ;;  %v488_v22 = vadd.f32 %v486_v4, %v473_v27  ;;  %v6081_v19 = vld [vmem:[#allocation18_spill] sm:$0xff] }
 0x271   : > { %v489_v54 = vadd.f32 %v487_v38, %v474_v2  ;;  %v623_v33 = vadd.f32 %v3875_v47, %v608_v53  ;;  %v624_v56 = vadd.f32 %v3878_v63, %v609_v36  ;;  %v6080_v63 = vld [vmem:[#allocation21_spill] sm:$0xff]  ;;  %v688_v14 = vrot.slane %v2700_v31, %v3634_v57  ;;  %v2703_v36 = vld [vmem:[%s5843_s9 + $0x1c] sm:$0x3] }
 0x272   : > { %v628_v35 = vpop.permute.xlu1 %627  ;;  %v563_v17 = vadd.f32 %v561_v11, %v548_v49  ;;  %v564_v41 = vadd.f32 %v562_v58, %v549_v52  ;;  %v490_v48 = vadd.f32 %v488_v22, %v422_v40  ;;  %v684_v18 = vrot.slane %v2700_v31, %v3553_v10  ;;  %v2701_v11 = vld [vmem:[%s5843_s9 + $0x16] sm:$0x3]  ;;  %v2702_v49 = vld [vmem:[%s5843_s9 + $0x18] sm:$0x3] }
 0x273   : > { %v630_v50 = vsel %vm629_vm15, %v6077_v37, %v628_v35  ;;  %v631_v46 = vsel %vm629_vm15, %v628_v35, %v6077_v37  ;;  %v703_v21 = vrot.slane %v2701_v11, %v3634_v57  ;;  %v699_v3 = vrot.slane %v2701_v11, %v3553_v10 }
 0x274   : > { %v636_v30 = vmul.f32 %v6078_v26, %v630_v50  ;;  %v637_v23 = vmul.f32 %v6078_v26, %v631_v46  ;;  %v578_v20 = vmul.f32 %v571_v9, %v563_v17  ;;  %v579_v13 = vmul.f32 %v575_v55, %v564_v41  ;;  %v2705_v50 = vld [vmem:[%s5843_s9 + $0x20] sm:$0x3] }
 0x275   : > { %v491_v9 = vadd.f32 %v489_v54, %v423_v59  ;;  %v714_v52 = vrot.slane %v2702_v49, %v3553_v10  ;;  %v718_v15 = vrot.slane %v2702_v49, %v3634_v57  ;;  %v729_v4 = vrot.slane %v2703_v36, %v3553_v10 }
 0x276   : > { %v643_v60 = vpop.permute.xlu1 %642  ;;  %v638_v47 = vadd.f32 %v636_v30, %v623_v33  ;;  %v639_v5 = vadd.f32 %v637_v23, %v624_v56  ;;  %v580_v32 = vadd.f32 %v578_v20, %v490_v48  ;;  %v744_v17 = vrot.slane %v2704_v44, %v3553_v10  ;;  %v4248_v56 = vld [vmem:[%s5841_s7] sm:$0xff] }
 0x277   : > { %v645_v39 = vsel %vm644_vm2, %v6079_v6, %v643_v60  ;;  %v646_v61 = vsel %vm644_vm2, %v643_v60, %v6079_v6  ;;  %v581_v55 = vadd.f32 %v579_v13, %v491_v9  ;;  %v733_v37 = vrot.slane %v2703_v36, %v3634_v57 }
 0x278   : > { %v651_v29 = vmul.f32 %v6080_v63, %v645_v39  ;;  %v652_v1 = vmul.f32 %v6080_v63, %v646_v61  ;;  %v763_v27 = vrot.slane %v2705_v50, %v3634_v57  ;;  %v748_v26 = vrot.slane %v2704_v44, %v3634_v57 }
 0x279   : > { %v759_v23 = vrot.slane %v2705_v50, %v3553_v10  ;;  %v6086_v20 = vmov 6   ;;  %vm1051_vm9 = vcmp.lt.s32.totalorder %v3761_v25, 48  ;;  %vm1269_vm6 = vcmp.lt.s32.totalorder %v3761_v25, 80 }
 0x27a   : > { %v653_v62 = vadd.f32 %v651_v29, %v638_v47  ;;  %v654_v28 = vadd.f32 %v652_v1, %v639_v5  ;;  %vm772_vm8 = vcmp.lt.s32.totalorder %v3761_v25, 25  ;;  %vm785_vm12 = vcmp.lt.s32.totalorder %v3761_v25, 22 }
 0x27b   : > { %vm889_vm15 = vcmp.lt.s32.totalorder %v3761_v25, 105  ;;  %vm902_vm2 = vcmp.lt.s32.totalorder %v3761_v25, 102  ;;  %vm800_vm7 = vcmp.lt.s32.totalorder %v3761_v25, 19  ;;  %vm917_vm11 = vcmp.lt.s32.totalorder %v3761_v25, 99 }
 0x27c   : > { %v668_v45 = vmul.f32 %v661_v16, %v653_v62  ;;  %v669_v42 = vmul.f32 %v665_v12, %v654_v28  ;;  %vm1036_vm14 = vcmp.lt.s32.totalorder %v3761_v25, 51 }
 0x27e   : > { %v670_v24 = vadd.f32 %v668_v45, %v580_v32  ;;  %v671_v8 = vadd.f32 %v669_v42, %v581_v55 }
 0x280   : > { %v4054_v7 = vadd.f32 %v6081_v19, %v670_v24  ;;  %v4057_v43 = vadd.f32 %v6081_v19, %v671_v8 }
 0x282   : > { %813 = vrot.lane.b32.xlu0 %v4057_v43, %s6082_s19  ;;  %811 = vrot.lane.b32.xlu1 %v4054_v7, %s6082_s19  ;;  %v4088_v58 = vmul.f32 %v688_v14, %v4057_v43  ;;  %v4091_v51 = vmul.f32 %v684_v18, %v4054_v7  ;;  %v4098_v0 = vmul.f32 %v703_v21, %v4057_v43 }
 0x283   : > { %v4101_v34 = vmul.f32 %v699_v3, %v4054_v7  ;;  %v4112_v53 = vmul.f32 %v714_v52, %v4054_v7  ;;  %v4124_v38 = vmul.f32 %v718_v15, %v4057_v43  ;;  %v4127_v35 = vmul.f32 %v729_v4, %v4054_v7 }
 0x284   : > { %v4146_v41 = vmul.f32 %v744_v17, %v4054_v7  ;;  %v4165_v46 = vmul.f32 %v733_v37, %v4057_v43  ;;  %v4173_v2 = vmul.f32 %v763_v27, %v4057_v43  ;;  %v4184_v30 = vmul.f32 %v748_v26, %v4057_v43 }
 0x285   : > { %v4209_v40 = vmul.f32 %v759_v23, %v4054_v7 }
 0x286   : > { %928 = vrot.lane.b32.xlu0 %v4054_v7, %s6083_s16  ;;  %930 = vrot.lane.b32.xlu1 %v4057_v43, %s6083_s16  ;;  %s3216_s16 = smov 105  }
 0x28a   : > { %1047 = vrot.lane.b32.xlu0 %v4054_v7, %s3212_s29  ;;  %1049 = vrot.lane.b32.xlu1 %v4057_v43, %s3212_s29  ;;  %s3217_s29 = smov 102  }
 0x28e   : > { %1265 = vrot.lane.b32.xlu0 %v4054_v7, %s3213_s13  ;;  %1267 = vrot.lane.b32.xlu1 %v4057_v43, %s3213_s13  ;;  %s3226_s13 = smov 10  }
 0x292   : > { %1385 = vrot.lane.b32.xlu0 %v4054_v7, %s6084_s6  ;;  %1387 = vrot.lane.b32.xlu1 %v4057_v43, %s6084_s6  ;;  %s3219_s6 = smov 54  }
 0x296   : > { %1504 = vrot.lane.b32.xlu0 %v4054_v7, %s6085_s26  ;;  %1506 = vrot.lane.b32.xlu1 %v4057_v43, %s6085_s26 }
 0x29a   : > { %770 = vrot.lane.b32.xlu1 %v4088_v58, %s3214_s11  ;;  %768 = vrot.lane.b32.xlu0 %v4091_v51, %s3214_s11  ;;  %s3222_s11 = smov 93  }
 0x29e   : > { %783 = vrot.lane.b32.xlu1 %v4098_v0, %s3215_s18  ;;  %781 = vrot.lane.b32.xlu0 %v4101_v34, %s3215_s18  ;;  %s3223_s18 = smov 6  }
 0x2a2   : > { %885 = vrot.lane.b32.xlu1 %v4091_v51, %s3216_s16  ;;  %898 = vrot.lane.b32.xlu0 %v4101_v34, %s3217_s29 }
 0x2a6   : > { %887 = vrot.lane.b32.xlu1 %v4088_v58, %s3216_s16  ;;  %796 = vrot.lane.b32.xlu0 %v4112_v53, %s3218_s27  ;;  %s3224_s16 = smov 57  }
 0x2aa   : > { %900 = vrot.lane.b32.xlu1 %v4098_v0, %s3217_s29  ;;  %1017 = vrot.lane.b32.xlu0 %v4101_v34, %s3219_s6  ;;  %s3225_s29 = smov 86  }
 0x2ae   : > { %798 = vrot.lane.b32.xlu1 %v4124_v38, %s3218_s27  ;;  %825 = vrot.lane.b32.xlu0 %v4127_v35, %s3220_s24  ;;  %s3228_s27 = smov 51  }
 0x2b2   : > { %913 = vrot.lane.b32.xlu1 %v4112_v53, %s3221_s25  ;;  %942 = vrot.lane.b32.xlu0 %v4127_v35, %s3222_s11 }
 0x2b6   : > { %915 = vrot.lane.b32.xlu1 %v4124_v38, %s3221_s25  ;;  %1137 = vrot.lane.b32.xlu0 %v4101_v34, %s3223_s18  ;;  %s3229_s25 = smov 45  }
 0x2ba   : > { %1004 = vrot.lane.b32.xlu1 %v4091_v51, %s3224_s16  ;;  %1235 = vrot.lane.b32.xlu0 %v4101_v34, %s3225_s29 }
 0x2be   : > { %1006 = vrot.lane.b32.xlu1 %v4088_v58, %s3224_s16  ;;  %840 = vrot.lane.b32.xlu0 %v4146_v41, %s3226_s13  ;;  %s3231_s16 = smov 38  }
 0x2c2   : > { %1019 = vrot.lane.b32.xlu1 %v4098_v0, %s3219_s6  ;;  %957 = vrot.lane.b32.xlu0 %v4146_v41, %s3227_s23  ;;  %s3230_s6 = smov 3  }
 0x2c6   : > { %1032 = vrot.lane.b32.xlu1 %v4112_v53, %s3228_s27  ;;  %1062 = vrot.lane.b32.xlu0 %v4127_v35, %s3229_s25 }
 0x2ca   : > { %1034 = vrot.lane.b32.xlu1 %v4124_v38, %s3228_s27  ;;  %1152 = vrot.lane.b32.xlu0 %v4112_v53, %s3230_s6  ;;  %s3232_s27 = smov 7  }
 0x2ce   : > { %827 = vrot.lane.b32.xlu1 %v4165_v46, %s3220_s24  ;;  %1355 = vrot.lane.b32.xlu0 %v4101_v34, %s3231_s16  ;;  %s3234_s24 = smov 87  }
 0x2d2   : > { %944 = vrot.lane.b32.xlu1 %v4165_v46, %s3222_s11  ;;  %857 = vrot.lane.b32.xlu0 %v4173_v2, %s3232_s27  ;;  %s3236_s11 = smov 118  }
 0x2d6   : > { %1124 = vrot.lane.b32.xlu1 %v4091_v51, %s3233_s15  ;;  %974 = vrot.lane.b32.xlu0 %v4173_v2, %s3234_s24 }
 0x2da   : > { %1126 = vrot.lane.b32.xlu1 %v4088_v58, %s3233_s15  ;;  %1079 = vrot.lane.b32.xlu0 %v4184_v30, %s3235_s2  ;;  %s3239_s15 = smov 77  }
 0x2de   : > { %1139 = vrot.lane.b32.xlu1 %v4098_v0, %s3223_s18  ;;  %1474 = vrot.lane.b32.xlu0 %v4101_v34, %s3236_s11  ;;  %s3240_s18 = smov 74  }
 0x2e2   : > { %1222 = vrot.lane.b32.xlu1 %v4091_v51, %s3237_s20  ;;  %1175 = vrot.lane.b32.xlu0 %v4127_v35, %s3238_s30 }
 0x2e6   : > { %1224 = vrot.lane.b32.xlu1 %v4088_v58, %s3237_s20  ;;  %1280 = vrot.lane.b32.xlu0 %v4127_v35, %s3239_s15  ;;  %s3242_s20 = smov 71  }
 0x2ea   : > { %1237 = vrot.lane.b32.xlu1 %v4098_v0, %s3225_s29  ;;  %1295 = vrot.lane.b32.xlu0 %v4146_v41, %s3240_s18  ;;  %s3243_s29 = smov 26  }
 0x2ee   : > { %842 = vrot.lane.b32.xlu1 %v4184_v30, %s3226_s13  ;;  %1399 = vrot.lane.b32.xlu0 %v4127_v35, %s3241_s22  ;;  %s3244_s13 = smov 109  }
 0x2f2   : > { %959 = vrot.lane.b32.xlu1 %v4184_v30, %s3227_s23  ;;  %1310 = vrot.lane.b32.xlu0 %v4209_v40, %s3242_s20  ;;  %s3245_s23 = smov 83  }
 0x2f4   : > { %v4215_v59 = vpop.permute.xlu1 %811  ;;  %v4273_v5 = vpop.permute.xlu0 %813 }
 0x2f6   : > { %1064 = vrot.lane.b32.xlu1 %v4165_v46, %s3229_s25  ;;  %1414 = vrot.lane.b32.xlu0 %v4146_v41, %s3243_s29  ;;  %s3247_s25 = smov 106  }
 0x2f8   : > { %v4221_v16 = vpop.permute.xlu1 %930  ;;  %v4279_v29 = vpop.permute.xlu0 %928 }
 0x2fa   : > { %1154 = vrot.lane.b32.xlu1 %v4124_v38, %s3230_s6  ;;  %1518 = vrot.lane.b32.xlu0 %v4127_v35, %s3244_s13  ;;  %s3248_s6 = smov 41  }
 0x2fc   : > { %v4227_v12 = vpop.permute.xlu1 %1049  ;;  %v4286_v9 = vpop.permute.xlu0 %1047 }
 0x2fe   : > { %1250 = vrot.lane.b32.xlu1 %v4112_v53, %s3245_s23  ;;  %1429 = vrot.lane.b32.xlu0 %v4209_v40, %s5957_s28  ;;  %s3250_s28 = smov 35  }
 0x300   : > { %v4232_v22 = vpop.permute.xlu1 %1267  ;;  %v4293_v28 = vpop.permute.xlu0 %1265 }
 0x302   : > { %1252 = vrot.lane.b32.xlu1 %v4124_v38, %s3245_s23  ;;  %1533 = vrot.lane.b32.xlu0 %v4146_v41, %s3247_s25 }
 0x304   : > { %v4237_v54 = vpop.permute.xlu1 %1387  ;;  %v4300_v45 = vpop.permute.xlu0 %1385 }
 0x306   : > { %1342 = vrot.lane.b32.xlu1 %v4091_v51, %s3248_s6  ;;  %1548 = vrot.lane.b32.xlu0 %v4209_v40, %s3249_s14 }
 0x308   : > { %v4242_v33 = vpop.permute.xlu1 %1506  ;;  %v4308_v24 = vpop.permute.xlu0 %1504 }
 0x30a   : > { %1344 = vrot.lane.b32.xlu1 %v4088_v58, %s3248_s6  ;;  %1581 = vperm.xlu0 %2967, %v4248_v56  }
 0x30c   : > { %v4251_v60 = vpop.permute.xlu1 %770  ;;  %v4315_v31 = vpop.permute.xlu0 %768 }
 0x30e   : > { %1357 = vrot.lane.b32.xlu1 %v4098_v0, %s3231_s16  ;;  %2969 = vset.pattern.permute.xlu0 %v6086_v20  ;;  %s3252_s16 = smov 39  }
 0x310   : > { %v4256_v13 = vpop.permute.xlu1 %783  ;;  %v4321_v18 = vpop.permute.xlu0 %781 }
 0x312   : > { %855 = vrot.lane.b32.xlu1 %v4209_v40, %s3232_s27  ;;  %s3253_s27 = smov 115  }
 0x314   : > { %v4260_v6 = vpop.permute.xlu1 %885 }
 0x316   : > { %972 = vrot.lane.b32.xlu1 %v4209_v40, %s3234_s24  ;;  %s3255_s24 = smov 119  }
 0x318   : > { %v4264_v39 = vpop.permute.xlu1 %887 }
 0x31a   : > { %1077 = vrot.lane.b32.xlu1 %v4146_v41, %s3235_s2  ;;  %s6218_s2 = smov 113  }
 0x31c   : > { %v4268_v61 = vpop.permute.xlu1 %900 }
 0x31e   : > { %1370 = vrot.lane.b32.xlu1 %v4112_v53, %s3250_s28 }
 0x320   : > { %v4271_v47 = vpop.permute.xlu1 %798 }
 0x322   : > { %1372 = vrot.lane.b32.xlu1 %v4124_v38, %s3250_s28 }
 0x324   : > { %v4276_v63 = vpop.permute.xlu1 %913 }
 0x326   : > { %1461 = vrot.lane.b32.xlu1 %v4091_v51, %s3251_s12  ;;  %v4328_v51 = vpop.permute.xlu0 %898 }
 0x328   : > { %v4281_v1 = vpop.permute.xlu1 %915 }
 0x32a   : > { %1463 = vrot.lane.b32.xlu1 %v4088_v58, %s3251_s12  ;;  %v4336_v3 = vpop.permute.xlu0 %796 }
 0x32c   : > { %v4284_v48 = vpop.permute.xlu1 %1004 }
 0x32e   : > { %1476 = vrot.lane.b32.xlu1 %v4098_v0, %s3236_s11  ;;  %v4343_v49 = vpop.permute.xlu0 %1017 }
 0x330   : > { %v4290_v62 = vpop.permute.xlu1 %1006 }
 0x332   : > { %1092 = vrot.lane.b32.xlu1 %v4209_v40, %s3252_s16 }
 0x334   : > { %v4295_v32 = vpop.permute.xlu1 %1019 }
 0x336   : > { %1094 = vrot.lane.b32.xlu1 %v4173_v2, %s3252_s16 }
 0x338   : > { %v4298_v55 = vpop.permute.xlu1 %1032 }
 0x33a   : > { %1177 = vrot.lane.b32.xlu1 %v4165_v46, %s3238_s30  ;;  %s3254_s30 = smov 122  }
 0x33c   : > { %v4304_v42 = vpop.permute.xlu1 %1034 }
 0x33e   : > { %1282 = vrot.lane.b32.xlu1 %v4165_v46, %s3239_s15 }
 0x340   : > { %v4310_v8 = vpop.permute.xlu1 %827 }
 0x342   : > { %1489 = vrot.lane.b32.xlu1 %v4112_v53, %s3253_s27  ;;  %v4350_v53 = vpop.permute.xlu0 %825 }
 0x344   : > { %v4313_v19 = vpop.permute.xlu1 %944 }
 0x346   : > { %1491 = vrot.lane.b32.xlu1 %v4124_v38, %s3253_s27  ;;  %v4358_v4 = vpop.permute.xlu0 %942  ;;  %s6213_s27 = smov 1  }
 0x348   : > { %v4318_v14 = vpop.permute.xlu1 %1124 }
 0x34a   : > { %1190 = vrot.lane.b32.xlu1 %v4146_v41, %s3254_s30  ;;  %v4366_v35 = vpop.permute.xlu0 %1137 }
 0x34c   : > { %v4323_v11 = vpop.permute.xlu1 %1126 }
 0x34e   : > { %1192 = vrot.lane.b32.xlu1 %v4184_v30, %s3254_s30  ;;  %v4374_v41 = vpop.permute.xlu0 %1235  ;;  %s6214_s30 = smov 17  }
 0x350   : > { %v4326_v58 = vpop.permute.xlu1 %1139 }
 0x352   : > { %1297 = vrot.lane.b32.xlu1 %v4184_v30, %s3240_s18  ;;  %v4380_v50 = vpop.permute.xlu0 %840  ;;  %s6281_s18 = sshll.u32 %s3109_s17, 4  ;;  %s65_s17 = sadd.s32 1, %s3109_s17  }
 0x353   : > { %p62_p2 = scmp.ge.s32.totalorder %s65_s17, 8  }
 0x354   : > { %v4332_v21 = vpop.permute.xlu1 %1222 }
 0x356   : > { %1401 = vrot.lane.b32.xlu1 %v4165_v46, %s3241_s22  ;;  %s6088_s22 = smov 23   ;;  %v4386_v26 = vpop.permute.xlu0 %957 }
 0x357   : > { %6094 = vst [vmem:[#allocation76_spill] sm:$0xff] %v4386_v26 }
 0x358   : > { %v4338_v0 = vpop.permute.xlu1 %1224 }
 0x35a   : > { %1205 = vrot.lane.b32.xlu1 %v4209_v40, %s3255_s24 }
 0x35c   : > { %v4341_v34 = vpop.permute.xlu1 %1237 }
 0x35e   : > { %1207 = vrot.lane.b32.xlu1 %v4173_v2, %s3255_s24  ;;  %s6215_s24 = smov 127  }
 0x360   : > { %v4346_v52 = vpop.permute.xlu1 %842 }
 0x362   : > { %1312 = vrot.lane.b32.xlu1 %v4173_v2, %s3242_s20  ;;  %s2660_s20 = scalar_lea.vmem [#allocation7], %s6281_s18 }
 0x364   : > { %v4352_v36 = vpop.permute.xlu1 %959 }
 0x366   : > { %1416 = vrot.lane.b32.xlu1 %v4184_v30, %s3243_s29  ;;  %s3256_s29 = smov (%p62_p2), [#allocation7]  }
 0x368   : > { %v4356_v15 = vpop.permute.xlu1 %1064 }
 0x369   : > { %6087 = vst [vmem:[#allocation15_spill] sm:$0xff] %v4356_v15  ;;  %v6102_v15 = vld [vmem:[#allocation36_spill] sm:$0xff] }
 0x36a   : > { %1520 = vrot.lane.b32.xlu1 %v4165_v46, %s3244_s13  ;;  %s2668_s13 = sshll.u32 (%p62_p2), %s3256_s29, 4  ;;  %s2669_s13 = int_to_ptr.vmem [resolvable:$true] %s2668_s13 }
 0x36b   :  { %s3075_s23 = scalar_lea.vmem (%p62_p2), %s2669_s13, 2048  ;;  %p3080_p4 = scmp.lt.s32.totalorder (%p62_p2), %s2669_s13, %s2669_s13 }
 0x36c   : > { %v4362_v38 = vpop.permute.xlu1 %1154  ;;  %p3076_p3 = scmp.ne.s32.totalorder (%p62_p2), %s2669_s13, %s3075_s23  ;;  %p3081_p5 = scmp.lt.s32.totalorder (%p62_p2), %s3075_s23, %s3075_s23 }
 0x36e   : > { %1431 = vrot.lane.b32.xlu1 %v4173_v2, %s6088_s22  ;;  %s6216_s22 = smov 15   ;;  %p3082_p6 = por (%p62_p2), %p3081_p5, %p3080_p4 }
 0x370   : > { %v4368_v44 = vpop.permute.xlu1 %1250  ;;  %p3083_p7 = pnand (%p62_p2), %p3082_p6, %p3076_p3 }
 0x371   : > { %6089 = vst [vmem:[#allocation13_spill] sm:$0xff] %v4368_v44 }
 0x372   : > { %1535 = vrot.lane.b32.xlu1 %v4184_v30, %s3247_s25  ;;  %v4390_v30 = vpop.permute.xlu0 %1062 }
 0x374   : > { %v4372_v17 = vpop.permute.xlu1 %1252 }
 0x375   : > { %6090 = vst [vmem:[#allocation72_spill] sm:$0xff] %v4372_v17 }
 0x376   : > { %1550 = vrot.lane.b32.xlu1 %v4173_v2, %s3249_s14  ;;  %v4396_v44 = vpop.permute.xlu0 %1152  ;;  %s6217_s14 = smov 111  }
 0x378   : > { %v4378_v37 = vpop.permute.xlu1 %1342 }
 0x379   : > { %6091 = vst [vmem:[#allocation73_spill] sm:$0xff] %v4378_v37 }
 0x37a   : > { %v4400_v37 = vpop.permute.xlu0 %1355 }
 0x37b   : > { %6098 = vst [vmem:[#allocation75_spill] sm:$0xff] %v4400_v37 }
 0x37c   : > { %v4382_v46 = vpop.permute.xlu1 %1344 }
 0x37d   : > { %6092 = vst [vmem:[#allocation14_spill] sm:$0xff] %v4382_v46 }
 0x380   : > { %v4384_v27 = vpop.permute.xlu1 %1357 }
 0x381   : > { %6093 = vst [vmem:[#allocation16_spill] sm:$0xff] %v4384_v27  ;;  %v6101_v27 = vld [vmem:[#allocation33_spill] sm:$0xff] }
 0x382   : > { %v1665_v26 = vadd.f32 %v6102_v15, %v6101_v27  ;;  %v816_v15 = vsel %vm366_vm3, %v4273_v5, %v4215_v59 }
 0x384   : > { %v4388_v23 = vpop.permute.xlu1 %855 }
 0x385   : > { %6095 = vst [vmem:[#allocation17_spill] sm:$0xff] %v4388_v23  ;;  %v4408_v23 = vpop.permute.xlu0 %857 }
 0x386   : > { %6103 = vst [vmem:[#allocation77_spill] sm:$0xff] %v4408_v23 }
 0x388   : > { %v4392_v40 = vpop.permute.xlu1 %972 }
 0x38c   : > { %v4394_v20 = vpop.permute.xlu1 %1077 }
 0x38d   : > { %6096 = vst [vmem:[#allocation74_spill] sm:$0xff] %v4394_v20 }
 0x390   : > { %v4398_v2 = vpop.permute.xlu1 %1370 }
 0x391   : > { %6097 = vst [vmem:[#allocation19_spill] sm:$0xff] %v4398_v2  ;;  %v6105_v2 = vld [vmem:[#allocation57_spill] sm:$0xff] }
 0x392   : > { %v4422_v27 = vmul.f32 %v6105_v2, %v4057_v43  ;;  %v933_v43 = vsel %vm614_vm5, %v4221_v16, %v4279_v29 }
 0x394   : > { %v4402_v17 = vpop.permute.xlu1 %1372  ;;  %6107 = vst [vmem:[#allocation79_spill] sm:$0xff] %v4422_v27 }
 0x395   : > { %6099 = vst [vmem:[#allocation21_spill] sm:$0xff] %v4402_v17  ;;  %v4418_v17 = vmul.f32 %v6105_v2, %v4054_v7  ;;  %v932_v7 = vsel %vm614_vm5, %v4279_v29, %v4221_v16  ;;  %v1270_v2 = vsel %vm1269_vm6, %v4293_v28, %v4232_v22  ;;  %v1271_v16 = vsel %vm1269_vm6, %v4232_v22, %v4293_v28  ;;  %v4461_v29 = vpop.permute.xlu0 %974  ;;  %v4476_v22 = vld [vmem:[%s5843_s9 + $0x22] sm:$0x3] }
 0x396   : > { %vm1008_vm5 = vcmp.lt.s32.totalorder %v3761_v25, 57  ;;  %vm946_vm6 = vcmp.lt.s32.totalorder %v3761_v25, 93 }
 0x397   : > { %6106 = vst [vmem:[#allocation57_spill] sm:$0xff] %v4418_v17 }
 0x398   : > { %v4404_v46 = vpop.permute.xlu1 %1461 }
 0x399   : > { %6100 = vst [vmem:[#allocation18_spill] sm:$0xff] %v4404_v46 }
 0x39a   : > { %1666 = vadd.xlane.f32.xlu1 %v1665_v26  ;;  %v815_v26 = vsel %vm366_vm3, %v4215_v59, %v4273_v5  ;;  %v1052_v59 = vsel %vm1051_vm9, %v4286_v9, %v4227_v12  ;;  %v1053_v5 = vsel %vm1051_vm9, %v4227_v12, %v4286_v9  ;;  %vm1021_vm9 = vcmp.lt.s32.totalorder %v3761_v25, 54  ;;  %v6111_v9 = vld [vmem:[#allocation37_spill] sm:$0xff] }
 0x39b   : > { %v4479_v28 = vmul.f32 %v6111_v9, %v933_v43  ;;  %v6113_v43 = vld [vmem:[#allocation59_spill] sm:$0xff] }
 0x39c   : > { %v4412_v20 = vpop.permute.xlu1 %1463  ;;  %v4499_v23 = vmul.f32 %v6113_v43, %v1270_v2  ;;  %v6117_v2 = vld [vmem:[#allocation65_spill] sm:$0xff] }
 0x39d   : > { %6104 = vst [vmem:[#allocation78_spill] sm:$0xff] %v4412_v20  ;;  %v6109_v20 = vld [vmem:[#allocation24_spill] sm:$0xff] }
 0x39e   : > { %v4466_v37 = vmul.f32 %v6109_v20, %v815_v26  ;;  %v4469_v12 = vmul.f32 %v6109_v20, %v816_v15  ;;  %6110 = vst [vmem:[#allocation24_spill] sm:$0xff] %v4476_v22  ;;  %v1389_v20 = vsel %vm278_vm1, %v4300_v45, %v4237_v54  ;;  %v1390_v15 = vsel %vm278_vm1, %v4237_v54, %v4300_v45  ;;  %v6112_v26 = vld [vmem:[#allocation41_spill] sm:$0xff] }
 0x39f   : > { %v4493_v27 = vmul.f32 %v6112_v26, %v1053_v5  ;;  %v4496_v17 = vmul.f32 %v6112_v26, %v1052_v59  ;;  %6114 = vst [vmem:[#allocation37_spill] sm:$0xff] %v4499_v23  ;;  %v774_v54 = vsel %vm772_vm8, %v4251_v60, %v4315_v31  ;;  %v4522_v26 = vmul.f32 %v6117_v2, %v1390_v15 }
 0x3a0   : > { %v4463_v46 = vpop.permute.xlu1 %1476  ;;  %vm829_vm1 = vcmp.lt.s32.totalorder %v3761_v25, 13  ;;  %v903_v15 = vsel %vm902_vm2, %v4328_v51, %v4268_v61 }
 0x3a1   : > { %6108 = vst [vmem:[#allocation80_spill] sm:$0xff] %v4463_v46  ;;  %v4482_v46 = vmul.f32 %v6111_v9, %v932_v7  ;;  %v4502_v7 = vmul.f32 %v6113_v43, %v1271_v16  ;;  %v773_v9 = vsel %vm772_vm8, %v4315_v31, %v4251_v60  ;;  %v4519_v16 = vmul.f32 %v6117_v2, %v1389_v20  ;;  %v6120_v2 = vld [vmem:[#allocation23_spill] sm:$0xff] }
 0x3a2   : > { %6119 = vst [vmem:[#allocation81_spill] sm:$0xff] %v4522_v26  ;;  %v786_v43 = vsel %vm785_vm12, %v4321_v18, %v4256_v13  ;;  %v787_v60 = vsel %vm785_vm12, %v4256_v13, %v4321_v18  ;;  %v1508_v31 = vsel %vm524_vm4, %v4308_v24, %v4242_v33  ;;  %v1509_v20 = vsel %vm524_vm4, %v4242_v33, %v4308_v24  ;;  %v4549_v18 = vpop.permute.xlu0 %1079  ;;  %v6121_v26 = vld [vmem:[#allocation25_spill] sm:$0xff] }
 0x3a3   : > { %6115 = vst [vmem:[#allocation41_spill] sm:$0xff] %v4502_v7  ;;  %6118 = vst [vmem:[#allocation65_spill] sm:$0xff] %v4519_v16  ;;  %v904_v13 = vsel %vm902_vm2, %v4268_v61, %v4328_v51  ;;  %v779_v59 = vmul.f32 %v6120_v2, %v773_v9  ;;  %v780_v45 = vmul.f32 %v6120_v2, %v774_v54  ;;  %v6123_v16 = vld [vmem:[#allocation27_spill] sm:$0xff]  ;;  %v6127_v7 = vld [vmem:[#allocation20_spill] sm:$0xff]  ;;  %vm1226_vm8 = vcmp.lt.s32.totalorder %v3761_v25, 89 }
 0x3a4   : > { %v4516_v5 = vpop.permute.xlu1 %1092  ;;  %v801_v33 = vsel %vm800_vm7, %v4336_v3, %v4271_v47  ;;  %v802_v24 = vsel %vm800_vm7, %v4271_v47, %v4336_v3  ;;  %v792_v61 = vmul.f32 %v6121_v26, %v786_v43  ;;  %v793_v51 = vmul.f32 %v6121_v26, %v787_v60  ;;  %v6124_v60 = vld [vmem:[#allocation29_spill] sm:$0xff] }
 0x3a5   : > { %6116 = vst [vmem:[#allocation59_spill] sm:$0xff] %v4516_v5  ;;  %v890_v9 = vsel %vm889_vm15, %v4260_v6, %v4264_v39  ;;  %v891_v54 = vsel %vm889_vm15, %v4264_v39, %v4260_v6  ;;  %v909_v47 = vmul.f32 %v6123_v16, %v904_v13  ;;  %v910_v3 = vmul.f32 %v6123_v16, %v903_v15 }
 0x3a6   : > { %v1022_v26 = vsel %vm1021_vm9, %v4343_v49, %v4295_v32  ;;  %v1023_v43 = vsel %vm1021_vm9, %v4295_v32, %v4343_v49  ;;  %v807_v22 = vmul.f32 %v6124_v60, %v801_v33  ;;  %v808_v6 = vmul.f32 %v6124_v60, %v802_v24  ;;  %v6125_v33 = vld [vmem:[#allocation34_spill] sm:$0xff] }
 0x3a7   : > { %v918_v39 = vsel %vm917_vm11, %v4276_v63, %v4281_v1  ;;  %v919_v16 = vsel %vm917_vm11, %v4281_v1, %v4276_v63  ;;  %vm1141_vm7 = vcmp.lt.s32.totalorder %v3761_v25, 6  ;;  %v1009_v32 = vsel %vm1008_vm5, %v4284_v48, %v4290_v62 }
 0x3a8   : > { %v4572_v2 = vpop.permute.xlu1 %1094  ;;  %v1010_v49 = vsel %vm1008_vm5, %v4290_v62, %v4284_v48  ;;  %v1037_v15 = vsel %vm1036_vm14, %v4298_v55, %v4304_v42  ;;  %v1038_v63 = vsel %vm1036_vm14, %v4304_v42, %v4298_v55  ;;  %v794_v1 = vadd.f32 %v792_v61, %v779_v59  ;;  %v4615_v48 = vpop.permute.xlu0 %1474 }
 0x3a9   : > { %6122 = vst [vmem:[#allocation23_spill] sm:$0xff] %v4572_v2  ;;  %v795_v13 = vadd.f32 %v793_v51, %v780_v45  ;;  %v1028_v24 = vmul.f32 %v6125_v33, %v1023_v43  ;;  %v1029_v60 = vmul.f32 %v6125_v33, %v1022_v26  ;;  %vm1128_vm11 = vcmp.lt.s32.totalorder %v3761_v25, 9  ;;  %v6128_v2 = vld [vmem:[#allocation22_spill] sm:$0xff]  ;;  %v6129_v45 = vld [vmem:[#allocation31_spill] sm:$0xff] }
 0x3aa   : > { %v896_v23 = vmul.f32 %v6127_v7, %v891_v54  ;;  %v897_v5 = vmul.f32 %v6127_v7, %v890_v9  ;;  %v924_v55 = vmul.f32 %v6128_v2, %v919_v16  ;;  %v925_v42 = vmul.f32 %v6128_v2, %v918_v39  ;;  %v6130_v51 = vld [vmem:[#allocation39_spill] sm:$0xff] }
 0x3ab   : > { %1588 = vperm.xlu1 %2968, %v4248_v56   ;;  %vm1239_vm14 = vcmp.lt.s32.totalorder %v3761_v25, 86  ;;  %v1015_v59 = vmul.f32 %v6129_v45, %v1010_v49  ;;  %v1016_v61 = vmul.f32 %v6129_v45, %v1009_v32  ;;  %v1043_v26 = vmul.f32 %v6130_v51, %v1038_v63  ;;  %v6133_v63 = vld [vmem:[#allocation26_spill] sm:$0xff] }
 0x3ac   : > { %v4617_v62 = vpop.permute.xlu1 %1177  ;;  %v1044_v43 = vmul.f32 %v6130_v51, %v1037_v15  ;;  %v911_v33 = vadd.f32 %v909_v47, %v896_v23  ;;  %v912_v54 = vadd.f32 %v910_v3, %v897_v5  ;;  %v810_v7 = vadd.f32 %v808_v6, %v795_v13  ;;  %v4643_v23 = vld [vmem:[%s5843_s9 + $0x24] sm:$0x3] }
 0x3ad   : > { %6126 = vst [vmem:[#allocation25_spill] sm:$0xff] %v4617_v62  ;;  %v809_v62 = vadd.f32 %v807_v22, %v794_v1  ;;  %vm1156_vm12 = vcmp.lt.s32.totalorder %v3761_v25, 3  ;;  %v6131_v9 = vmov 7   ;;  %v1030_v2 = vadd.f32 %v1028_v24, %v1015_v59  ;;  %v6132_v5 = vld [vmem:[#allocation69_spill] sm:$0xff] }
 0x3ae   : > { %v1031_v39 = vadd.f32 %v1029_v60, %v1016_v61  ;;  %v830_v16 = vsel %vm829_vm1, %v4350_v53, %v4310_v8  ;;  %v831_v32 = vsel %vm829_vm1, %v4310_v8, %v4350_v53  ;;  %vm844_vm15 = vcmp.lt.s32.totalorder %v3761_v25, 10  ;;  %v4657_v8 = vld [vmem:[%s5843_s9 + $0x26] sm:$0x3]  ;;  %v6135_v61 = vld [vmem:[#allocation28_spill] sm:$0xff] }
 0x3af   : > { %2970 = vset.pattern.permute.xlu1 %v6131_v9  ;;  %v4649_v47 = vmul.f32 %v6132_v5, %v1509_v20  ;;  %v4652_v3 = vmul.f32 %v6132_v5, %v1508_v31  ;;  %v926_v6 = vadd.f32 %v924_v55, %v911_v33  ;;  %v927_v49 = vadd.f32 %v925_v42, %v912_v54  ;;  %v4667_v20 = vpop.permute.xlu0 %1175 }
 0x3b0   : > { %v4645_v22 = vpop.permute.xlu1 %1282  ;;  %1777 = vperm.xlu1 %2970, %v4248_v56   ;;  %v1045_v53 = vadd.f32 %v1043_v26, %v1030_v2  ;;  %v1046_v15 = vadd.f32 %v1044_v43, %v1031_v39  ;;  %v947_v56 = vsel %vm946_vm6, %v4358_v4, %v4313_v19  ;;  %v948_v31 = vsel %vm946_vm6, %v4313_v19, %v4358_v4 }
 0x3b1   : > { %vm961_vm2 = vcmp.lt.s32.totalorder %v3761_v25, 90  ;;  %v836_v1 = vmul.f32 %v6133_v63, %v830_v16  ;;  %v837_v13 = vmul.f32 %v6133_v63, %v831_v32  ;;  %vm1066_vm5 = vcmp.lt.s32.totalorder %v3761_v25, 45 }
 0x3b2   : > { %v993_v24 = vrot.slane %v4643_v23, %v3553_v10  ;;  %v997_v60 = vrot.slane %v4643_v23, %v3634_v57  ;;  %v823_v55 = vadd.f32 %v4466_v37, %v809_v62  ;;  %v824_v19 = vadd.f32 %v4469_v12, %v810_v7 }
 0x3b3   : > { %v1113_v4 = vrot.slane %v4657_v8, %v3553_v10  ;;  %v1117_v42 = vrot.slane %v4657_v8, %v3634_v57  ;;  %v6134_v59 = vmov 0   ;;  %v953_v51 = vmul.f32 %v6135_v61, %v948_v31 }
 0x3b4   : > { %v4683_v45 = vpop.permute.xlu1 %1489  ;;  %2971 = vset.pattern.permute.xlu1 %v6134_v59  ;;  %v954_v26 = vmul.f32 %v6135_v61, %v947_v56  ;;  %v1142_v37 = vsel %vm1141_vm7, %v4366_v35, %v4326_v58  ;;  %v1143_v12 = vsel %vm1141_vm7, %v4326_v58, %v4366_v35  ;;  %vm1254_vm9 = vcmp.lt.s32.totalorder %v3761_v25, 83  ;;  %v6136_v35 = vld [vmem:[#allocation30_spill] sm:$0xff]  ;;  %v6138_v56 = vld [vmem:[#allocation47_spill] sm:$0xff] }
 0x3b5   : > { %v940_v62 = vadd.f32 %v4479_v28, %v926_v6  ;;  %v941_v43 = vadd.f32 %v4482_v46, %v927_v49  ;;  %v4700_v33 = vadd.f32 %v4493_v27, %v1045_v53  ;;  %v4703_v54 = vadd.f32 %v4496_v17, %v1046_v15  ;;  %v4715_v28 = vpop.permute.xlu0 %1280  ;;  %v6137_v49 = vld [vmem:[#allocation43_spill] sm:$0xff]  ;;  %v4765_v61 = vld [vmem:[%s5843_s9 + $0x2a] sm:$0x3] }
 0x3b6   : > { %v838_v7 = vadd.f32 %v836_v1, %v823_v55  ;;  %v839_v2 = vadd.f32 %v837_v13, %v824_v19  ;;  %v1129_v39 = vsel %vm1128_vm11, %v4318_v14, %v4323_v11  ;;  %v1130_v58 = vsel %vm1128_vm11, %v4323_v11, %v4318_v14  ;;  %v6139_v55 = vld [vmem:[#allocation45_spill] sm:$0xff] }
 0x3b7   : > { %v1148_v46 = vmul.f32 %v6136_v35, %v1143_v12  ;;  %v1149_v27 = vmul.f32 %v6136_v35, %v1142_v37  ;;  %v1240_v17 = vsel %vm1239_vm14, %v4374_v41, %v4341_v34  ;;  %v1241_v16 = vsel %vm1239_vm14, %v4341_v34, %v4374_v41  ;;  %v6143_v35 = vld [vmem:[#allocation15_spill] sm:$0xff] }
 0x3b8   : > { %vm976_vm1 = vcmp.lt.s32.totalorder %v3761_v25, 87  ;;  %v4726_v32 = vpop.permute.xlu1 %1491  ;;  %v955_v14 = vadd.f32 %v953_v51, %v940_v62  ;;  %v956_v11 = vadd.f32 %v954_v26, %v941_v43  ;;  %v1227_v5 = vsel %vm1226_vm8, %v4332_v21, %v4338_v0  ;;  %v6140_v51 = vld [vmem:[#allocation76_spill] sm:$0xff]  ;;  %v6141_v26 = vld [vmem:[#allocation49_spill] sm:$0xff] }
 0x3b9   : > { %v1228_v6 = vsel %vm1226_vm8, %v4338_v0, %v4332_v21  ;;  %vm859_vm6 = vcmp.lt.s32.totalorder %v3761_v25, 7  ;;  %v1135_v34 = vmul.f32 %v6137_v49, %v1130_v58  ;;  %v1136_v41 = vmul.f32 %v6137_v49, %v1129_v39  ;;  %v4779_v62 = vpop.permute.xlu0 %1295  ;;  %v6142_v43 = vld [vmem:[#allocation32_spill] sm:$0xff]  ;;  %v6144_v49 = vld [vmem:[#allocation35_spill] sm:$0xff] }
 0x3ba   : > { %v1157_v53 = vsel %vm1156_vm12, %v4396_v44, %v4362_v38  ;;  %v1158_v15 = vsel %vm1156_vm12, %v4362_v38, %v4396_v44  ;;  %v1246_v31 = vmul.f32 %v6138_v56, %v1240_v17  ;;  %v1247_v21 = vmul.f32 %v6138_v56, %v1241_v16 }
 0x3bb   : > { %v845_v0 = vsel %vm844_vm15, %v4380_v50, %v4346_v52  ;;  %v846_v63 = vsel %vm844_vm15, %v4346_v52, %v4380_v50  ;;  %vm1359_vm7 = vcmp.lt.s32.totalorder %v3761_v25, 38  ;;  %v1150_v1 = vadd.f32 %v1148_v46, %v1135_v34 }
 0x3bc   : > { %v1151_v13 = vadd.f32 %v1149_v27, %v1136_v41  ;;  %v1233_v38 = vmul.f32 %v6139_v55, %v1227_v5  ;;  %v1234_v44 = vmul.f32 %v6139_v55, %v1228_v6  ;;  %v4760_v19 = vpop.permute.xlu1 %1190  ;;  %v962_v52 = vsel %vm961_vm2, %v6140_v51, %v4352_v36  ;;  %v4800_v6 = vld [vmem:[%s5843_s9 + $0x2c] sm:$0x3]  ;;  %v6145_v41 = vld [vmem:[#allocation72_spill] sm:$0xff] }
 0x3bd   : > { %v963_v50 = vsel %vm961_vm2, %v4352_v36, %v6140_v51  ;;  %v1163_v37 = vmul.f32 %v6141_v26, %v1158_v15  ;;  %v1164_v12 = vmul.f32 %v6141_v26, %v1157_v53  ;;  %vm1346_vm11 = vcmp.lt.s32.totalorder %v3761_v25, 41  ;;  %v6146_v53 = vld [vmem:[#allocation13_spill] sm:$0xff]  ;;  %v6148_v26 = vld [vmem:[#allocation51_spill] sm:$0xff] }
 0x3be   : > { %vm1081_vm14 = vcmp.lt.s32.totalorder %v3761_v25, 42  ;;  %v851_v39 = vmul.f32 %v6142_v43, %v845_v0  ;;  %v852_v58 = vmul.f32 %v6142_v43, %v846_v63  ;;  %v1067_v46 = vsel %vm1066_vm5, %v4390_v30, %v6143_v35 }
 0x3bf   : > { %v1068_v36 = vsel %vm1066_vm5, %v6143_v35, %v4390_v30  ;;  %vm1374_vm8 = vcmp.lt.s32.totalorder %v3761_v25, 35  ;;  %v1248_v27 = vadd.f32 %v1246_v31, %v1233_v38  ;;  %v1249_v17 = vadd.f32 %v1247_v21, %v1234_v44  ;;  %v6147_v21 = vld [vmem:[#allocation38_spill] sm:$0xff] }
 0x3c0   : > { %vm1096_vm12 = vcmp.lt.s32.totalorder %v3761_v25, 39  ;;  %v968_v34 = vmul.f32 %v6144_v49, %v963_v50  ;;  %v969_v30 = vmul.f32 %v6144_v49, %v962_v52  ;;  %v1255_v15 = vsel %vm1254_vm9, %v6146_v53, %v6145_v41  ;;  %v4812_v31 = vpop.permute.xlu1 %1192  ;;  %v6165_v50 = vld [vmem:[#allocation44_spill] sm:$0xff] }
 0x3c1   : > { %v1256_v56 = vsel %vm1254_vm9, %v6145_v41, %v6146_v53  ;;  %v1073_v0 = vmul.f32 %v6147_v21, %v1068_v36  ;;  %v1074_v63 = vmul.f32 %v6147_v21, %v1067_v46  ;;  %v1165_v55 = vadd.f32 %v1163_v37, %v1150_v1  ;;  %v6149_v37 = vld [vmem:[#allocation77_spill] sm:$0xff]  ;;  %v6154_v41 = vld [vmem:[#allocation75_spill] sm:$0xff] }
 0x3c2   : > { %v1166_v38 = vadd.f32 %v1164_v12, %v1151_v13  ;;  %v853_v44 = vadd.f32 %v851_v39, %v838_v7  ;;  %v854_v51 = vadd.f32 %v852_v58, %v839_v2  ;;  %v1261_v43 = vmul.f32 %v6148_v26, %v1255_v15  ;;  %v4830_v2 = vpop.permute.xlu0 %1399  ;;  %v6150_v12 = vld [vmem:[#allocation17_spill] sm:$0xff]  ;;  %v6155_v15 = vld [vmem:[#allocation42_spill] sm:$0xff] }
 0x3c3   : > { %v1262_v35 = vmul.f32 %v6148_v26, %v1256_v56  ;;  %v977_v36 = vsel %vm976_vm1, %v4392_v40, %v4461_v29  ;;  %v978_v7 = vsel %vm976_vm1, %v4461_v29, %v4392_v40  ;;  %v970_v1 = vadd.f32 %v968_v34, %v955_v14  ;;  %v6151_v29 = vld [vmem:[#allocation57_spill] sm:$0xff]  ;;  %v6157_v26 = vld [vmem:[#allocation14_spill] sm:$0xff] }
 0x3c4   : > { %v971_v13 = vadd.f32 %v969_v30, %v956_v11  ;;  %v860_v39 = vsel %vm859_vm6, %v6150_v12, %v6149_v37  ;;  %v861_v58 = vsel %vm859_vm6, %v6149_v37, %v6150_v12  ;;  %v4840_v46 = vpop.permute.xlu1 %1297  ;;  %v1075_v49 = vadd.f32 %v1073_v0, %v4700_v33  ;;  %v6152_v11 = vld [vmem:[#allocation79_spill] sm:$0xff]  ;;  %v6153_v30 = vld [vmem:[#allocation16_spill] sm:$0xff]  ;;  %v6158_v37 = vld [vmem:[#allocation73_spill] sm:$0xff] }
 0x3c5   : > { %v1076_v40 = vadd.f32 %v1074_v63, %v4703_v54  ;;  %vm1478_vm15 = vcmp.lt.s32.totalorder %v3761_v25, 118  ;;  %v4846_v14 = vadd.f32 %v6151_v29, %v1165_v55  ;;  %v4849_v34 = vadd.f32 %v6152_v11, %v1166_v38  ;;  %v6156_v63 = vld [vmem:[#allocation55_spill] sm:$0xff]  ;;  %v6161_v29 = vld [vmem:[#allocation21_spill] sm:$0xff] }
 0x3c6   : > { %v1360_v53 = vsel %vm1359_vm7, %v6154_v41, %v6153_v30  ;;  %v1361_v33 = vsel %vm1359_vm7, %v6153_v30, %v6154_v41  ;;  %v983_v54 = vmul.f32 %v6155_v15, %v978_v7  ;;  %v984_v56 = vmul.f32 %v6155_v15, %v977_v36  ;;  %v6159_v7 = vld [vmem:[#allocation74_spill] sm:$0xff]  ;;  %v6162_v11 = vld [vmem:[#allocation19_spill] sm:$0xff]  ;;  %v4894_v15 = vpop.permute.xlu0 %1310 }
 0x3c7   : > { %vm1179_vm2 = vcmp.lt.s32.totalorder %v3761_v25, 125  ;;  %v1263_v21 = vadd.f32 %v1261_v43, %v1248_v27  ;;  %v1264_v0 = vadd.f32 %v1262_v35, %v1249_v17  ;;  %v866_v55 = vmul.f32 %v6156_v63, %v860_v39  ;;  %v6160_v35 = vld [vmem:[#allocation53_spill] sm:$0xff] }
 0x3c8   : > { %v867_v38 = vmul.f32 %v6156_v63, %v861_v58  ;;  %vm1465_vm5 = vcmp.lt.s32.totalorder %v3761_v25, 121  ;;  %v1347_v12 = vsel %vm1346_vm11, %v6158_v37, %v6157_v26  ;;  %v1348_v36 = vsel %vm1346_vm11, %v6157_v26, %v6158_v37  ;;  %v4882_v43 = vpop.permute.xlu1 %1401  ;;  %v6163_v26 = vld [vmem:[#allocation23_spill] sm:$0xff] }
 0x3c9   : > { %v1082_v27 = vsel %vm1081_vm14, %v6159_v7, %v4549_v18  ;;  %v1083_v17 = vsel %vm1081_vm14, %v4549_v18, %v6159_v7  ;;  %vm1284_vm9 = vcmp.lt.s32.totalorder %v3761_v25, 77  ;;  %v1366_v39 = vmul.f32 %v6160_v35, %v1360_v53  ;;  %v6164_v37 = vld [vmem:[#allocation59_spill] sm:$0xff] }
 0x3ca   : > { %v1367_v58 = vmul.f32 %v6160_v35, %v1361_v33  ;;  %v1375_v30 = vsel %vm1374_vm8, %v6162_v11, %v6161_v29  ;;  %v1376_v41 = vsel %vm1374_vm8, %v6161_v29, %v6162_v11  ;;  %v985_v18 = vadd.f32 %v983_v54, %v970_v1  ;;  %v6166_v1 = vld [vmem:[#allocation40_spill] sm:$0xff] }
 0x3cb   : > { %v986_v63 = vadd.f32 %v984_v56, %v971_v13  ;;  %v1097_v53 = vsel %vm1096_vm12, %v6164_v37, %v6163_v26  ;;  %v1098_v33 = vsel %vm1096_vm12, %v6163_v26, %v6164_v37  ;;  %v868_v7 = vadd.f32 %v866_v55, %v853_v44  ;;  %v6167_v56 = vld [vmem:[#allocation46_spill] sm:$0xff]  ;;  %v6168_v44 = vld [vmem:[#allocation48_spill] sm:$0xff] }
 0x3cc   : > { %v869_v35 = vadd.f32 %v867_v38, %v854_v51  ;;  %v1088_v52 = vmul.f32 %v6165_v50, %v1083_v17  ;;  %v1089_v29 = vmul.f32 %v6165_v50, %v1082_v27  ;;  %vm1493_vm1 = vcmp.lt.s32.totalorder %v3761_v25, 115  ;;  %v4912_v16 = vpop.permute.xlu1 %1205  ;;  %v6169_v38 = vld [vmem:[#allocation37_spill] sm:$0xff]  ;;  %v6171_v26 = vld [vmem:[#allocation24_spill] sm:$0xff] }
 0x3cd   : > { %v1353_v13 = vmul.f32 %v6166_v1, %v1347_v12  ;;  %v1354_v54 = vmul.f32 %v6166_v1, %v1348_v36  ;;  %v1381_v11 = vmul.f32 %v6167_v56, %v1375_v30  ;;  %v1382_v5 = vmul.f32 %v6167_v56, %v1376_v41  ;;  %v6170_v27 = vld [vmem:[#allocation41_spill] sm:$0xff] }
 0x3ce   : > { %vm1194_vm6 = vcmp.lt.s32.totalorder %v3761_v25, 122  ;;  %v1103_v51 = vmul.f32 %v6168_v44, %v1098_v33  ;;  %v1104_v55 = vmul.f32 %v6168_v44, %v1097_v53  ;;  %v1278_v50 = vadd.f32 %v6169_v38, %v1263_v21  ;;  %v6179_v38 = vld [vmem:[#allocation50_spill] sm:$0xff] }
 0x3cf   : > { %v1279_v17 = vadd.f32 %v6170_v27, %v1264_v0  ;;  %vm1403_vm7 = vcmp.lt.s32.totalorder %v3761_v25, 29  ;;  %v1368_v12 = vadd.f32 %v1366_v39, %v1353_v13  ;;  %v1369_v36 = vadd.f32 %v1367_v58, %v1354_v54  ;;  %v4931_v39 = vpop.permute.xlu0 %1414  ;;  %v6174_v54 = vld [vmem:[#allocation80_spill] sm:$0xff] }
 0x3d0   : > { %v1000_v30 = vmul.f32 %v993_v24, %v985_v18  ;;  %v1001_v41 = vmul.f32 %v997_v60, %v986_v63  ;;  %v6172_v37 = vrot.slane %v6171_v26, %v3553_v10  ;;  %v6173_v21 = vrot.slane %v6171_v26, %v3634_v57  ;;  %v1208_v60 = vpop.permute.xlu1 %1207 }
 0x3d1   : > { %v1090_v33 = vadd.f32 %v1088_v52, %v1075_v49  ;;  %v1091_v1 = vadd.f32 %v1089_v29, %v1076_v40  ;;  %v1383_v58 = vadd.f32 %v1381_v11, %v1368_v12  ;;  %v1384_v13 = vadd.f32 %v1382_v5, %v1369_v36  ;;  %v6175_v49 = vld [vmem:[#allocation25_spill] sm:$0xff]  ;;  %v6178_v11 = vld [vmem:[#allocation63_spill] sm:$0xff] }
 0x3d2   : > { %v883_v53 = vmul.f32 %v6172_v37, %v868_v7  ;;  %v884_v0 = vmul.f32 %v6173_v21, %v869_v35  ;;  %v1479_v23 = vsel %vm1478_vm15, %v4615_v48, %v6174_v54  ;;  %v1480_v24 = vsel %vm1478_vm15, %v6174_v54, %v4615_v48  ;;  %v6176_v7 = vld [vmem:[#allocation78_spill] sm:$0xff]  ;;  %v6180_v36 = vld [vmem:[#allocation65_spill] sm:$0xff] }
 0x3d3   : > { %vm1299_vm11 = vcmp.lt.s32.totalorder %v3761_v25, 74  ;;  %v1105_v18 = vadd.f32 %v1103_v51, %v1090_v33  ;;  %v1106_v52 = vadd.f32 %v1104_v55, %v1091_v1  ;;  %v1180_v5 = vsel %vm1179_vm2, %v4667_v20, %v6175_v49  ;;  %v6177_v35 = vld [vmem:[#allocation18_spill] sm:$0xff]  ;;  %v6183_v1 = vld [vmem:[#allocation52_spill] sm:$0xff] }
 0x3d4   : > { %v1181_v40 = vsel %vm1179_vm2, %v6175_v49, %v4667_v20  ;;  %vm1209_vm14 = vcmp.lt.s32.totalorder %v3761_v25, 119  ;;  %vm1418_vm8 = vcmp.lt.s32.totalorder %v3761_v25, 26  ;;  %v1002_v48 = vadd.f32 %v1000_v30, %v883_v53  ;;  %v1313_v37 = vpop.permute.xlu1 %1312  ;;  %v6182_v53 = vld [vmem:[#allocation61_spill] sm:$0xff] }
 0x3d5   : > { %v1003_v63 = vadd.f32 %v1001_v41, %v884_v0  ;;  %v1466_v29 = vsel %vm1465_vm5, %v6177_v35, %v6176_v7  ;;  %v1467_v56 = vsel %vm1465_vm5, %v6176_v7, %v6177_v35  ;;  %vm1314_vm12 = vcmp.lt.s32.totalorder %v3761_v25, 71  ;;  %v6181_v41 = vld [vmem:[#allocation81_spill] sm:$0xff] }
 0x3d6   : > { %v1485_v20 = vmul.f32 %v6178_v11, %v1480_v24  ;;  %v1486_v44 = vmul.f32 %v6178_v11, %v1479_v23  ;;  %v1285_v51 = vsel %vm1284_vm9, %v4715_v28, %v4645_v22  ;;  %v1286_v55 = vsel %vm1284_vm9, %v4645_v22, %v4715_v28  ;;  %v1519_v28 = vpop.permute.xlu0 %1518 }
 0x3d7   : > { %v1186_v27 = vmul.f32 %v6179_v38, %v1180_v5  ;;  %v1187_v12 = vmul.f32 %v6179_v38, %v1181_v40  ;;  %v1397_v30 = vadd.f32 %v6180_v36, %v1383_v58  ;;  %v1398_v26 = vadd.f32 %v6181_v41, %v1384_v13  ;;  %v6184_v5 = vld [vmem:[#allocation67_spill] sm:$0xff] }
 0x3d8   : > { %v1472_v21 = vmul.f32 %v6182_v53, %v1467_v56  ;;  %v1473_v0 = vmul.f32 %v6182_v53, %v1466_v29  ;;  %v1120_v33 = vmul.f32 %v1113_v4, %v1105_v18  ;;  %v1121_v22 = vmul.f32 %v1117_v42, %v1106_v52  ;;  %v1417_v49 = vpop.permute.xlu1 %1416 }
 0x3d9   : > { %v1291_v54 = vmul.f32 %v6183_v1, %v1285_v51  ;;  %v1292_v58 = vmul.f32 %v6183_v1, %v1286_v55  ;;  %v1494_v13 = vsel %vm1493_vm1, %v4683_v45, %v4726_v32  ;;  %v1495_v23 = vsel %vm1493_vm1, %v4726_v32, %v4683_v45 }
 0x3da   : > { %vm1522_vm15 = vcmp.lt.s32.totalorder %v3761_v25, 109  ;;  %vm1433_vm2 = vcmp.lt.s32.totalorder %v3761_v25, 23  ;;  %v1487_v8 = vadd.f32 %v1485_v20, %v1472_v21  ;;  %v1488_v4 = vadd.f32 %v1486_v44, %v1473_v0  ;;  %v6189_v0 = vld [vmem:[#allocation62_spill] sm:$0xff] }
 0x3db   : > { %v1195_v42 = vsel %vm1194_vm6, %v4760_v19, %v4812_v31  ;;  %v1196_v24 = vsel %vm1194_vm6, %v4812_v31, %v4760_v19  ;;  %v1188_v18 = vadd.f32 %v1186_v27, %v4846_v14  ;;  %v1189_v45 = vadd.f32 %v1187_v12, %v4849_v34  ;;  %v6185_v34 = vld [vmem:[#allocation54_spill] sm:$0xff]  ;;  %v6187_v12 = vld [vmem:[#allocation56_spill] sm:$0xff] }
 0x3dc   : > { %v1404_v32 = vsel %vm1403_vm7, %v4830_v2, %v4882_v43  ;;  %v1405_v52 = vsel %vm1403_vm7, %v4882_v43, %v4830_v2  ;;  %v1500_v40 = vmul.f32 %v6184_v5, %v1495_v23  ;;  %v1501_v7 = vmul.f32 %v6184_v5, %v1494_v13 }
 0x3dd   : > { %v1122_v19 = vadd.f32 %v1120_v33, %v1002_v48  ;;  %v1123_v31 = vadd.f32 %v1121_v22, %v1003_v63  ;;  %v1293_v14 = vadd.f32 %v1291_v54, %v1278_v50  ;;  %v1294_v35 = vadd.f32 %v1292_v58, %v1279_v17  ;;  %v6186_v48 = vld [vmem:[#allocation58_spill] sm:$0xff]  ;;  %v1430_v17 = vpop.permute.xlu0 %1429  ;;  %v6190_v58 = vld [vmem:[#allocation60_spill] sm:$0xff] }
 0x3de   : > { %v1201_v29 = vmul.f32 %v6185_v34, %v1195_v42  ;;  %v1202_v56 = vmul.f32 %v6185_v34, %v1196_v24  ;;  %vm1537_vm5 = vcmp.lt.s32.totalorder %v3761_v25, 106  ;;  %v1300_v2 = vsel %vm1299_vm11, %v4779_v62, %v4840_v46 }
 0x3df   : > { %v1301_v43 = vsel %vm1299_vm11, %v4840_v46, %v4779_v62  ;;  %v1410_v63 = vmul.f32 %v6186_v48, %v1404_v32  ;;  %v1411_v50 = vmul.f32 %v6186_v48, %v1405_v52  ;;  %v1210_v11 = vsel %vm1209_vm14, %v4912_v16, %v1208_v60  ;;  %v1521_v46 = vpop.permute.xlu1 %1520 }
 0x3e0   : > { %v1211_v20 = vsel %vm1209_vm14, %v1208_v60, %v4912_v16  ;;  %v1419_v44 = vsel %vm1418_vm8, %v4931_v39, %v1417_v49  ;;  %v1420_v62 = vsel %vm1418_vm8, %v1417_v49, %v4931_v39  ;;  %v1502_v51 = vadd.f32 %v1500_v40, %v1487_v8  ;;  %v6188_v39 = vld [vmem:[#allocation71_spill] sm:$0xff] }
 0x3e1   : > { %v1503_v55 = vadd.f32 %v1501_v7, %v1488_v4  ;;  %v1315_v38 = vsel %vm1314_vm12, %v4894_v15, %v1313_v37  ;;  %v1316_v27 = vsel %vm1314_vm12, %v1313_v37, %v4894_v15  ;;  %v1203_v16 = vadd.f32 %v1201_v29, %v1188_v18  ;;  %v1534_v24 = vpop.permute.xlu0 %1533  ;;  %v6191_v18 = vld [vmem:[#allocation66_spill] sm:$0xff] }
 0x3e2   : > { %v1204_v60 = vadd.f32 %v1202_v56, %v1189_v45  ;;  %v1306_v36 = vmul.f32 %v6187_v12, %v1300_v2  ;;  %v1307_v41 = vmul.f32 %v6187_v12, %v1301_v43  ;;  %vm1552_vm9 = vcmp.lt.s32.totalorder %v3761_v25, 103 }
 0x3e3   : > { %v1216_v53 = vmul.f32 %v6188_v39, %v1210_v11  ;;  %v1217_v21 = vmul.f32 %v6188_v39, %v1211_v20  ;;  %v1425_v33 = vmul.f32 %v6189_v0, %v1419_v44  ;;  %v1426_v22 = vmul.f32 %v6189_v0, %v1420_v62  ;;  %v1432_v13 = vpop.permute.xlu1 %1431  ;;  %v6193_v11 = vld [vmem:[#allocation68_spill] sm:$0xff] }
 0x3e4   : > { %v1412_v1 = vadd.f32 %v1410_v63, %v1397_v30  ;;  %v1413_v54 = vadd.f32 %v1411_v50, %v1398_v26  ;;  %v1321_v15 = vmul.f32 %v6190_v58, %v1315_v38  ;;  %v1322_v37 = vmul.f32 %v6190_v58, %v1316_v27 }
 0x3e5   : > { %v1523_v23 = vsel %vm1522_vm15, %v1519_v28, %v1521_v46  ;;  %v1524_v8 = vsel %vm1522_vm15, %v1521_v46, %v1519_v28  ;;  %v1434_v4 = vsel %vm1433_vm2, %v1430_v17, %v1432_v13  ;;  %v1435_v42 = vsel %vm1433_vm2, %v1432_v13, %v1430_v17  ;;  %v6192_v28 = vld [vmem:[#allocation64_spill] sm:$0xff] }
 0x3e6   : > { %v1308_v30 = vadd.f32 %v1306_v36, %v1293_v14  ;;  %v1309_v26 = vadd.f32 %v1307_v41, %v1294_v35  ;;  %v1440_v45 = vmul.f32 %v6191_v18, %v1434_v4  ;;  %v1441_v32 = vmul.f32 %v6191_v18, %v1435_v42  ;;  %v2711_v14 = vld [vmem:[%s5843_s9 + $0x2e] sm:$0x3] }
 0x3e7   : > { %v1218_v52 = vadd.f32 %v1216_v53, %v1203_v16  ;;  %v1219_v49 = vadd.f32 %v1217_v21, %v1204_v60  ;;  %v1427_v5 = vadd.f32 %v1425_v33, %v1412_v1  ;;  %v1428_v40 = vadd.f32 %v1426_v22, %v1413_v54  ;;  %v1536_v2 = vpop.permute.xlu1 %1535  ;;  %v1549_v16 = vpop.permute.xlu0 %1548  ;;  %v6198_v22 = vld [vmem:[#allocation70_spill] sm:$0xff] }
 0x3e8   : > { %v1323_v7 = vadd.f32 %v1321_v15, %v1308_v30  ;;  %v1324_v34 = vadd.f32 %v1322_v37, %v1309_v26  ;;  %v1529_v29 = vmul.f32 %v6192_v28, %v1524_v8  ;;  %v1530_v56 = vmul.f32 %v6192_v28, %v1523_v23  ;;  %v1586_v18 = vld [vmem:[%s5835_s1 + $0x8] sm:$0xff] }
 0x3e9   : > { %v1442_v35 = vadd.f32 %v1440_v45, %v1427_v5  ;;  %v1443_v43 = vadd.f32 %v1441_v32, %v1428_v40  ;;  %v1538_v48 = vsel %vm1537_vm5, %v1534_v24, %v1536_v2  ;;  %v1539_v63 = vsel %vm1537_vm5, %v1536_v2, %v1534_v24  ;;  %v1669_v32 = vld [vmem:[%s5838_s4] sm:$0xff] }
 0x3ea   : > { %v1516_v50 = vadd.f32 %v4649_v47, %v1502_v51  ;;  %v1517_v17 = vadd.f32 %v4652_v3, %v1503_v55  ;;  %v1544_v20 = vmul.f32 %v6193_v11, %v1539_v63  ;;  %v1545_v44 = vmul.f32 %v6193_v11, %v1538_v48  ;;  %v5112_v63 = vld [vmem:[%s5841_s7] sm:$0xff] }
 0x3eb   : > { %v1220_v62 = vadd.f32 %v1218_v52, %v1122_v19  ;;  %v1221_v46 = vadd.f32 %v1219_v49, %v1123_v31  ;;  %v1573_v38 = vrot.slane %v2711_v14, %v3634_v57  ;;  %v1569_v27 = vrot.slane %v2711_v14, %v3553_v10  ;;  %v1551_v47 = vpop.permute.xlu1 %1550  ;;  %v1582_v30 = vpop.permute.xlu0 %1581  ;;  %v1680_v14 = vld [vmem:[%s5838_s4 + $0x8] sm:$0xff] }
 0x3ec   : > { %v6194_v60 = vrot.slane %v4765_v61, %v3553_v10  ;;  %v1531_v36 = vadd.f32 %v1529_v29, %v1516_v50  ;;  %v1532_v41 = vadd.f32 %v1530_v56, %v1517_v17  ;;  %v6195_v3 = vrot.slane %v4765_v61, %v3634_v57 }
 0x3ed   : > { %v1553_v19 = vsel %vm1552_vm9, %v1549_v16, %v1551_v47  ;;  %v1554_v31 = vsel %vm1552_vm9, %v1551_v47, %v1549_v16  ;;  %v6196_v55 = vrot.slane %v4800_v6, %v3634_v57  ;;  %v6197_v53 = vrot.slane %v4800_v6, %v3553_v10  ;;  %v6201_v47 = vld [vmem:[#allocation36_spill] sm:$0xff] }
 0x3ee   : > { %v1338_v12 = vmul.f32 %v6194_v60, %v1323_v7  ;;  %v1339_v51 = vmul.f32 %v6195_v3, %v1324_v34  ;;  %v1546_v0 = vadd.f32 %v1544_v20, %v1531_v36  ;;  %v1547_v33 = vadd.f32 %v1545_v44, %v1532_v41 }
 0x3ef   : > { %v1458_v39 = vmul.f32 %v6196_v55, %v1443_v43  ;;  %v1457_v21 = vmul.f32 %v6197_v53, %v1442_v35  ;;  %v1559_v1 = vmul.f32 %v6198_v22, %v1554_v31  ;;  %v1560_v61 = vmul.f32 %v6198_v22, %v1553_v19  ;;  %v1695_v31 = vld [vmem:[%s5835_s1 + $0x10] sm:$0xff]  ;;  %v1788_v55 = vld [vmem:[%s5842_s8] sm:$0xff]  ;;  %v1916_v22 = vld [vmem:[%s5837_s3 + $0x18] sm:$0xff] }
 0x3f0   : > { %v1341_v58 = vadd.f32 %v1339_v51, %v1221_v46  ;;  %v1340_v37 = vadd.f32 %v1338_v12, %v1220_v62  ;;  %v6199_v45 = vmov 0.0   ;;  %vm1671_vm1 = vcmask 15360   ;;  %v6202_v51 = vld [vmem:[#allocation33_spill] sm:$0xff]  ;;  %1794 = vperm.xlu1 %2971, %v1788_v55   ;;  %v5135_v53 = vld [vmem:[%s5842_s8 + $0x10] sm:$0xff] }
 0x3f1   : > { %v1561_v54 = vadd.f32 %v1559_v1, %v1546_v0  ;;  %v1562_v15 = vadd.f32 %v1560_v61, %v1547_v33  ;;  %v6200_v50 = vmov 4   ;;  %v1913_v0 = vld [vmem:[%s5837_s3] sm:$0xff]  ;;  %v1914_v33 = vld [vmem:[%s5837_s3 + $0x8] sm:$0xff]  ;;  %v6203_v1 = vmov 1   ;;  %v1915_v61 = vld [vmem:[%s5837_s3 + $0x10] sm:$0xff] }
 0x3f2   : > { %v1460_v13 = vadd.f32 %v1458_v39, %v1341_v58  ;;  %v1459_v8 = vadd.f32 %v1457_v21, %v1340_v37  ;;  %v5129_v39 = vld [vmem:[%s5842_s8 + $0x8] sm:$0xff]  ;;  %v5141_v21 = vld [vmem:[%s5842_s8 + $0x18] sm:$0xff]  ;;  %v6205_v58 = vmov 3   ;;  %v6207_v37 = vmov 5  }
 0x3f3   : > { %v1577_v23 = vmul.f32 %v1573_v38, %v1562_v15  ;;  %v1576_v4 = vmul.f32 %v1569_v27, %v1561_v54  ;;  %v6204_v54 = vmov 2   ;;  %v6206_v15 = vmov 6  }
 0x3f4   : > { %1799 = vperm.xlu1 %2971, %v5129_v39   ;;  %vm6235_vm7 = vcmp.lt.s32.totalorder %v3761_v25, 113  ;;  %vm6237_vm14 = vcmp.lt.s32.totalorder %v3761_v25, 127  ;;  %vm6239_vm12 = vcmp.lt.s32.totalorder %v3761_v25, 111 }
 0x3f5   : > { %v1579_v42 = vadd.f32 %v1577_v23, %v1460_v13  ;;  %v1578_v24 = vadd.f32 %v1576_v4, %v1459_v8  ;;  %v6208_v13 = vmov 8   ;;  %vm6236_vm11 = vmmov %vm6235_vm7 }
 0x3f6   : > { %vm6238_vm8 = vmmov %vm6237_vm14 }
 0x3f7   : > { %v1585_v26 = vadd.f32 %v1582_v30, %v1579_v42  ;;  %v1584_v6 = vadd.f32 %v1582_v30, %v1578_v24  ;;  %v6209_v30 = vld [vmem:[#allocation12_spill] sm:$0xff]  ;;  %vm6240_vm15 = vmmov %vm6239_vm12 }
 0x3f8   : > { %1804 = vperm.xlu1 %2971, %v5135_v53   ;;  %vm6243_vm9 = vmmov %vm6235_vm7 }
 0x3f9   : > { %1594 = vmatprep.subr.mxu1 %v1585_v26 }
 0x3fa   : > { %1595 = vmatpush1.msra.mxu1 %v1584_v6  ;;  %v6210_v6 = vld [vmem:[#allocation11_spill] sm:$0xff] }
 0x3fb   : > { %2712 = vmatmul.mubr.msk.f32.vlgmr.msra.gmra.mrb[0].mxu1 %vm90_vm0, %v1586_v18 }
 0x3fc   : > { %1888 = vmatprep.mubr.f32.mxu1 %v6199_v45  ;;  %1809 = vperm.xlu1 %2971, %v5141_v21  }
 0x400   : > { %1985 = vperm.xlu1 %2971, %v1913_v0  }
 0x404   : > { %1990 = vperm.xlu1 %2971, %v1914_v33  }
 0x408   : > { %2972 = vset.pattern.permute.xlu1 %v6203_v1 }
 0x409   : > { %2036 = vperm.xlu1 %2972, %v1913_v0  }
 0x40d   : > { %2973 = vset.pattern.permute.xlu1 %v6204_v54 }
 0x40e   : > { %2092 = vperm.xlu1 %2973, %v1913_v0  }
 0x412   : > { %2096 = vperm.xlu1 %2973, %v1914_v33  }
 0x416   : > { %2974 = vset.pattern.permute.xlu1 %v6205_v58 }
 0x417   : > { %2173 = vperm.xlu1 %2974, %v1914_v33  }
 0x41b   : > { %2975 = vset.pattern.permute.xlu1 %v6200_v50 }
 0x41c   : > { %2193 = vperm.xlu1 %2975, %v1913_v0  }
 0x420   : > { %2977 = vset.pattern.permute.xlu1 %v6206_v15 }
 0x421   : > { %2313 = vperm.xlu1 %2977, %v1913_v0  }
 0x425   : > { %2317 = vperm.xlu1 %2977, %v1914_v33  }
 0x427   : > { %v1667_v52 = vpop.xlane.xlu1 %1666 }
 0x428   : > { %v1668_v49 = vmul.f32 0.00390625, %v1667_v52  ;;  %v3027_v52 = vld [vmem:[%s3412_s21 + $0x8] sm:$0xff] }
 0x429   : > { %2978 = vset.pattern.permute.xlu1 %v6131_v9 }
 0x42a   : > { %v1670_v5 = vmul.f32 %v1669_v32, %v1668_v49  ;;  %2365 = vperm.xlu1 %2978, %v1914_v33  }
 0x42b   : > { %v1589_v27 = vpop.permute.xlu1 %1588 }
 0x42c   : > { %v1672_v40 = vsel %vm1671_vm1, %v1670_v5, 0.0  ;;  %v3028_v5 = vld [vmem:[%s3412_s21] sm:$0xff] }
 0x42d   : > { %v1673_v7 = vrot.slane %v1672_v40, 4 }
 0x42e   : > { %2979 = vset.pattern.permute.xlu1 %v6134_v59 }
 0x42f   : > { %v1674_v34 = vadd.f32 %v1673_v7, %v1672_v40  ;;  %1995 = vperm.xlu1 %2979, %v1915_v61   ;;  %v1778_v24 = vpop.permute.xlu1 %1777  ;;  %v1784_v7 = vld [vmem:[%s5839_s5] sm:$0xff] }
 0x431   : > { %v1675_v28 = vrot.slane %v1674_v34, 2 }
 0x433   : > { %v1676_v29 = vadd.f32 %v1675_v28, %v1674_v34  ;;  %2981 = vset.pattern.permute.xlu1 %v6203_v1  ;;  %v1785_v34 = vld [vmem:[%s5839_s5 + $0x8] sm:$0xff]  ;;  %v1786_v28 = vld [vmem:[%s5839_s5 + $0x10] sm:$0xff] }
 0x434   : > { %2044 = vperm.xlu1 %2981, %v1915_v61  }
 0x435   : > { %v1677_v56 = vrot.slane %v1676_v29, 1 }
 0x437   : > { %v1678_v2 = vadd.f32 %v1677_v56, %v1676_v29  ;;  %v1787_v29 = vld [vmem:[%s5839_s5 + $0x18] sm:$0xff] }
 0x438   : > { %2048 = vperm.xlu1 %2981, %v1916_v22  }
 0x439   : > { %v1679_v35 = vmax.f32 %v1678_v2, 0.0 }
 0x43b   : > { %v1681_v43 = vmul.f32 %v1680_v14, %v1679_v35 }
 0x43c   : > { %2982 = vset.pattern.permute.xlu1 %v6207_v37 }
 0x43d   : > { %v1682_v48 = vsel %vm1671_vm1, %v1681_v43, 0.0  ;;  %2253 = vperm.xlu1 %2982, %v1914_v33   ;;  %vm6244_vm1 = vmmov %vm6235_vm7 }
 0x43e   : > { %1683 = vadd.xlane.f32.xlu0 %v1682_v48 }
 0x441   : > { %2983 = vset.pattern.permute.xlu1 %v6208_v13 }
 0x442   : > { %2417 = vperm.xlu1 %2983, %v1913_v0  }
 0x446   : > { %2986 = vset.pattern.permute.xlu1 %v6204_v54 }
 0x447   : > { %2104 = vperm.xlu1 %2986, %v1916_v22  }
 0x44b   : > { %2987 = vset.pattern.permute.xlu1 %v6205_v58 }
 0x44c   : > { %2177 = vperm.xlu1 %2987, %v1915_v61  }
 0x450   : > { %2988 = vset.pattern.permute.xlu1 %v6200_v50 }
 0x451   : > { %2201 = vperm.xlu1 %2988, %v1915_v61  }
 0x454   : > { %1697 = vperm.xlu0 %2969, %v5112_v63  }
 0x455   : > { %2205 = vperm.xlu1 %2988, %v1916_v22  }
 0x458   : > { %2976 = vset.pattern.permute.xlu0 %v6200_v50 }
 0x459   : > { %2197 = vperm.xlu0 %2976, %v1914_v33   ;;  %2991 = vset.pattern.permute.xlu1 %v6206_v15 }
 0x45a   : > { %2325 = vperm.xlu1 %2991, %v1916_v22  }
 0x45d   : > { %2980 = vset.pattern.permute.xlu0 %v6134_v59 }
 0x45e   : > { %2000 = vperm.xlu0 %2980, %v1916_v22   ;;  %2992 = vset.pattern.permute.xlu1 %v6131_v9 }
 0x45f   : > { %2369 = vperm.xlu1 %2992, %v1915_v61  }
 0x462   : > { %2984 = vset.pattern.permute.xlu0 %v6204_v54 }
 0x463   : > { %2100 = vperm.xlu0 %2984, %v1915_v61   ;;  %2995 = vset.pattern.permute.xlu1 %v6207_v37 }
 0x464   : > { %2261 = vperm.xlu1 %2995, %v1916_v22  }
 0x467   : > { %2985 = vset.pattern.permute.xlu0 %v6205_v58 }
 0x468   : > { %2169 = vperm.xlu0 %2985, %v1913_v0   ;;  %2996 = vset.pattern.permute.xlu1 %v6208_v13 }
 0x469   : > { %2425 = vperm.xlu1 %2996, %v1915_v61  }
 0x46c   : > { %2181 = vperm.xlu0 %2985, %v1916_v22  }
 0x46d   : > { %2998 = vset.pattern.permute.xlu1 %v6203_v1 }
 0x46e   : > { %2482 = vperm.xlu1 %2998, %v5129_v39  }
 0x46f   : > { %v1795_v56 = vpop.permute.xlu1 %1794 }
 0x470   : > { %2989 = vset.pattern.permute.xlu0 %v6206_v15 }
 0x471   : > { %2321 = vperm.xlu0 %2989, %v1915_v61  }
 0x473   : > { %v1800_v2 = vpop.permute.xlu1 %1799 }
 0x475   : > { %2990 = vset.pattern.permute.xlu0 %v6131_v9 }
 0x476   : > { %2361 = vperm.xlu0 %2990, %v1913_v0  }
 0x477   : > { %v1805_v14 = vpop.permute.xlu1 %1804 }
 0x47a   : > { %2373 = vperm.xlu0 %2990, %v1916_v22  }
 0x47b   : > { %v5212_v35 = vpop.permute.xlu1 %1809 }
 0x47e   : > { %2993 = vset.pattern.permute.xlu0 %v6207_v37 }
 0x47f   : > { %2249 = vperm.xlu0 %2993, %v1913_v0   ;;  %v5214_v43 = vpop.permute.xlu1 %1985 }
 0x483   : > { %2257 = vperm.xlu0 %2993, %v1915_v61   ;;  %v5216_v48 = vpop.permute.xlu1 %1990 }
 0x487   : > { %2994 = vset.pattern.permute.xlu0 %v6208_v13 }
 0x488   : > { %2421 = vperm.xlu0 %2994, %v1914_v33   ;;  %v5218_v50 = vpop.permute.xlu1 %2036 }
 0x48c   : > { %2429 = vperm.xlu0 %2994, %v1916_v22  }
 0x490   : > { %2997 = vset.pattern.permute.xlu0 %v6203_v1 }
 0x491   : > { %2040 = vperm.xlu0 %2997, %v1914_v33  }
 0x495   : > { %2478 = vperm.xlu0 %2997, %v1788_v55  }
 0x4cb   : > { %v1684_v20 = vpop.xlane.xlu0 %1683 }
 0x4cc   : > { %v1685_v44 = vsub.f32 0.0, %v1684_v20 }
 0x4ce   : > { %v1660_v17 = vpop.f32.mrb[0].mxu1  ;;  %v1686_v62 = vmul.f32 1.442695, %v1685_v44 }
 0x4cf   : > { %v1662_v11 = vpop.f32.mrb[1].mxu1  ;;  %v1661_v16 = vadd.f32 %v1660_v17, %v1589_v27  ;;  %v5220_v17 = vpop.permute.xlu1 %2092 }
 0x4d0   : > { %3005 = vpow2.f32 %v1686_v62  ;;  %v1663_v60 = vadd.f32 %v1662_v11, %v1589_v27  ;;  %v2718_v62 = vld [vmem:[%s5843_s9 + $0x30] sm:$0x3] }
 0x4d3   : > { %v1698_v59 = vpop.permute.xlu0 %1697 }
 0x4da   : > { %v3006_v46 = vpop.eup %3005 }
 0x4db   : > { %v1688_v38 = vadd.f32 1.0, %v3006_v46 }
 0x4dd   : > { %3007 = vrcp.f32 %v1688_v38 }
 0x4e7   : > { %v3008_v12 = vpop.eup %3007 }
 0x4e8   : > { %v1691_v36 = vmul.f32 %v3008_v12, %v1661_v16  ;;  %v1692_v41 = vmul.f32 %v3008_v12, %v1663_v60  ;;  %v5238_v60 = vrot.slane %v2718_v62, %v3553_v10  ;;  %v2719_v12 = vld [vmem:[%s5843_s9 + $0x34] sm:$0x3] }
 0x4e9   : > { %v5286_v58 = vrot.slane %v2719_v12, %v3634_v57 }
 0x4ea   : > { %v1694_v3 = vmul.f32 %v1692_v41, %v6201_v47  ;;  %v1693_v19 = vmul.f32 %v1691_v36, %v6202_v51  ;;  %v5252_v51 = vrot.slane %v2719_v12, %v3553_v10 }
 0x4ec   : > { %1703 = vmatprep.subr.mxu0 %v1694_v3 }
 0x4ed   : > { %1704 = vmatpush1.msra.mxu0 %v1693_v19 }
 0x4ee   : > { %2713 = vmatmul.mubr.msk.f32.vlgmr.msra.gmra.mrb[2].mxu0 %vm90_vm0, %v1695_v31  ;;  %v5257_v31 = vrot.slane %v2718_v62, %v3634_v57 }
 0x4ef   : > { %2642 = vmatprep.mubr.f32.mxu0 %v6199_v45 }
 0x5c1   : > { %v1769_v23 = vpop.f32.mrb[2].mxu0 }
 0x5c2   : > { %v1770_v8 = vadd.f32 %v1769_v23, %v1698_v59  ;;  %v1771_v4 = vpop.f32.mrb[3].mxu0 }
 0x5c3   : > { %v1772_v42 = vadd.f32 %v1771_v4, %v1698_v59 }
 0x5c4   : > { %v1774_v26 = vadd.f32 %v1770_v8, %v6209_v30 }
 0x5c5   : > { %v1775_v18 = vadd.f32 %v1772_v42, %v6210_v6 }
 0x5c6   : > { %v1780_v9 = vmul.f32 %v1778_v24, %v1774_v26 }
 0x5c7   : > { %v1781_v32 = vmul.f32 %v1778_v24, %v1775_v18  ;;  %v5310_v24 = vpop.permute.xlu0 %2197 }
 0x5c8   : > { %v5189_v40 = vadd.f32 %v3028_v5, %v1780_v9 }
 0x5c9   : > { %v5186_v49 = vadd.f32 %v3027_v52, %v1781_v32 }
 0x5ca   : > { %6212 = vst [vmem:[#allocation29_spill] sm:$0xff] %v5189_v40 }
 0x5cb   : > { %6211 = vst [vmem:[#allocation27_spill] sm:$0xff] %v5186_v49  ;;  %1824 = vmatprep.subr.mxu1 %v5186_v49  ;;  %v5318_v26 = vpop.permute.xlu0 %2000 }
 0x5cc   : > { %1825 = vmatpush1.msra.mxu1 %v5189_v40  ;;  %6219 = vst [vmem:[#allocation34_spill] sm:$0xff] %v5318_v26 }
 0x5cd   : > { %2714 = vmatmul.mubr.msk.f32.vlgmr.msra.gmra.mrb[2].mxu1 %vm90_vm0, %v1784_v7 }
 0x5ce   : > { %1894 = vmatprep.mubr.f32.mxu1 %v6199_v45 }
 0x5cf   : > { %v5325_v18 = vpop.permute.xlu0 %2100 }
 0x5d0   : > { %6220 = vst [vmem:[#allocation20_spill] sm:$0xff] %v5325_v18 }
 0x5d1   : > { %2715 = vmatmul.mubr.msk.f32.gmra.mrb[4].mxu1 %vm90_vm0, %v1785_v34 }
 0x5d2   : > { %1900 = vmatprep.mubr.f32.mxu1 %v6199_v45 }
 0x5d3   : > { %v5334_v32 = vpop.permute.xlu0 %2169 }
 0x5d5   : > { %2716 = vmatmul.mubr.msk.f32.gmra.mrb[6].mxu1 %vm90_vm0, %v1786_v28 }
 0x5d6   : > { %1906 = vmatprep.mubr.f32.mxu1 %v6199_v45  ;;  %v5222_v45 = vpop.permute.xlu1 %2096 }
 0x5d7   : > { %v5344_v34 = vpop.permute.xlu0 %2181 }
 0x5d8   : > { %6222 = vst [vmem:[#allocation31_spill] sm:$0xff] %v5344_v34 }
 0x5d9   : > { %2717 = vmatmul.mubr.msk.f32.gmra.mrb[8].mxu1 %vm90_vm0, %v1787_v29  ;;  %vm6233_vm0 = vcmp.lt.s32.totalorder %v3761_v25, 1 }
 0x5da   : > { %v5233_v38 = vpop.permute.xlu1 %2173  ;;  %vm6234_vm6 = vmmov %vm6233_vm0 }
 0x5db   : > { %v5354_v29 = vpop.permute.xlu0 %2321  ;;  %vm6241_vm2 = vmmov %vm6233_vm0 }
 0x5dc   : > { %6223 = vst [vmem:[#allocation39_spill] sm:$0xff] %v5354_v29  ;;  %vm6242_vm5 = vmmov %vm6233_vm0 }
 0x5de   : > { %v5259_v55 = vpop.permute.xlu1 %2193 }
 0x5e2   : > { %v5279_v61 = vpop.permute.xlu1 %2313 }
 0x5e6   : > { %v5288_v15 = vpop.permute.xlu1 %2317 }
 0x5ea   : > { %v5299_v23 = vpop.permute.xlu1 %2365 }
 0x5ee   : > { %v5308_v42 = vpop.permute.xlu1 %1995 }
 0x5f2   : > { %v5320_v6 = vpop.permute.xlu1 %2044 }
 0x5f6   : > { %v5327_v9 = vpop.permute.xlu1 %2048 }
 0x5f7   : > { %6221 = vst [vmem:[#allocation22_spill] sm:$0xff] %v5327_v9 }
 0x5fa   : > { %v5336_v52 = vpop.permute.xlu1 %2253 }
 0x5fe   : > { %v5346_v28 = vpop.permute.xlu1 %2417 }
 0x6a0   : > { %v1890_v11 = vpop.f32.mrb[2].mxu1 }
 0x6a1   : > { %v5224_v20 = vadd.f32 %v1890_v11, %v1795_v56  ;;  %v1892_v44 = vpop.f32.mrb[3].mxu1 }
 0x6a2   : > { %v5235_v27 = vadd.f32 %v1892_v44, %v1795_v56  ;;  %v5356_v56 = vpop.permute.xlu1 %2104 }
 0x6a3   : > { %2336 = vrot.lane.b32.xlu1 %v5224_v20, %s6085_s26  ;;  %2011 = vrot.lane.b32.xlu0 %v5224_v20, %s6082_s19  ;;  %v1930_v3 = vmul.f32 %v5238_v60, %v5224_v20  ;;  %v1951_v1 = vmul.f32 %v5252_v51, %v5224_v20  ;;  %6224 = vst [vmem:[#allocation69_spill] sm:$0xff] %v5356_v56 }
 0x6a4   : > { %v1896_v46 = vpop.f32.mrb[4].mxu1  ;;  %v1931_v54 = vmul.f32 %v5257_v31, %v5235_v27  ;;  %v1952_v59 = vmul.f32 %v5286_v58, %v5235_v27  ;;  %v2208_v26 = vmul.f32 %v5259_v55, %v5224_v20 }
 0x6a5   : > { %v1898_v16 = vpop.f32.mrb[5].mxu1  ;;  %v5292_v37 = vadd.f32 %v1896_v46, %v1800_v2 }
 0x6a6   : > { %v5301_v8 = vadd.f32 %v1898_v16, %v1800_v2  ;;  %v5361_v2 = vpop.permute.xlu0 %2361 }
 0x6a7   : > { %2344 = vrot.lane.b32.xlu1 %v5235_v27, %s6085_s26  ;;  %2019 = vrot.lane.b32.xlu0 %v5235_v27, %s6082_s19  ;;  %v1932_v4 = vmul.f32 %v5238_v60, %v5292_v37  ;;  %v1953_v30 = vmul.f32 %v5252_v51, %v5292_v37 }
 0x6a8   : > { %v1902_v36 = vpop.f32.mrb[6].mxu1  ;;  %v1933_v5 = vmul.f32 %v5257_v31, %v5301_v8  ;;  %v1954_v7 = vmul.f32 %v5286_v58, %v5301_v8 }
 0x6a9   : > { %v5247_v41 = vadd.f32 %v1902_v36, %v1805_v14  ;;  %v1904_v47 = vpop.f32.mrb[7].mxu1 }
 0x6aa   : > { %v5254_v19 = vadd.f32 %v1904_v47, %v1805_v14  ;;  %v5363_v14 = vpop.permute.xlu1 %2177  ;;  %v5373_v44 = vpop.permute.xlu0 %2373 }
 0x6ab   : > { %2144 = vrot.lane.b32.xlu0 %v1930_v3, %s6213_s27  ;;  %1959 = vrot.lane.b32.xlu1 %v1930_v3, %s6214_s30  ;;  %v5265_v39 = vmul.f32 %v5238_v60, %v5247_v41  ;;  %6225 = vst [vmem:[#allocation26_spill] sm:$0xff] %v5363_v14  ;;  %v1955_v11 = vmul.f32 %v5252_v51, %v5247_v41  ;;  %6226 = vst [vmem:[#allocation28_spill] sm:$0xff] %v5373_v44 }
 0x6ac   : > { %v5267_v0 = vpop.f32.mrb[8].mxu1  ;;  %v5271_v33 = vmul.f32 %v5257_v31, %v5254_v19  ;;  %v1956_v12 = vmul.f32 %v5286_v58, %v5254_v19 }
 0x6ad   : > { %v5273_v22 = vpop.f32.mrb[9].mxu1 }
 0x6ae   : > { %v5375_v62 = vpop.permute.xlu1 %2201  ;;  %v5380_v46 = vpop.permute.xlu0 %2249 }
 0x6af   : > { %2224 = vrot.lane.b32.xlu0 %v1951_v1, %s6215_s24  ;;  %2067 = vrot.lane.b32.xlu1 %v1951_v1, %s6216_s22 }
 0x6b2   : > { %v5382_v16 = vpop.permute.xlu1 %2205  ;;  %v5394_v47 = vpop.permute.xlu0 %2257 }
 0x6b3   : > { %2392 = vrot.lane.b32.xlu0 %v1951_v1, %s6217_s14  ;;  %2288 = vrot.lane.b32.xlu1 %v1930_v3, %s6218_s2  ;;  %6228 = vst [vmem:[#allocation43_spill] sm:$0xff] %v5394_v47  ;;  %v5400_v3 = vadd.f32 %v5267_v0, %v5212_v35 }
 0x6b6   : > { %v5392_v36 = vpop.permute.xlu1 %2325  ;;  %v5404_v1 = vpop.permute.xlu0 %2421 }
 0x6b7   : > { %1967 = vrot.lane.b32.xlu0 %v1931_v54, %s6214_s30  ;;  %2296 = vrot.lane.b32.xlu1 %v1931_v54, %s6218_s2  ;;  %6227 = vst [vmem:[#allocation30_spill] sm:$0xff] %v5392_v36 }
 0x6ba   : > { %v5416_v0 = vpop.permute.xlu0 %2429 }
 0x6bb   : > { %2075 = vrot.lane.b32.xlu0 %v1952_v59, %s6216_s22  ;;  %2013 = vrot.lane.b32.xlu1 %v5292_v37, %s6082_s19  ;;  %6231 = vst [vmem:[#allocation76_spill] sm:$0xff] %v5416_v0 }
 0x6bf   : > { %2152 = vrot.lane.b32.xlu0 %v1931_v54, %s6213_s27  ;;  %2021 = vrot.lane.b32.xlu1 %v5301_v8, %s6082_s19 }
 0x6c3   : > { %2232 = vrot.lane.b32.xlu0 %v1952_v59, %s6215_s24  ;;  %1961 = vrot.lane.b32.xlu1 %v1932_v4, %s6214_s30 }
 0x6c7   : > { %2400 = vrot.lane.b32.xlu0 %v1952_v59, %s6217_s14  ;;  %2069 = vrot.lane.b32.xlu1 %v1953_v30, %s6216_s22  ;;  %v5420_v59 = vadd.f32 %v5273_v22, %v5212_v35 }
 0x6c9   : > { %v1958_v35 = vmul.f32 %v5286_v58, %v5420_v59 }
 0x6cb   : > { %2338 = vrot.lane.b32.xlu0 %v5292_v37, %s6085_s26  ;;  %2146 = vrot.lane.b32.xlu1 %v1932_v4, %s6213_s27 }
 0x6cf   : > { %2346 = vrot.lane.b32.xlu0 %v5301_v8, %s6085_s26  ;;  %2226 = vrot.lane.b32.xlu1 %v1953_v30, %s6215_s24 }
 0x6d3   : > { %2290 = vrot.lane.b32.xlu0 %v1932_v4, %s6218_s2  ;;  %2394 = vrot.lane.b32.xlu1 %v1953_v30, %s6217_s14  ;;  %v1957_v4 = vmul.f32 %v5252_v51, %v5400_v3  ;;  %v5429_v30 = vpop.permute.xlu0 %2040  ;;  %v1936_v51 = vmul.f32 %v5238_v60, %v5400_v3 }
 0x6d7   : > { %2298 = vrot.lane.b32.xlu0 %v1933_v5, %s6218_s2  ;;  %1969 = vrot.lane.b32.xlu1 %v1933_v5, %s6214_s30 }
 0x6db   : > { %2015 = vrot.lane.b32.xlu0 %v5247_v41, %s6082_s19  ;;  %2077 = vrot.lane.b32.xlu1 %v1954_v7, %s6216_s22 }
 0x6df   : > { %2340 = vrot.lane.b32.xlu0 %v5247_v41, %s6085_s26  ;;  %2154 = vrot.lane.b32.xlu1 %v1933_v5, %s6213_s27  ;;  %v5442_v5 = vpop.permute.xlu0 %2478 }
 0x6e3   : > { %2023 = vrot.lane.b32.xlu0 %v5254_v19, %s6082_s19  ;;  %2234 = vrot.lane.b32.xlu1 %v1954_v7, %s6215_s24 }
 0x6e7   : > { %2348 = vrot.lane.b32.xlu0 %v5254_v19, %s6085_s26  ;;  %2402 = vrot.lane.b32.xlu1 %v1954_v7, %s6217_s14 }
 0x6eb   : > { %2071 = vrot.lane.b32.xlu0 %v1955_v11, %s6216_s22  ;;  %1963 = vrot.lane.b32.xlu1 %v5265_v39, %s6214_s30 }
 0x6ef   : > { %2148 = vrot.lane.b32.xlu0 %v5265_v39, %s6213_s27  ;;  %2228 = vrot.lane.b32.xlu1 %v1955_v11, %s6215_s24 }
 0x6f3   : > { %2292 = vrot.lane.b32.xlu0 %v5265_v39, %s6218_s2  ;;  %2396 = vrot.lane.b32.xlu1 %v1955_v11, %s6217_s14  ;;  %v5402_v39 = vpop.permute.xlu1 %2369 }
 0x6f4   : > { %6229 = vst [vmem:[#allocation47_spill] sm:$0xff] %v5402_v39 }
 0x6f7   : > { %1971 = vrot.lane.b32.xlu0 %v5271_v33, %s6214_s30  ;;  %2236 = vrot.lane.b32.xlu1 %v1956_v12, %s6215_s24  ;;  %v5414_v54 = vpop.permute.xlu1 %2261 }
 0x6f8   : > { %6230 = vst [vmem:[#allocation45_spill] sm:$0xff] %v5414_v54 }
 0x6fb   : > { %2079 = vrot.lane.b32.xlu0 %v1956_v12, %s6216_s22  ;;  %2404 = vrot.lane.b32.xlu1 %v1956_v12, %s6217_s14 }
 0x6ff   : > { %2156 = vrot.lane.b32.xlu0 %v5271_v33, %s6213_s27  ;;  %2017 = vrot.lane.b32.xlu1 %v5400_v3, %s6082_s19 }
 0x703   : > { %2300 = vrot.lane.b32.xlu0 %v5271_v33, %s6218_s2  ;;  %2342 = vrot.lane.b32.xlu1 %v5400_v3, %s6085_s26  ;;  %v5427_v33 = vpop.permute.xlu1 %2425 }
 0x704   : > { %6232 = vst [vmem:[#allocation49_spill] sm:$0xff] %v5427_v33 }
 0x707   : > { %2230 = vrot.lane.b32.xlu0 %v1957_v4, %s6215_s24  ;;  %2025 = vrot.lane.b32.xlu1 %v5420_v59, %s6082_s19  ;;  %v5440_v22 = vpop.permute.xlu1 %2482 }
 0x70b   : > { %2398 = vrot.lane.b32.xlu0 %v1957_v4, %s6217_s14  ;;  %2350 = vrot.lane.b32.xlu1 %v5420_v59, %s6085_s26 }
 0x70f   : > { %2238 = vrot.lane.b32.xlu0 %v1958_v35, %s6215_s24  ;;  %1965 = vrot.lane.b32.xlu1 %v1936_v51, %s6214_s30 }
 0x713   : > { %2406 = vrot.lane.b32.xlu0 %v1958_v35, %s6217_s14  ;;  %2073 = vrot.lane.b32.xlu1 %v1957_v4, %s6216_s22  ;;  %v1937_v4 = vmul.f32 %v5257_v31, %v5420_v59  ;;  %v2720_v31 = vld [vmem:[%s5843_s9 + $0x36] sm:$0x3] }
 0x714   : > { %v5475_v29 = vrot.slane %v2720_v31, %v3553_v10 }
 0x715   : > { %v2337_v7 = vpop.permute.xlu1 %2336  ;;  %v2012_v11 = vpop.permute.xlu0 %2011 }
 0x717   : > { %2490 = vperm.xlu0 %2997, %v5141_v21   ;;  %2150 = vrot.lane.b32.xlu1 %v1936_v51, %s6213_s27 }
 0x719   : > { %v2345_v58 = vpop.permute.xlu1 %2344  ;;  %v2020_v60 = vpop.permute.xlu0 %2019 }
 0x71a   : > { %v2352_v12 = vsel %vm524_vm4, %v2337_v7, %v2345_v58  ;;  %v2031_v9 = vsel %vm366_vm3, %v2020_v60, %v2012_v11 }
 0x71b   : > { %2294 = vrot.lane.b32.xlu1 %v1936_v51, %s6218_s2  ;;  %3000 = vset.pattern.permute.xlu0 %v6208_v13 }
 0x71d   : > { %v1960_v49 = vpop.permute.xlu1 %1959  ;;  %v2145_v40 = vpop.permute.xlu0 %2144 }
 0x71f   : > { %1973 = vrot.lane.b32.xlu1 %v1937_v4, %s6214_s30 }
 0x721   : > { %v2068_v33 = vpop.permute.xlu1 %2067  ;;  %v2225_v21 = vpop.permute.xlu0 %2224 }
 0x723   : > { %2081 = vrot.lane.b32.xlu1 %v1958_v35, %s6216_s22 }
 0x725   : > { %v2289_v0 = vpop.permute.xlu1 %2288  ;;  %v2393_v36 = vpop.permute.xlu0 %2392 }
 0x727   : > { %2158 = vrot.lane.b32.xlu1 %v1937_v4, %s6213_s27 }
 0x729   : > { %v2297_v54 = vpop.permute.xlu1 %2296  ;;  %v1968_v44 = vpop.permute.xlu0 %1967 }
 0x72a   : > { %v1975_v35 = vsel %vm351_vm10, %v1960_v49, %v1968_v44  ;;  %v1979_v56 = vsel %vm351_vm10, %v1968_v44, %v1960_v49  ;;  %v2308_v47 = vsel %vm6236_vm11, %v2297_v54, %v2289_v0 }
 0x72b   : > { %2302 = vrot.lane.b32.xlu1 %v1937_v4, %s6218_s2  ;;  %v2027_v4 = vsel %vm366_vm3, %v2012_v11, %v2020_v60  ;;  %v2304_v60 = vsel %vm6235_vm7, %v2289_v0, %v2297_v54  ;;  %vm6247_vm7 = vmmov %vm6239_vm12 }
 0x72c   : > { %v2052_v39 = vmul.f32 %v5218_v50, %v2027_v4  ;;  %v2376_v4 = vmul.f32 %v5361_v2, %v2352_v12  ;;  %vm6248_vm11 = vmmov %vm6247_vm7 }
 0x72d   : > { %v5458_v51 = vpop.permute.xlu1 %2013  ;;  %v2076_v34 = vpop.permute.xlu0 %2075 }
 0x72e   : > { %v2083_v49 = vsel %vm381_vm13, %v2068_v33, %v2076_v34  ;;  %v2087_v20 = vsel %vm381_vm13, %v2076_v34, %v2068_v33  ;;  %v2356_v34 = vsel %vm524_vm4, %v2345_v58, %v2337_v7  ;;  %v2051_v33 = vmul.f32 %v5218_v50, %v2031_v9  ;;  %v2721_v9 = vld [vmem:[%s5843_s9 + $0x3a] sm:$0x3] }
 0x72f   : > { %2486 = vperm.xlu1 %2998, %v5135_v53   ;;  %v2209_v53 = vmul.f32 %v5259_v55, %v5235_v27  ;;  %v2003_v27 = vmul.f32 %v5214_v43, %v1979_v56  ;;  %v2004_v55 = vmul.f32 %v5214_v43, %v1975_v35  ;;  %v2108_v56 = vmul.f32 %v5220_v17, %v2083_v49 }
 0x730   : > { %v2328_v50 = vmul.f32 %v5279_v61, %v2304_v60  ;;  %v2329_v7 = vmul.f32 %v5279_v61, %v2308_v47  ;;  %v2377_v49 = vmul.f32 %v5361_v2, %v2356_v34  ;;  %v5525_v61 = vrot.slane %v2721_v9, %v3634_v57 }
 0x731   : > { %v5477_v14 = vpop.permute.xlu1 %2021  ;;  %v2153_v18 = vpop.permute.xlu0 %2152  ;;  %v2059_v58 = vadd.f32 %v2051_v33, %v2003_v27 }
 0x732   : > { %v2160_v44 = vsel %vm6233_vm0, %v2145_v40, %v2153_v18  ;;  %v2164_v11 = vsel %vm6234_vm6, %v2153_v18, %v2145_v40  ;;  %v5501_v40 = vrot.slane %v2720_v31, %v3634_v57  ;;  %v2107_v18 = vmul.f32 %v5220_v17, %v2087_v20  ;;  %vm6245_vm0 = vmmov %vm6238_vm8 }
 0x733   : > { %2999 = vset.pattern.permute.xlu1 %v6208_v13  ;;  %v2184_v43 = vmul.f32 %v5334_v32, %v2164_v11  ;;  %v2185_v13 = vmul.f32 %v5334_v32, %v2160_v44  ;;  %v2060_v31 = vadd.f32 %v2052_v39, %v2004_v55  ;;  %v5522_v20 = vrot.slane %v2721_v9, %v3553_v10  ;;  %vm6246_vm6 = vmmov %vm6245_vm0 }
 0x734   : > { %2652 = vperm.xlu1 %2999, %v5112_v63   ;;  %v2115_v47 = vadd.f32 %v2107_v18, %v2059_v58  ;;  %v2384_v27 = vadd.f32 %v2376_v4, %v2328_v50  ;;  %v2385_v55 = vadd.f32 %v2377_v49, %v2329_v7 }
 0x735   : > { %v1962_v54 = vpop.permute.xlu1 %1961  ;;  %v2233_v0 = vpop.permute.xlu0 %2232  ;;  %v2116_v44 = vadd.f32 %v2108_v56, %v2060_v31  ;;  %v2216_v11 = vadd.f32 %v2208_v26, %v2184_v43 }
 0x736   : > { %v2240_v63 = vsel %vm6237_vm14, %v2225_v21, %v2233_v0  ;;  %v2244_v17 = vsel %vm6238_vm8, %v2233_v0, %v2225_v21  ;;  %v2217_v21 = vadd.f32 %v2209_v53, %v2185_v13  ;;  %v2136_v33 = vmul.f32 %v5475_v29, %v2115_v47  ;;  %vm6249_vm14 = vmmov %vm6245_vm0 }
 0x737   : > { %v2264_v32 = vmul.f32 %v5380_v46, %v2240_v63  ;;  %v2265_v35 = vmul.f32 %v5380_v46, %v2244_v17  ;;  %v2137_v26 = vmul.f32 %v5501_v40, %v2116_v44  ;;  %vm6250_vm8 = vmmov %vm6245_vm0 }
 0x739   : > { %v2070_v60 = vpop.permute.xlu1 %2069  ;;  %v2401_v39 = vpop.permute.xlu0 %2400  ;;  %v2272_v12 = vadd.f32 %v2264_v32, %v2216_v11  ;;  %v2273_v10 = vadd.f32 %v2265_v35, %v2217_v21  ;;  %v2210_v21 = vmul.f32 %v5310_v24, %v5292_v37 }
 0x73a   : > { %v2408_v46 = vsel %vm6239_vm12, %v2393_v36, %v2401_v39  ;;  %v2412_v2 = vsel %vm6240_vm15, %v2401_v39, %v2393_v36  ;;  %v2028_v39 = vsel %vm366_vm3, %v5458_v51, %v5477_v14  ;;  %vm6253_vm12 = vmmov %vm6241_vm2 }
 0x73b   : > { %v2432_v34 = vmul.f32 %v5346_v28, %v2408_v46  ;;  %v2433_v57 = vmul.f32 %v5346_v28, %v2412_v2  ;;  %v2280_v13 = vadd.f32 %v2272_v12, %v2136_v33  ;;  %v2281_v0 = vadd.f32 %v2273_v10, %v2137_v26  ;;  %vm6254_vm15 = vmmov %vm6241_vm2 }
 0x73d   : > { %v2440_v53 = vadd.f32 %v2432_v34, %v2384_v27  ;;  %v2441_v18 = vadd.f32 %v2433_v57, %v2385_v55  ;;  %v2147_v56 = vpop.permute.xlu1 %2146  ;;  %v2339_v43 = vpop.permute.xlu0 %2338  ;;  %v2032_v27 = vsel %vm366_vm3, %v5477_v14, %v5458_v51 }
 0x73e   : > { %v2053_v10 = vmul.f32 %v5429_v30, %v2032_v27 }
 0x73f   : > { %v2461_v9 = vmul.f32 %v5522_v20, %v2440_v53  ;;  %v2462_v36 = vmul.f32 %v5525_v61, %v2441_v18 }
 0x741   : > { %v2469_v50 = vadd.f32 %v2461_v9, %v2280_v13  ;;  %v2470_v7 = vadd.f32 %v2462_v36, %v2281_v0  ;;  %v2227_v63 = vpop.permute.xlu1 %2226  ;;  %v2347_v17 = vpop.permute.xlu0 %2346 }
 0x742   : > { %v2353_v34 = vsel %vm524_vm4, %v2339_v43, %v2347_v17  ;;  %v2357_v57 = vsel %vm524_vm4, %v2347_v17, %v2339_v43 }
 0x743   : > { %v5538_v28 = vadd.f32 %v5442_v5, %v2469_v50  ;;  %v5541_v58 = vadd.f32 %v5442_v5, %v2470_v7  ;;  %v2211_v5 = vmul.f32 %v5310_v24, %v5301_v8  ;;  %v2379_v7 = vmul.f32 %v5299_v23, %v2357_v57 }
 0x745   : > { %v2395_v31 = vpop.permute.xlu1 %2394  ;;  %v2291_v32 = vpop.permute.xlu0 %2290  ;;  %v2502_v17 = vmul.f32 %v5541_v58, %v5541_v58 }
 0x749   : > { %v1970_v35 = vpop.permute.xlu1 %1969  ;;  %v2299_v4 = vpop.permute.xlu0 %2298 }
 0x74a   : > { %v1976_v44 = vsel %vm351_vm10, %v1962_v54, %v1970_v35  ;;  %v1980_v11 = vsel %vm351_vm10, %v1970_v35, %v1962_v54  ;;  %v2305_v14 = vsel %vm6243_vm9, %v2291_v32, %v2299_v4  ;;  %v2309_v51 = vsel %vm6244_vm1, %v2299_v4, %v2291_v32  ;;  %vm6257_vm9 = vmmov %vm6247_vm7 }
 0x74b   : > { %v2005_v2 = vmul.f32 %v5216_v48, %v1980_v11  ;;  %v2006_v12 = vmul.f32 %v5216_v48, %v1976_v44  ;;  %v2330_v13 = vmul.f32 %v5288_v15, %v2305_v14 }
 0x74d   : > { %v2078_v49 = vpop.permute.xlu1 %2077  ;;  %v5543_v47 = vpop.permute.xlu0 %2015  ;;  %v2061_v9 = vadd.f32 %v2053_v10, %v2005_v2 }
 0x74e   : > { %v2084_v54 = vsel %vm381_vm13, %v2070_v60, %v2078_v49  ;;  %v2088_v37 = vsel %vm381_vm13, %v2078_v49, %v2070_v60  ;;  %v2054_v60 = vmul.f32 %v5429_v30, %v2028_v39  ;;  %v2331_v30 = vmul.f32 %v5288_v15, %v2309_v51 }
 0x74f   : > { %v2109_v33 = vmul.f32 %v5222_v45, %v2088_v37  ;;  %v2110_v48 = vmul.f32 %v5222_v45, %v2084_v54 }
 0x750   : > { %v2062_v36 = vadd.f32 %v2054_v60, %v2006_v12  ;;  %v2387_v11 = vadd.f32 %v2379_v7, %v2331_v30 }
 0x751   : > { %v2155_v55 = vpop.permute.xlu1 %2154  ;;  %v5561_v46 = vpop.permute.xlu0 %2340  ;;  %v2117_v15 = vadd.f32 %v2109_v33, %v2061_v9 }
 0x752   : > { %v2161_v8 = vsel %vm6241_vm2, %v2147_v56, %v2155_v55  ;;  %v2165_v24 = vsel %vm6242_vm5, %v2155_v55, %v2147_v56  ;;  %v2118_v32 = vadd.f32 %v2110_v48, %v2062_v36  ;;  %vm6255_vm2 = vmmov %vm6244_vm1 }
 0x753   : > { %v2186_v26 = vmul.f32 %v5233_v38, %v2165_v24  ;;  %v2187_v53 = vmul.f32 %v5233_v38, %v2161_v8  ;;  %v2378_v38 = vmul.f32 %v5299_v23, %v2353_v34  ;;  %vm6256_vm5 = vmmov %vm6244_vm1 }
 0x754   : > { %v2139_v37 = vmul.f32 %v5501_v40, %v2118_v32  ;;  %vm6258_vm1 = vmmov %vm6247_vm7 }
 0x755   : > { %v2235_v18 = vpop.permute.xlu1 %2234  ;;  %v5587_v56 = vpop.permute.xlu0 %2023  ;;  %v2218_v35 = vadd.f32 %v2210_v21, %v2186_v26  ;;  %v2219_v4 = vadd.f32 %v2211_v5, %v2187_v53  ;;  %v2501_v21 = vmul.f32 %v5538_v28, %v5538_v28  ;;  %v2138_v5 = vmul.f32 %v5475_v29, %v2117_v15 }
 0x756   : > { %v2241_v0 = vsel %vm6245_vm0, %v2227_v63, %v2235_v18  ;;  %v2245_v43 = vsel %vm6246_vm6, %v2235_v18, %v2227_v63  ;;  %v2386_v63 = vadd.f32 %v2378_v38, %v2330_v13  ;;  %vm6272_vm6 = vmmov %vm6258_vm1 }
 0x757   : > { %v2266_v45 = vmul.f32 %v5336_v52, %v2241_v0  ;;  %v2267_v50 = vmul.f32 %v5336_v52, %v2245_v43  ;;  %v2509_v60 = vmul.f32 %v2501_v21, %v5538_v28 }
 0x759   : > { %v2403_v49 = vpop.permute.xlu1 %2402  ;;  %v5601_v44 = vpop.permute.xlu0 %2348  ;;  %v2274_v27 = vadd.f32 %v2266_v45, %v2218_v35  ;;  %v2275_v23 = vadd.f32 %v2267_v50, %v2219_v4  ;;  %v2517_v13 = vmul.f32 0.044715, %v2509_v60  ;;  %v2533_v60 = vmul.f32 0.5, %v5538_v28 }
 0x75a   : > { %v2409_v39 = vsel %vm6247_vm7, %v2395_v31, %v2403_v49  ;;  %v2413_v52 = vsel %vm6248_vm11, %v2403_v49, %v2395_v31  ;;  %v2510_v31 = vmul.f32 %v2502_v17, %v5541_v58  ;;  %vm6274_vm7 = vmmov %vm6255_vm2 }
 0x75b   : > { %v2434_v55 = vmul.f32 %v5404_v1, %v2409_v39  ;;  %v2435_v54 = vmul.f32 %v5404_v1, %v2413_v52  ;;  %v2282_v14 = vadd.f32 %v2274_v27, %v2138_v5  ;;  %v2283_v51 = vadd.f32 %v2275_v23, %v2139_v37  ;;  %vm6275_vm11 = vmmov %vm6255_vm2 }
 0x75c   : > { %v2518_v48 = vmul.f32 0.044715, %v2510_v31  ;;  %v2525_v50 = vadd.f32 %v2517_v13, %v5538_v28  ;;  %v2534_v31 = vmul.f32 0.5, %v5541_v58 }
 0x75d   : > { %v2442_v8 = vadd.f32 %v2434_v55, %v2386_v63  ;;  %v2443_v24 = vadd.f32 %v2435_v54, %v2387_v11  ;;  %v5613_v2 = vpop.permute.xlu1 %1963  ;;  %v5615_v12 = vpop.permute.xlu0 %2071 }
 0x75e   : > { %v2526_v9 = vadd.f32 %v2518_v48, %v5541_v58  ;;  %v2541_v4 = vmul.f32 0.7978846, %v2525_v50 }
 0x75f   : > { %v2463_v10 = vmul.f32 %v5522_v20, %v2442_v8  ;;  %v2464_v1 = vmul.f32 %v5525_v61, %v2443_v24 }
 0x760   : > { %v2542_v32 = vmul.f32 0.7978846, %v2526_v9 }
 0x761   : > { %v2471_v34 = vadd.f32 %v2463_v10, %v2282_v14  ;;  %v2472_v57 = vadd.f32 %v2464_v1, %v2283_v51  ;;  %v5621_v33 = vpop.permute.xlu1 %2228  ;;  %v5625_v18 = vpop.permute.xlu0 %2148 }
 0x762   : > { %3009 = vtanh.f32 %v2542_v32 }
 0x763   : > { %v2495_v26 = vadd.f32 %v5440_v22, %v2471_v34  ;;  %v2496_v53 = vadd.f32 %v5440_v22, %v2472_v57  ;;  %3011 = vtanh.f32 %v2541_v4  ;;  %v2354_v4 = vsel %vm524_vm4, %v5561_v46, %v5601_v44 }
 0x765   : > { %v2503_v30 = vmul.f32 %v2495_v26, %v2495_v26  ;;  %v5627_v0 = vpop.permute.xlu1 %2396  ;;  %v2504_v43 = vmul.f32 %v2496_v53, %v2496_v53  ;;  %v5631_v38 = vpop.permute.xlu0 %2292  ;;  %v2536_v14 = vmul.f32 0.5, %v2496_v53  ;;  %v2535_v48 = vmul.f32 0.5, %v2495_v26 }
 0x767   : > { %v2512_v36 = vmul.f32 %v2504_v43, %v2496_v53  ;;  %v2511_v45 = vmul.f32 %v2503_v30, %v2495_v26 }
 0x769   : > { %v2237_v7 = vpop.permute.xlu1 %2236  ;;  %v2520_v17 = vmul.f32 0.044715, %v2512_v36  ;;  %v2519_v15 = vmul.f32 0.044715, %v2511_v45  ;;  %v1972_v63 = vpop.permute.xlu0 %1971 }
 0x76a   : > { %v1981_v28 = vsel %vm351_vm10, %v1972_v63, %v5613_v2 }
 0x76b   : > { %v2528_v22 = vadd.f32 %v2520_v17, %v2496_v53  ;;  %v2527_v35 = vadd.f32 %v2519_v15, %v2495_v26  ;;  %v1977_v15 = vsel %vm351_vm10, %v5613_v2, %v1972_v63  ;;  %v2358_v2 = vsel %vm524_vm4, %v5601_v44, %v5561_v46 }
 0x76c   : > { %v3010_v55 = vpop.eup %3009  ;;  %v2242_v63 = vsel %vm6249_vm14, %v5621_v33, %v2237_v7  ;;  %v2214_v46 = vmul.f32 %v5382_v16, %v5400_v3  ;;  %v2215_v44 = vmul.f32 %v5382_v16, %v5420_v59  ;;  %vm2574_vm14 = vcmask 261120  }
 0x76d   : > { %v5633_v49 = vpop.permute.xlu1 %2404  ;;  %v2544_v11 = vmul.f32 0.7978846, %v2528_v22  ;;  %v2543_v39 = vmul.f32 0.7978846, %v2527_v35  ;;  %v2080_v27 = vpop.permute.xlu0 %2079  ;;  %v2558_v37 = vadd.f32 1.0, %v3010_v55  ;;  %v2029_v22 = vsel %vm366_vm3, %v5543_v47, %v5587_v56 }
 0x76e   : > { %v3012_v21 = vpop.eup %3011  ;;  %v2033_v35 = vsel %vm366_vm3, %v5587_v56, %v5543_v47  ;;  %v2007_v47 = vmul.f32 %v5308_v42, %v1981_v28  ;;  %v2008_v56 = vmul.f32 %v5308_v42, %v1977_v15  ;;  %v5685_v55 = vmul.f32 %v5375_v62, %v5254_v19  ;;  %v6251_v42 = vld [vmem:[#allocation47_spill] sm:$0xff] }
 0x76f   : > { %3013 = vtanh.f32 %v2544_v11  ;;  %v2557_v10 = vadd.f32 1.0, %v3012_v21  ;;  %v2566_v34 = vmul.f32 %v2558_v37, %v2534_v31  ;;  %v2246_v11 = vsel %vm6250_vm8, %v2237_v7, %v5621_v33 }
 0x770   : > { %3015 = vtanh.f32 %v2543_v39  ;;  %v5681_v39 = vmul.f32 %v5375_v62, %v5247_v41  ;;  %v2055_v33 = vmul.f32 %v5320_v6, %v2033_v35  ;;  %v2056_v7 = vmul.f32 %v5320_v6, %v2029_v22 }
 0x771   : > { %v5635_v52 = vpop.permute.xlu1 %2017  ;;  %v2157_v5 = vpop.permute.xlu0 %2156  ;;  %v2565_v36 = vmul.f32 %v2557_v10, %v2533_v60  ;;  %v2380_v37 = vmul.f32 %v6251_v42, %v2354_v4  ;;  %v2381_v41 = vmul.f32 %v6251_v42, %v2358_v2  ;;  %v2085_v16 = vsel %vm381_vm13, %v5615_v12, %v2080_v27  ;;  %v6259_v60 = vld [vmem:[#allocation20_spill] sm:$0xff]  ;;  %v6263_v4 = vld [vmem:[#allocation34_spill] sm:$0xff] }
 0x772   : > { %v5701_v62 = vadd.f32 %v2055_v33, %v2007_v47  ;;  %v5703_v3 = vadd.f32 %v2056_v7, %v2008_v56  ;;  %v2089_v6 = vsel %vm381_vm13, %v2080_v27, %v5615_v12  ;;  %v2410_v12 = vsel %vm6257_vm9, %v5627_v0, %v5633_v49  ;;  %v6268_v7 = vld [vmem:[#allocation69_spill] sm:$0xff] }
 0x773   : > { %v2414_v27 = vsel %vm6258_vm1, %v5633_v49, %v5627_v0  ;;  %v6260_v49 = vld [vmem:[#allocation26_spill] sm:$0xff] }
 0x775   : > { %v5637_v23 = vpop.permute.xlu1 %2342  ;;  %v2301_v30 = vpop.permute.xlu0 %2300 }
 0x776   : > { %v2306_v10 = vsel %vm6255_vm2, %v5631_v38, %v2301_v30 }
 0x779   : > { %v5639_v54 = vpop.permute.xlu1 %2025  ;;  %v3014_v8 = vpop.eup %3013 }
 0x77a   : > { %v2560_v51 = vadd.f32 1.0, %v3014_v8  ;;  %v3016_v1 = vpop.eup %3015  ;;  %v2231_v58 = vpop.permute.xlu0 %2230  ;;  %v6252_v8 = vld [vmem:[#allocation43_spill] sm:$0xff] }
 0x77b   : > { %v2559_v13 = vadd.f32 1.0, %v3016_v1  ;;  %v5696_v31 = vmul.f32 %v6252_v8, %v2242_v63  ;;  %v5699_v19 = vmul.f32 %v6252_v8, %v2246_v11  ;;  %v2310_v1 = vsel %vm6256_vm5, %v2301_v30, %v5631_v38 }
 0x77c   : > { %v2568_v57 = vmul.f32 %v2560_v51, %v2536_v14  ;;  %v2162_v14 = vsel %vm6253_vm12, %v5625_v18, %v2157_v5  ;;  %v2166_v51 = vsel %vm6254_vm15, %v2157_v5, %v5625_v18  ;;  %v2030_v18 = vsel %vm366_vm3, %v5635_v52, %v5639_v54 }
 0x77d   : > { %v5641_v24 = vpop.permute.xlu1 %2350  ;;  %v2567_v45 = vmul.f32 %v2559_v13, %v2535_v48  ;;  %v2034_v38 = vsel %vm366_vm3, %v5639_v54, %v5635_v52  ;;  %v2188_v13 = vmul.f32 %v6260_v49, %v2166_v51  ;;  %v2189_v30 = vmul.f32 %v6260_v49, %v2162_v14  ;;  %v6262_v52 = vld [vmem:[#allocation22_spill] sm:$0xff]  ;;  %vm6264_vm3 = vmmov %vm6245_vm0 }
 0x77e   : > { %v2726_v43 = vpack.c.bf16 %v2568_v57, %v2566_v34  ;;  %v5651_v26 = vpop.permute.xlu0 %2398  ;;  %v2111_v34 = vmul.f32 %v6259_v60, %v2089_v6  ;;  %v2112_v57 = vmul.f32 %v6259_v60, %v2085_v16  ;;  %v2057_v54 = vmul.f32 %v6262_v52, %v2034_v38  ;;  %v6270_v16 = vld [vmem:[#allocation28_spill] sm:$0xff]  ;;  %v6273_v38 = vld [vmem:[#allocation45_spill] sm:$0xff] }
 0x77f   : > { %v2728_v50 = vpack.c.bf16 %v2567_v45, %v2565_v36  ;;  %v2359_v22 = vsel %vm524_vm4, %v5641_v24, %v5637_v23 }
 0x780   : > { %2727 = vmatprep.subr.bf16.mxu0 %v2726_v43  ;;  %v6261_v43 = vld [vmem:[#allocation39_spill] sm:$0xff]  ;;  %v2383_v14 = vmul.f32 %v6270_v16, %v2359_v22 }
 0x781   : > { %v1966_v9 = vpop.permute.xlu1 %1965  ;;  %2729 = vmatpush1.bf16.msra.mxu0 %v2728_v50  ;;  %v2332_v36 = vmul.f32 %v6261_v43, %v2306_v10  ;;  %v2333_v45 = vmul.f32 %v6261_v43, %v2310_v1  ;;  %v2058_v50 = vmul.f32 %v6262_v52, %v2030_v18 }
 0x782   : > { %v2239_v59 = vpop.permute.xlu0 %2238 }
 0x783   : > { %v2243_v47 = vsel %vm6264_vm3, %v2231_v58, %v2239_v59 }
 0x785   : > { %v2074_v17 = vpop.permute.xlu1 %2073 }
 0x786   : > { %v2407_v35 = vpop.permute.xlu0 %2406 }
 0x789   : > { %v2151_v53 = vpop.permute.xlu1 %2150 }
 0x78d   : > { %v5653_v32 = vpop.permute.xlu1 %2294 }
 0x791   : > { %v1974_v21 = vpop.permute.xlu1 %1973 }
 0x792   : > { %v1978_v48 = vsel %vm351_vm10, %v1966_v9, %v1974_v21  ;;  %v1982_v0 = vsel %vm351_vm10, %v1974_v21, %v1966_v9  ;;  %v2355_v9 = vsel %vm524_vm4, %v5637_v23, %v5641_v24  ;;  %vm6265_vm10 = vmmov %vm6245_vm0  ;;  %v6269_v21 = vld [vmem:[#allocation31_spill] sm:$0xff] }
 0x793   : > { %v2009_v2 = vmul.f32 %v6263_v4, %v1982_v0  ;;  %v2010_v63 = vmul.f32 %v6263_v4, %v1978_v48  ;;  %vm6267_vm0 = vmmov %vm6253_vm12  ;;  %v2382_v6 = vmul.f32 %v6270_v16, %v2355_v9 }
 0x794   : > { %vm6271_vm4 = vmmov %vm6258_vm1 }
 0x795   : > { %v2082_v5 = vpop.permute.xlu1 %2081  ;;  %v2066_v51 = vadd.f32 %v2058_v50, %v2010_v63  ;;  %v6277_v50 = vld [vmem:[#allocation76_spill] sm:$0xff] }
 0x796   : > { %v2086_v15 = vsel %vm381_vm13, %v2074_v17, %v2082_v5  ;;  %v2090_v28 = vsel %vm381_vm13, %v2082_v5, %v2074_v17  ;;  %v2247_v17 = vsel %vm6265_vm10, %v2239_v59, %v2231_v58  ;;  %vm6266_vm13 = vmmov %vm6253_vm12  ;;  %v2411_v58 = vsel %vm6271_vm4, %v5651_v26, %v2407_v35 }
 0x797   : > { %v2113_v23 = vmul.f32 %v6268_v7, %v2090_v28  ;;  %v2114_v24 = vmul.f32 %v6268_v7, %v2086_v15  ;;  %v2065_v59 = vadd.f32 %v2057_v54, %v2009_v2  ;;  %v2270_v5 = vmul.f32 %v6273_v38, %v2243_v47  ;;  %v6278_v2 = vld [vmem:[#allocation49_spill] sm:$0xff] }
 0x798   : > { %v2271_v60 = vmul.f32 %v6273_v38, %v2247_v17  ;;  %v2389_v54 = vadd.f32 %v2381_v41, %v2333_v45  ;;  %v2438_v15 = vmul.f32 %v6277_v50, %v2411_v58  ;;  %v2436_v63 = vmul.f32 %v6278_v2, %v2410_v12 }
 0x799   : > { %v2159_v11 = vpop.permute.xlu1 %2158  ;;  %v2121_v49 = vadd.f32 %v2113_v23, %v2065_v59  ;;  %v2122_v43 = vadd.f32 %v2114_v24, %v2066_v51  ;;  %v2437_v25 = vmul.f32 %v6278_v2, %v2414_v27  ;;  %v2119_v45 = vadd.f32 %v2111_v34, %v5701_v62  ;;  %v2491_v34 = vpop.permute.xlu0 %2490 }
 0x79a   : > { %v2163_v56 = vsel %vm6266_vm13, %v2151_v53, %v2159_v11  ;;  %v2167_v33 = vsel %vm6267_vm0, %v2159_v11, %v2151_v53  ;;  %v2415_v53 = vsel %vm6272_vm6, %v2407_v35, %v5651_v26  ;;  %v6276_v26 = vld [vmem:[#allocation30_spill] sm:$0xff]  ;;  %v2221_v11 = vadd.f32 %v5685_v55, %v2189_v30 }
 0x79b   : > { %v2190_v42 = vmul.f32 %v6269_v21, %v2167_v33  ;;  %v2191_v8 = vmul.f32 %v6269_v21, %v2163_v56  ;;  %v2439_v28 = vmul.f32 %v6277_v50, %v2415_v53  ;;  %v2142_v47 = vmul.f32 %v5475_v29, %v2121_v49 }
 0x79c   : > { %v2120_v17 = vadd.f32 %v2112_v57, %v5703_v3  ;;  %v2445_v33 = vadd.f32 %v2437_v25, %v2389_v54  ;;  %v2140_v24 = vmul.f32 %v5475_v29, %v2119_v45  ;;  %v2573_v45 = vld [vmem:[#allocation5] sm:$0xff] }
 0x79d   : > { %v2222_v10 = vadd.f32 %v2214_v46, %v2190_v42  ;;  %v2223_v1 = vadd.f32 %v2215_v44, %v2191_v8  ;;  %v2303_v18 = vpop.permute.xlu1 %2302  ;;  %v2388_v44 = vadd.f32 %v2380_v37, %v2332_v36  ;;  %v2143_v37 = vmul.f32 %v5501_v40, %v2122_v43 }
 0x79e   : > { %v2307_v48 = vsel %vm6274_vm7, %v5653_v32, %v2303_v18  ;;  %v2311_v0 = vsel %vm6275_vm11, %v2303_v18, %v5653_v32  ;;  %v2220_v32 = vadd.f32 %v5681_v39, %v2188_v13  ;;  %v2277_v13 = vadd.f32 %v5699_v19, %v2221_v11 }
 0x79f   : > { %v2334_v52 = vmul.f32 %v6276_v26, %v2307_v48  ;;  %v2335_v46 = vmul.f32 %v6276_v26, %v2311_v0  ;;  %v2278_v9 = vadd.f32 %v2270_v5, %v2222_v10  ;;  %v2279_v22 = vadd.f32 %v2271_v60, %v2223_v1 }
 0x7a0   : > { %v2444_v56 = vadd.f32 %v2436_v63, %v2388_v44  ;;  %v2276_v55 = vadd.f32 %v5696_v31, %v2220_v32  ;;  %v2141_v62 = vmul.f32 %v5501_v40, %v2120_v17  ;;  %v2466_v42 = vmul.f32 %v5525_v61, %v2445_v33  ;;  %v6279_v33 = vld [vmem:[#allocation29_spill] sm:$0xff] }
 0x7a1   : > { %v2390_v35 = vadd.f32 %v2382_v6, %v2334_v52  ;;  %v2391_v4 = vadd.f32 %v2383_v14, %v2335_v46  ;;  %v2286_v7 = vadd.f32 %v2278_v9, %v2142_v47  ;;  %v2287_v12 = vadd.f32 %v2279_v22, %v2143_v37 }
 0x7a2   : > { %v2465_v21 = vmul.f32 %v5522_v20, %v2444_v56  ;;  %v2284_v8 = vadd.f32 %v2276_v55, %v2140_v24  ;;  %v2285_v16 = vadd.f32 %v2277_v13, %v2141_v62  ;;  %v3030_v24 = vld [vmem:[%s3412_s21 + $0x8] sm:$0xff] }
 0x7a3   : > { %v2446_v41 = vadd.f32 %v2438_v15, %v2390_v35  ;;  %v2447_v36 = vadd.f32 %v2439_v28, %v2391_v4 }
 0x7a4   : > { %v2473_v31 = vadd.f32 %v2465_v21, %v2284_v8  ;;  %v2474_v58 = vadd.f32 %v2466_v42, %v2285_v16 }
 0x7a5   : > { %v2467_v27 = vmul.f32 %v5522_v20, %v2446_v41  ;;  %v2468_v39 = vmul.f32 %v5525_v61, %v2447_v36 }
 0x7a7   : > { %v2475_v30 = vadd.f32 %v2467_v27, %v2286_v7  ;;  %v2476_v23 = vadd.f32 %v2468_v39, %v2287_v12  ;;  %v6280_v27 = vld [vmem:[#allocation27_spill] sm:$0xff] }
 0x7a9   : > { %v2499_v3 = vadd.f32 %v2491_v34, %v2475_v30  ;;  %v2500_v57 = vadd.f32 %v2491_v34, %v2476_v23  ;;  %v3029_v30 = vld [vmem:[%s3412_s21] sm:$0xff] }
 0x7ab   : > { %v2508_v6 = vmul.f32 %v2500_v57, %v2500_v57  ;;  %v2507_v14 = vmul.f32 %v2499_v3, %v2499_v3  ;;  %v2539_v35 = vmul.f32 0.5, %v2499_v3  ;;  %v2540_v63 = vmul.f32 0.5, %v2500_v57 }
 0x7ad   : > { %v2516_v19 = vmul.f32 %v2508_v6, %v2500_v57  ;;  %v2515_v53 = vmul.f32 %v2507_v14, %v2499_v3 }
 0x7ae   : > { %v2487_v59 = vpop.permute.xlu1 %2486 }
 0x7af   : > { %v2497_v51 = vadd.f32 %v2487_v59, %v2473_v31  ;;  %v2498_v29 = vadd.f32 %v2487_v59, %v2474_v58  ;;  %v2524_v10 = vmul.f32 0.044715, %v2516_v19  ;;  %v2523_v40 = vmul.f32 0.044715, %v2515_v53 }
 0x7b1   : > { %v2505_v1 = vmul.f32 %v2497_v51, %v2497_v51  ;;  %v2506_v18 = vmul.f32 %v2498_v29, %v2498_v29  ;;  %v2532_v38 = vadd.f32 %v2524_v10, %v2500_v57  ;;  %v2531_v5 = vadd.f32 %v2523_v40, %v2499_v3 }
 0x7b2   : > { %v2537_v22 = vmul.f32 0.5, %v2497_v51  ;;  %v2538_v2 = vmul.f32 0.5, %v2498_v29 }
 0x7b3   : > { %v2513_v20 = vmul.f32 %v2505_v1, %v2497_v51  ;;  %v2514_v60 = vmul.f32 %v2506_v18, %v2498_v29  ;;  %v2548_v61 = vmul.f32 0.7978846, %v2532_v38  ;;  %v2547_v48 = vmul.f32 0.7978846, %v2531_v5  ;;  %v2653_v56 = vpop.permute.xlu1 %2652 }
 0x7b5   : > { %v2521_v0 = vmul.f32 0.044715, %v2513_v20  ;;  %v2522_v49 = vmul.f32 0.044715, %v2514_v60  ;;  %3017 = vtanh.f32 %v2547_v48 }
 0x7b6   : > { %3019 = vtanh.f32 %v2548_v61 }
 0x7b7   : > { %v2529_v43 = vadd.f32 %v2521_v0, %v2497_v51  ;;  %v2530_v26 = vadd.f32 %v2522_v49, %v2498_v29 }
 0x7b9   : > { %v2545_v52 = vmul.f32 0.7978846, %v2529_v43  ;;  %v2546_v46 = vmul.f32 0.7978846, %v2530_v26 }
 0x7bb   : > { %3021 = vtanh.f32 %v2545_v52 }
 0x7bc   : > { %3023 = vtanh.f32 %v2546_v46 }
 0x7bf   : > { %v3018_v44 = vpop.eup %3017 }
 0x7c0   : > { %v3020_v54 = vpop.eup %3019  ;;  %v2563_v50 = vadd.f32 1.0, %v3018_v44 }
 0x7c1   : > { %v2564_v28 = vadd.f32 1.0, %v3020_v54 }
 0x7c2   : > { %v2571_v11 = vmul.f32 %v2563_v50, %v2539_v35 }
 0x7c3   : > { %v2572_v37 = vmul.f32 %v2564_v28, %v2540_v63 }
 0x7c5   : > { %v3022_v15 = vpop.eup %3021 }
 0x7c6   : > { %v3024_v9 = vpop.eup %3023  ;;  %v2561_v4 = vadd.f32 1.0, %v3022_v15 }
 0x7c7   : > { %v2562_v25 = vadd.f32 1.0, %v3024_v9 }
 0x7c8   : > { %v2569_v32 = vmul.f32 %v2561_v4, %v2537_v22 }
 0x7c9   : > { %v2570_v47 = vmul.f32 %v2562_v25, %v2538_v2 }
 0x7ca   : > { %v2732_v41 = vpack.c.bf16 %v2571_v11, %v2569_v32 }
 0x7cb   : > { %v2730_v36 = vpack.c.bf16 %v2572_v37, %v2570_v47 }
 0x7cd   : > { %2731 = vmatprep.subr.bf16.mxu0 %v2730_v36 }
 0x7ce   : > { %2733 = vmatpush1.bf16.msra.mxu0 %v2732_v41 }
 0x7d1   : > { %2722 = vmatmul.mubr.msk.f32.vlgmr.msra.gmra.mrb[4].mxu0 %vm2574_vm14, %v2573_v45 }
 0x8a4   : > { %v2644_v17 = vpop.f32.mrb[4].mxu0 }
 0x8a5   : > { %v2649_v7 = vadd.f32 %v2644_v17, %v6279_v33  ;;  %v2646_v12 = vpop.f32.mrb[5].mxu0 }
 0x8a6   : > { %v2650_v39 = vadd.f32 %v2646_v12, %v6280_v27  ;;  %64 = sbr.rel (!%p62_p2) target bundleno = 38 (0x26), region = 100 }
 0x8a7   : > { %v2655_v55 = vadd.f32 %v2653_v56, %v2649_v7 }
 0x8a8   : > { %v2656_v13 = vadd.f32 %v2653_v56, %v2650_v39 }
 0x8a9   : > { %v2657_v23 = vadd.f32 %v3029_v30, %v2655_v55 }
 0x8aa   : > { %v2658_v62 = vadd.f32 %v3030_v24, %v2656_v13 }
 0x8ab   : > { %2661 = vst [vmem:[%s2660_s20] sm:$0xff] %v2657_v23 }
 0x8ac   : > { %2662 = vst [vmem:[%s2660_s20 + $0x8] sm:$0xff] %v2658_v62 }
 0x8ad   :  { %3086 = shalt.err (!%p3083_p7)
}
 0x8ae   :  { %s3087_s6 = scalar_lea.hbm %s5844_s10, 2048 }
 0x8af   :  { %p3088_p8 = scmp.ne.s32.totalorder %s5844_s10, %s3087_s6  ;;  %p3091_p9 = scmp.lt.u32.totalorder %s3087_s6, %s5844_s10 }
 0x8b1   :  { %p3093_p10 = pnand %p3091_p9, %p3088_p8 }
 0x8b3   :  { %3096 = shalt.err (!%p3093_p10)
}
 0x8b4   :  { %s3257_s0 = smov 256   ;;  %s3258_s1 = smov 16  }
 0x8b5   :  { %2674 = dma.vmem_to_hbm [thread:$0]  %s2669_s13, 2048, %s5844_s10, [#allocation4], %s3257_s0, %s3257_s0, %s3258_s1  }
 0x8b6   :  { %3105 = dma.done.wait [#allocation4], 2048  }
 0x8b7   :  { %3106 = vsyncadd [#allocation4], 4294965248 }
 0x8b8   :  { %2678 = vsyncpa [#allocation3], 1 }
 0x8b9   :  { %2679 = vsyncpa [#allocation6], 1 }
 0x8ba   :  { %2680 = vsyncpa [#allocation4], 1 }

</bundles_post_ra>
